<compile_context>
chip_gen: v7x
topology: tpu7x:2x2x1
jax: 0.10.0
libtpu: 0.0.40
codegen_flags: <defaults>
</compile_context>

<pallas_src>
import jax
import jax.numpy as jnp
from jax.experimental import pallas as pl
from jax.experimental.pallas import tpu as pltpu

# ----------------------------- small config ---------------------------------
D_HET_LATENT = 8
D_HET_WEIGHTS = 16
D_ACTION = 4
D_BELIEFS = 4
D_COMM_STATE = 4
D_MESSAGE = 4
D_RELATION = 4
BATCH = 2
HIDDEN = (128, 256, 512)

# (head name, true output width) in the order they are stacked on the head axis.
HEAD_SPECS = (
    ("p_w", D_HET_WEIGHTS * D_ACTION),      ("p_b", D_ACTION),
    ("b_w", D_HET_WEIGHTS * D_BELIEFS),     ("b_b", D_BELIEFS),
    ("e_w", D_HET_WEIGHTS * D_COMM_STATE),  ("e_b", D_COMM_STATE),
    ("f_w", D_HET_WEIGHTS * D_MESSAGE),     ("f_b", D_MESSAGE),
    ("d_w", D_HET_WEIGHTS * D_COMM_STATE),  ("d_b", D_COMM_STATE),
    ("um_w", D_HET_WEIGHTS * D_RELATION),   ("um_b", D_RELATION),
    ("us_w", D_HET_WEIGHTS * D_RELATION),   ("us_b", D_RELATION),
)
NUM_HEADS = len(HEAD_SPECS)                      # 14
PAD_OUT = max(d for _, d in HEAD_SPECS)          # 64 (widest real head; was 128)
HEADS_PER_STEP = 7                               # G heads per grid step -> grid=(2,)
assert NUM_HEADS % HEADS_PER_STEP == 0


# ------------------------------ Pallas kernel --------------------------------
def mlp4_group_kernel(lv_ref, w1_ref, b1_ref, w2_ref, b2_ref,
                      w3_ref, b3_ref, w4_ref, b4_ref, o_ref):
    """One grid step == one group of G heads: fused (Linear+ReLU) x3 -> Linear."""
    g = w1_ref.shape[0]
    x = lv_ref[...].astype(jnp.bfloat16)                         # (B, 8)
    xg = jnp.broadcast_to(x[None, :, :], (g,) + x.shape)         # (G, B, 8)

    h = jnp.einsum('gbk,gkn->gbn', xg, w1_ref[...],
                   preferred_element_type=jnp.float32) + b1_ref[...]
    h = jnp.maximum(h, 0.0).astype(jnp.bfloat16)
    h = jnp.einsum('gbk,gkn->gbn', h, w2_ref[...],
                   preferred_element_type=jnp.float32) + b2_ref[...]
    h = jnp.maximum(h, 0.0).astype(jnp.bfloat16)
    h = jnp.einsum('gbk,gkn->gbn', h, w3_ref[...],
                   preferred_element_type=jnp.float32) + b3_ref[...]
    h = jnp.maximum(h, 0.0).astype(jnp.bfloat16)
    out = jnp.einsum('gbk,gkn->gbn', h, w4_ref[...],
                     preferred_element_type=jnp.float32) + b4_ref[...]
    o_ref[...] = out.astype(o_ref.dtype)                         # (G, B, PAD_OUT)


def fused_heads(lv, stacked):
    """Run all 14 head-MLPs in one grid-pipelined pallas_call (G heads per step).

    Returns a (NUM_HEADS, batch, PAD_OUT) f32 slab; real columns are sliced by caller.
    """
    w1, b1, w2, b2, w3, b3, w4, b4 = stacked
    batch = lv.shape[0]
    g = HEADS_PER_STEP
    n_steps = NUM_HEADS // g

    weight_elems = (D_HET_LATENT * HIDDEN[0] + HIDDEN[0] * HIDDEN[1]
                    + HIDDEN[1] * HIDDEN[2] + HIDDEN[2] * PAD_OUT)
    bias_elems = HIDDEN[0] + HIDDEN[1] + HIDDEN[2] + PAD_OUT
    bytes_accessed = (NUM_HEADS * (weight_elems * 2 + bias_elems * 4)   # bf16 W, f32 b
                      + lv.size * 4 + NUM_HEADS * batch * PAD_OUT * 4)  # lv + output
    cost = pl.CostEstimate(flops=2 * batch * weight_elems * NUM_HEADS,
                           transcendentals=0,
                           bytes_accessed=bytes_accessed)

    grid_spec = pltpu.PrefetchScalarGridSpec(
        num_scalar_prefetch=0,
        grid=(n_steps,),
        in_specs=[
            # lv stays resident across the whole grid.
            pl.BlockSpec((batch, D_HET_LATENT), lambda i: (0, 0)),
            # group-of-heads weights / biases, pipelined along the grid.
            pl.BlockSpec((g, D_HET_LATENT, HIDDEN[0]), lambda i: (i, 0, 0)),
            pl.BlockSpec((g, 1, HIDDEN[0]), lambda i: (i, 0, 0)),
            pl.BlockSpec((g, HIDDEN[0], HIDDEN[1]), lambda i: (i, 0, 0)),
            pl.BlockSpec((g, 1, HIDDEN[1]), lambda i: (i, 0, 0)),
            pl.BlockSpec((g, HIDDEN[1], HIDDEN[2]), lambda i: (i, 0, 0)),
            pl.BlockSpec((g, 1, HIDDEN[2]), lambda i: (i, 0, 0)),
            pl.BlockSpec((g, HIDDEN[2], PAD_OUT), lambda i: (i, 0, 0)),
            pl.BlockSpec((g, 1, PAD_OUT), lambda i: (i, 0, 0)),
        ],
        out_specs=pl.BlockSpec((g, batch, PAD_OUT), lambda i: (i, 0, 0)),
    )

    return pl.pallas_call(
        mlp4_group_kernel,
        out_shape=jax.ShapeDtypeStruct((NUM_HEADS, batch, PAD_OUT), jnp.float32),
        grid_spec=grid_spec,
        compiler_params=pltpu.CompilerParams(
            dimension_semantics=("parallel",)),   # groups independent; megacore shard
        cost_estimate=cost,
    )(lv, w1, b1, w2, b2, w3, b3, w4, b4)


# ------------------------- parameter construction ----------------------------
def make_net_params(key, dims):
    """Deterministic f32 params for make_net([d_in, 128, 256, 512, d_out])."""
    params = []
    for din, dout in zip(dims[:-1], dims[1:]):
        key, kw, kb = jax.random.split(key, 3)
        bound = 1.0 / (din ** 0.5)
        w = jax.random.uniform(kw, (din, dout), jnp.float32, -bound, bound)
        b = jax.random.uniform(kb, (1, dout), jnp.float32, -bound, bound)
        params.append((w, b))
    return params, key


def build_latent_decoder_params(key):
    nets = {}
    for name, d_out in HEAD_SPECS:
        dims = [D_HET_LATENT, *HIDDEN, d_out]
        nets[name], key = make_net_params(key, dims)
    return nets


def stack_head_params(nets):
    """Stack per-layer params across the 14 heads; weights in bf16, biases f32.

    The final layer is zero-padded to PAD_OUT (=64) columns so all heads share a
    block shape; padded columns are sliced off by the caller.
    NOTE: weights generated here are (d_in, d_out); real PyTorch nn.Linear weights
    (shape (out, in)) must be transposed before stacking."""
    names = [name for name, _ in HEAD_SPECS]

    def stack_layer(layer_idx, pad_to=None):
        ws, bs = [], []
        for n in names:
            w, b = nets[n][layer_idx]
            if pad_to is not None:
                pad = pad_to - w.shape[1]
                w = jnp.pad(w, ((0, 0), (0, pad)))
                b = jnp.pad(b, ((0, 0), (0, pad)))
            ws.append(w)
            bs.append(b)
        return jnp.stack(ws).astype(jnp.bfloat16), jnp.stack(bs)  # bf16 W, f32 b

    w1, b1 = stack_layer(0)
    w2, b2 = stack_layer(1)
    w3, b3 = stack_layer(2)
    w4, b4 = stack_layer(3, pad_to=PAD_OUT)
    return (w1, b1, w2, b2, w3, b3, w4, b4)


# ------------------------------- forward -------------------------------------
def latent_decoder_forward(stacked, lv):
    raw = fused_heads(lv, stacked)  # (14, batch, 64) f32

    outs = {}
    for i, (name, d_out) in enumerate(HEAD_SPECS):
        outs[name] = raw[i, :, :d_out]   # drop zero-padded columns

    def wh(name, d_x):
        return outs[name].reshape((-1, d_x, D_HET_WEIGHTS))

    whp, bp = wh("p_w", D_ACTION), outs["p_b"]
    whb, bb = wh("b_w", D_BELIEFS), outs["b_b"]
    whe, be = wh("e_w", D_COMM_STATE), outs["e_b"]
    whf, bf = wh("f_w", D_MESSAGE), outs["f_b"]
    whd, bd = wh("d_w", D_COMM_STATE), outs["d_b"]
    whum, bum = wh("um_w", D_RELATION), outs["um_b"]
    whus, bus = wh("us_w", D_RELATION), outs["us_b"]
    return ((whp, bp), (whb, bb), (whe, be), (whf, bf), (whd, bd),
            (whum, bum, whus, bus))


# ------------------------------- reference -----------------------------------
def mlp_ref(lv, params):
    """Pure-JAX reference using the same bf16-weight / f32-accumulate arithmetic."""
    h = lv
    for i, (w, b) in enumerate(params):
        h = jnp.dot(h.astype(jnp.bfloat16), w.astype(jnp.bfloat16),
                    preferred_element_type=jnp.float32) + b
        if i < len(params) - 1:
            h = jnp.maximum(h, 0.0)
    return h


# --------------------------------- main ---------------------------------------
if __name__ == "__main__":
    key = jax.random.PRNGKey(0)
    key, klv = jax.random.split(key)
    lv = jax.random.normal(klv, (BATCH, D_HET_LATENT), dtype=jnp.float32)

    nets = build_latent_decoder_params(key)
    stacked = stack_head_params(nets)

    out = latent_decoder_forward(stacked, lv)
    out = jax.block_until_ready(out)

    # --- correctness: every head against a pure-JAX reference (same bf16 arithmetic)
    raw = jax.block_until_ready(fused_heads(lv, stacked))  # (14, B, 64)
    for i, (name, d_out) in enumerate(HEAD_SPECS):
        ref = mlp_ref(lv, nets[name])
        got = raw[i, :, :d_out]
        assert jnp.allclose(got, ref, atol=1e-2, rtol=1e-2), f"head {name} mismatch"

    # --- shape checks matching the PyTorch forward
    assert out[0][0].shape == (BATCH, D_ACTION, D_HET_WEIGHTS)
    assert out[0][1].shape == (BATCH, D_ACTION)
    assert out[1][0].shape == (BATCH, D_BELIEFS, D_HET_WEIGHTS)
    assert out[2][0].shape == (BATCH, D_COMM_STATE, D_HET_WEIGHTS)
    assert out[3][0].shape == (BATCH, D_MESSAGE, D_HET_WEIGHTS)
    assert out[4][0].shape == (BATCH, D_COMM_STATE, D_HET_WEIGHTS)
    assert out[5][0].shape == (BATCH, D_RELATION, D_HET_WEIGHTS)
    assert out[5][1].shape == (BATCH, D_RELATION)
    assert out[5][2].shape == (BATCH, D_RELATION, D_HET_WEIGHTS)
    assert out[5][3].shape == (BATCH, D_RELATION)

    print("KERNEL_OK")
</pallas_src>

<mosaic_0001>
module attributes {stable_mosaic.version = 11 : i64} {
  func.func @mlp4_group_kernel(%arg0: i32, %arg1: memref<2x8xf32, #tpu.memory_space<vmem>>, %arg2: memref<7x8x128xbf16, #tpu.memory_space<vmem>>, %arg3: memref<7x1x128xf32, #tpu.memory_space<vmem>>, %arg4: memref<7x128x256xbf16, #tpu.memory_space<vmem>>, %arg5: memref<7x1x256xf32, #tpu.memory_space<vmem>>, %arg6: memref<7x256x512xbf16, #tpu.memory_space<vmem>>, %arg7: memref<7x1x512xf32, #tpu.memory_space<vmem>>, %arg8: memref<7x512x64xbf16, #tpu.memory_space<vmem>>, %arg9: memref<7x1x64xf32, #tpu.memory_space<vmem>>, %arg10: memref<7x2x64xf32, #tpu.memory_space<vmem>>) attributes {dimension_semantics = [#tpu.dimension_semantics<parallel>], iteration_bounds = array<i64: 2>, scalar_prefetch = 0 : i64, scratch_operands = 0 : i64, tpu.core_type = #tpu.core_type<tc>, window_params = [{pipeline_mode = #tpu.pipeline_mode<synchronous>, transform_indices = @transform_0, window_bounds = array<i64: 2, 8>}, {transform_indices = @transform_1, window_bounds = array<i64: 7, 8, 128>}, {transform_indices = @transform_2, window_bounds = array<i64: 7, 1, 128>}, {transform_indices = @transform_3, window_bounds = array<i64: 7, 128, 256>}, {transform_indices = @transform_4, window_bounds = array<i64: 7, 1, 256>}, {transform_indices = @transform_5, window_bounds = array<i64: 7, 256, 512>}, {transform_indices = @transform_6, window_bounds = array<i64: 7, 1, 512>}, {transform_indices = @transform_7, window_bounds = array<i64: 7, 512, 64>}, {transform_indices = @transform_8, window_bounds = array<i64: 7, 1, 64>}, {transform_indices = @transform_9, window_bounds = array<i64: 7, 2, 64>}]} {
    %c0 = arith.constant 0 : index
    %c0_0 = arith.constant 0 : index
    %0 = vector.load %arg1[%c0, %c0_0] : memref<2x8xf32, #tpu.memory_space<vmem>>, vector<2x8xf32>
    %1 = arith.truncf %0 : vector<2x8xf32> to vector<2x8xbf16>
    %2 = vector.shape_cast %1 : vector<2x8xbf16> to vector<1x2x8xbf16>
    %3 = vector.shape_cast %2 : vector<1x2x8xbf16> to vector<1x2x8xbf16>
    %4 = vector.broadcast %3 : vector<1x2x8xbf16> to vector<7x2x8xbf16>
    %c0_1 = arith.constant 0 : index
    %c0_2 = arith.constant 0 : index
    %c0_3 = arith.constant 0 : index
    %5 = vector.load %arg2[%c0_1, %c0_2, %c0_3] : memref<7x8x128xbf16, #tpu.memory_space<vmem>>, vector<7x8x128xbf16>
    "tpu.trace_start"() <{level = 10 : i32, message = "gbk,gkn->gbn"}> : () -> ()
    %cst = arith.constant dense<0.000000e+00> : vector<7x2x128xf32>
    %6 = tpu.matmul %4, %5, %cst {dimension_numbers = #tpu.dot_dimension_numbers<[2], [1], [1], [2], [0, 0, 0, 1, 1, 2], [0], [0]>} : vector<7x2x8xbf16>, vector<7x8x128xbf16>, vector<7x2x128xf32> -> vector<7x2x128xf32>
    "tpu.trace_stop"() : () -> ()
    %c0_4 = arith.constant 0 : index
    %c0_5 = arith.constant 0 : index
    %c0_6 = arith.constant 0 : index
    %7 = vector.load %arg3[%c0_4, %c0_5, %c0_6] : memref<7x1x128xf32, #tpu.memory_space<vmem>>, vector<7x1x128xf32>
    %8 = vector.broadcast %7 : vector<7x1x128xf32> to vector<7x2x128xf32>
    %9 = arith.addf %6, %8 : vector<7x2x128xf32>
    %cst_7 = arith.constant 0.000000e+00 : f32
    %10 = vector.broadcast %cst_7 : f32 to vector<7x2x128xf32>
    %11 = arith.maximumf %9, %10 : vector<7x2x128xf32>
    %12 = arith.truncf %11 : vector<7x2x128xf32> to vector<7x2x128xbf16>
    %c0_8 = arith.constant 0 : index
    %c0_9 = arith.constant 0 : index
    %c0_10 = arith.constant 0 : index
    %13 = vector.load %arg4[%c0_8, %c0_9, %c0_10] : memref<7x128x256xbf16, #tpu.memory_space<vmem>>, vector<7x128x256xbf16>
    "tpu.trace_start"() <{level = 10 : i32, message = "gbk,gkn->gbn"}> : () -> ()
    %cst_11 = arith.constant dense<0.000000e+00> : vector<7x2x256xf32>
    %14 = tpu.matmul %12, %13, %cst_11 {dimension_numbers = #tpu.dot_dimension_numbers<[2], [1], [1], [2], [0, 0, 0, 1, 1, 2], [0], [0]>} : vector<7x2x128xbf16>, vector<7x128x256xbf16>, vector<7x2x256xf32> -> vector<7x2x256xf32>
    "tpu.trace_stop"() : () -> ()
    %c0_12 = arith.constant 0 : index
    %c0_13 = arith.constant 0 : index
    %c0_14 = arith.constant 0 : index
    %15 = vector.load %arg5[%c0_12, %c0_13, %c0_14] : memref<7x1x256xf32, #tpu.memory_space<vmem>>, vector<7x1x256xf32>
    %16 = vector.broadcast %15 : vector<7x1x256xf32> to vector<7x2x256xf32>
    %17 = arith.addf %14, %16 : vector<7x2x256xf32>
    %cst_15 = arith.constant 0.000000e+00 : f32
    %18 = vector.broadcast %cst_15 : f32 to vector<7x2x256xf32>
    %19 = arith.maximumf %17, %18 : vector<7x2x256xf32>
    %20 = arith.truncf %19 : vector<7x2x256xf32> to vector<7x2x256xbf16>
    %c0_16 = arith.constant 0 : index
    %c0_17 = arith.constant 0 : index
    %c0_18 = arith.constant 0 : index
    %21 = vector.load %arg6[%c0_16, %c0_17, %c0_18] : memref<7x256x512xbf16, #tpu.memory_space<vmem>>, vector<7x256x512xbf16>
    "tpu.trace_start"() <{level = 10 : i32, message = "gbk,gkn->gbn"}> : () -> ()
    %cst_19 = arith.constant dense<0.000000e+00> : vector<7x2x512xf32>
    %22 = tpu.matmul %20, %21, %cst_19 {dimension_numbers = #tpu.dot_dimension_numbers<[2], [1], [1], [2], [0, 0, 0, 1, 1, 2], [0], [0]>} : vector<7x2x256xbf16>, vector<7x256x512xbf16>, vector<7x2x512xf32> -> vector<7x2x512xf32>
    "tpu.trace_stop"() : () -> ()
    %c0_20 = arith.constant 0 : index
    %c0_21 = arith.constant 0 : index
    %c0_22 = arith.constant 0 : index
    %23 = vector.load %arg7[%c0_20, %c0_21, %c0_22] : memref<7x1x512xf32, #tpu.memory_space<vmem>>, vector<7x1x512xf32>
    %24 = vector.broadcast %23 : vector<7x1x512xf32> to vector<7x2x512xf32>
    %25 = arith.addf %22, %24 : vector<7x2x512xf32>
    %cst_23 = arith.constant 0.000000e+00 : f32
    %26 = vector.broadcast %cst_23 : f32 to vector<7x2x512xf32>
    %27 = arith.maximumf %25, %26 : vector<7x2x512xf32>
    %28 = arith.truncf %27 : vector<7x2x512xf32> to vector<7x2x512xbf16>
    %c0_24 = arith.constant 0 : index
    %c0_25 = arith.constant 0 : index
    %c0_26 = arith.constant 0 : index
    %29 = vector.load %arg8[%c0_24, %c0_25, %c0_26] : memref<7x512x64xbf16, #tpu.memory_space<vmem>>, vector<7x512x64xbf16>
    "tpu.trace_start"() <{level = 10 : i32, message = "gbk,gkn->gbn"}> : () -> ()
    %cst_27 = arith.constant dense<0.000000e+00> : vector<7x2x64xf32>
    %30 = tpu.matmul %28, %29, %cst_27 {dimension_numbers = #tpu.dot_dimension_numbers<[2], [1], [1], [2], [0, 0, 0, 1, 1, 2], [0], [0]>} : vector<7x2x512xbf16>, vector<7x512x64xbf16>, vector<7x2x64xf32> -> vector<7x2x64xf32>
    "tpu.trace_stop"() : () -> ()
    %c0_28 = arith.constant 0 : index
    %c0_29 = arith.constant 0 : index
    %c0_30 = arith.constant 0 : index
    %31 = vector.load %arg9[%c0_28, %c0_29, %c0_30] : memref<7x1x64xf32, #tpu.memory_space<vmem>>, vector<7x1x64xf32>
    %32 = vector.broadcast %31 : vector<7x1x64xf32> to vector<7x2x64xf32>
    %33 = arith.addf %30, %32 : vector<7x2x64xf32>
    %c0_31 = arith.constant 0 : index
    %c0_32 = arith.constant 0 : index
    %c0_33 = arith.constant 0 : index
    %34 = vector.load %arg10[%c0_31, %c0_32, %c0_33] : memref<7x2x64xf32, #tpu.memory_space<vmem>>, vector<7x2x64xf32>
    tpu.vector_store %arg10[%c0_31, %c0_32, %c0_33], %33 {strides = array<i32>} : memref<7x2x64xf32, #tpu.memory_space<vmem>>, vector<7x2x64xf32>,
    return
  }
  func.func @transform_0(%arg0: i32) -> (i32, i32) {
    %c0_i32 = arith.constant 0 : i32
    %c0_i32_0 = arith.constant 0 : i32
    %c0_i32_1 = arith.constant 0 : i32
    return %c0_i32, %c0_i32_0 : i32, i32
  }
  func.func @transform_1(%arg0: i32) -> (i32, i32, i32) {
    %c0_i32 = arith.constant 0 : i32
    %c0_i32_0 = arith.constant 0 : i32
    %c0_i32_1 = arith.constant 0 : i32
    return %arg0, %c0_i32, %c0_i32_0 : i32, i32, i32
  }
  func.func @transform_2(%arg0: i32) -> (i32, i32, i32) {
    %c0_i32 = arith.constant 0 : i32
    %c0_i32_0 = arith.constant 0 : i32
    %c0_i32_1 = arith.constant 0 : i32
    return %arg0, %c0_i32, %c0_i32_0 : i32, i32, i32
  }
  func.func @transform_3(%arg0: i32) -> (i32, i32, i32) {
    %c0_i32 = arith.constant 0 : i32
    %c0_i32_0 = arith.constant 0 : i32
    %c0_i32_1 = arith.constant 0 : i32
    return %arg0, %c0_i32, %c0_i32_0 : i32, i32, i32
  }
  func.func @transform_4(%arg0: i32) -> (i32, i32, i32) {
    %c0_i32 = arith.constant 0 : i32
    %c0_i32_0 = arith.constant 0 : i32
    %c0_i32_1 = arith.constant 0 : i32
    return %arg0, %c0_i32, %c0_i32_0 : i32, i32, i32
  }
  func.func @transform_5(%arg0: i32) -> (i32, i32, i32) {
    %c0_i32 = arith.constant 0 : i32
    %c0_i32_0 = arith.constant 0 : i32
    %c0_i32_1 = arith.constant 0 : i32
    return %arg0, %c0_i32, %c0_i32_0 : i32, i32, i32
  }
  func.func @transform_6(%arg0: i32) -> (i32, i32, i32) {
    %c0_i32 = arith.constant 0 : i32
    %c0_i32_0 = arith.constant 0 : i32
    %c0_i32_1 = arith.constant 0 : i32
    return %arg0, %c0_i32, %c0_i32_0 : i32, i32, i32
  }
  func.func @transform_7(%arg0: i32) -> (i32, i32, i32) {
    %c0_i32 = arith.constant 0 : i32
    %c0_i32_0 = arith.constant 0 : i32
    %c0_i32_1 = arith.constant 0 : i32
    return %arg0, %c0_i32, %c0_i32_0 : i32, i32, i32
  }
  func.func @transform_8(%arg0: i32) -> (i32, i32, i32) {
    %c0_i32 = arith.constant 0 : i32
    %c0_i32_0 = arith.constant 0 : i32
    %c0_i32_1 = arith.constant 0 : i32
    return %arg0, %c0_i32, %c0_i32_0 : i32, i32, i32
  }
  func.func @transform_9(%arg0: i32) -> (i32, i32, i32) {
    %c0_i32 = arith.constant 0 : i32
    %c0_i32_0 = arith.constant 0 : i32
    %c0_i32_1 = arith.constant 0 : i32
    return %arg0, %c0_i32, %c0_i32_0 : i32, i32, i32
  }
}

</mosaic_0001>

<bundles_post_ra>
// kernel: tpu_custom_call.1
= control target key start
LH: loop header
LB: loop body
LE: loop exit
PB: predicated region body
PF: predicated region fallthrough
CT: control target
= control target key end

     0   :  { %s12561_s0 = inlined_call_operand.hbm [shape: f32[2,8], index: 0, kind: input, shape index: {}]   ;;  %s12562_s1 = inlined_call_operand.hbm [shape: bf16[14,8,128], index: 1, kind: input, shape index: {}]   ;;  %s12563_s2 = inlined_call_operand.hbm [shape: f32[14,1,128], index: 2, kind: input, shape index: {}]   ;;  %s12564_s3 = inlined_call_operand.hbm [shape: bf16[14,128,256], index: 3, kind: input, shape index: {}]   ;;  %s12565_s4 = inlined_call_operand.hbm [shape: f32[14,1,256], index: 4, kind: input, shape index: {}]   ;;  %s12566_s5 = inlined_call_operand.hbm [shape: bf16[14,256,512], index: 5, kind: input, shape index: {}]   ;;  %s12567_s6 = inlined_call_operand.hbm [shape: f32[14,1,512], index: 6, kind: input, shape index: {}]   ;;  %s12568_s7 = inlined_call_operand.vmem [shape: bf16[14,512,64], index: 7, kind: input, shape index: {}]   ;;  %s12569_s8 = inlined_call_operand.hbm [shape: f32[14,1,64], index: 8, kind: input, shape index: {}]   ;;  %s12570_s9 = inlined_call_operand.hbm [shape: f32[14,2,64], index: 9, kind: output, shape index: {}]  }
   0x1   :  { %12597 = sst [smem:[#allocation28_spill]] %s12562_s1 }
   0x2   :  { %12598 = sst [smem:[#allocation29_spill]] %s12564_s3 }
   0x3   :  { %12599 = sst [smem:[#allocation30_spill]] %s12566_s5 }
   0x4   :  { %14 = vsyncpa [#allocation3], 0 }
   0x5   :  { %15 = vsyncpa [#allocation6], 0 }
   0x6   :  { %17 = vsyncpa [#allocation6 + $0x1], 0 }
   0x7   :  { %18 = vsyncpa [#allocation9], 0 }
   0x8   :  { %20 = vsyncpa [#allocation9 + $0x1], 0 }
   0x9   :  { %21 = vsyncpa [#allocation12], 0 }
   0xa   :  { %23 = vsyncpa [#allocation12 + $0x1], 0 }
   0xb   :  { %24 = vsyncpa [#allocation15], 0 }
   0xc   :  { %26 = vsyncpa [#allocation15 + $0x1], 0 }
   0xd   :  { %27 = vsyncpa [#allocation4], 0 }
   0xe   :  { %29 = vsyncpa [#allocation4 + $0x1], 0  ;;  %s10983_s30 = smov 0   ;;  %s10985_s10 = smov 0  }
   0xf   :  { %s10987_s11 = smov 0   ;;  %s10989_s12 = smov 0  }
  0x10 LB: > { %12600 = sst [smem:[#allocation23_spill]] %s10896_s30  ;;  %s11004_s13 = sadd.s32 1, %s10908_s12   ;;  %s10908_s12 = sphi %s10989_s12, %s12638_s12   ;;  %s10904_s11 = sphi %s10987_s11, %s12640_s11   ;;  %s10900_s10 = sphi %s10985_s10, %s12642_s10   ;;  %s10896_s30 = sphi %s10983_s30, %s12641_s30  }
  0x11   : > { %12601 = sst [smem:[#allocation24_spill]] %s10904_s11  ;;  %s63_s14 = sadd.s32 1, %s10904_s11 }
  0x12   : > { %12602 = sst [smem:[#allocation25_spill]] %s11004_s13  ;;  %s60_s15 = ssub.s32 %s10908_s12, %s11004_s13 }
  0x13   : > { %p12572_p0 = scmp.ne.s32.totalorder %s10904_s11, %s10900_s10  ;;  %p61_p1 = scmp.eq.s32.totalorder %s60_s15, 0 }
  0x14   : > { %p71_p2 = scmp.eq.s32.totalorder %s10908_s12, 0  ;;  %p9474_p4 = scmp.lt.s32.totalorder %s10908_s12, 2 }
  0x15   : > { %s11015_s16 = scalar_select %p61_p1, %s10904_s11, %s63_s14  }
  0x16   : > { %p72_p5 = por %p71_p2, %p12572_p0  ;;  %s11021_s17 = sand.u32 1, %s10908_s12  }
  0x17   : > { %12603 = sst [smem:[#allocation26_spill]] %s11015_s16  ;;  %s11024_s18 = sand.u32 1, %s10904_s11  }
  0x18   : > { %s12571_s19 = smul.u32 28, %s11024_s18  ;;  %p11027_p6 = pnand %p9474_p4, %p72_p5 }
  0x19   : > { %s12573_s21 = smul.u32 448, %s10908_s12  ;;  %s12605_s1 = sld [smem:[#allocation28_spill]] }
  0x1a   : > { %s12604_s20 = scalar_select %p11027_p6, 1, 0 }
  0x1b   : > { %s323_s25 = scalar_lea.vmem [#allocation5], %s12571_s19  ;;  %s12578_s27 = scalar_lea.sflag [#allocation6], %s11021_s17 }
  0x1c   : > { %s330_s26 = sshll.u32 %s323_s25, 4  ;;  %p11048_p8 = pneg %p11027_p6  ;;  %s11041_s26 = int_to_ptr.vmem [resolvable:$true] %s330_s26 }
  0x1e   : > { %s12606_s29 = scalar_select %p11048_p8, 1, 0 }
  0x1f   : > { %s11037_s24 = scalar_lea.hbm %s12605_s1, %s12573_s21  ;;  %s10593_s22 = scalar_lea.hbm %s12605_s1, 896 }
  0x20   : > { %s10588_s28 = scalar_lea.hbm %s11037_s24, 448  ;;  %p10594_p11 = scmp.lt.u32.totalorder %s11037_s24, %s12605_s1 }
  0x21   : > { %p10589_p7 = scmp.ne.s32.totalorder %s11037_s24, %s10588_s28  ;;  %p10595_p12 = scmp.lt.u32.totalorder %s10593_s22, %s10588_s28 }
  0x22   : > { %p10597_p1 = scmp.lt.u32.totalorder %s10588_s28, %s11037_s24 }
  0x23   : > { %p10591_p9 = pnand %p11048_p8, %p10589_p7  ;;  %p10596_p13 = por %p10595_p12, %p10594_p11 }
  0x25   : > { %p10592_p10 = pneg %p10591_p9  ;;  %p10598_p2 = por %p10597_p1, %p10596_p13 }
  0x27   : > { %p10599_p4 = pnand %p10598_p2, %p10592_p10 }
  0x29   : > { %10602 = shalt.err (!%p10599_p4)
}
  0x2a   : > { %s10603_s19 = scalar_lea.vmem %s11041_s26, 448  ;;  %s10910_s14 = smov [#allocation5]  }
  0x2b   : > { %p10604_p5 = scmp.ne.s32.totalorder %s11041_s26, %s10603_s19  ;;  %s10608_s15 = sshll.u32 %s10910_s14, 4  ;;  %s10609_s15 = int_to_ptr.vmem [resolvable:$false] %s10608_s15 }
  0x2c   : > { %s10610_s23 = scalar_lea.vmem %s10609_s15, 896  ;;  %p10611_p3 = scmp.lt.s32.totalorder %s11041_s26, %s10609_s15 }
  0x2d   : > { %p10606_p7 = pnand %p10604_p5, %p11048_p8  ;;  %p10612_p0 = scmp.lt.s32.totalorder %s10610_s23, %s10603_s19 }
  0x2f   : > { %p10607_p9 = pneg %p10606_p7  ;;  %p10613_p11 = por %p10612_p0, %p10611_p3 }
  0x31   : > { %p10614_p12 = pnand %p10613_p11, %p10607_p9 }
  0x33   : > { %10617 = shalt.err (!%p10614_p12)
}
  0x34   : > { %s12576_s28 = smov 64   ;;  %s12577_s22 = smov 4  }
  0x35   : > { %9450 = dma.hbm_to_vmem [thread:$0]  (!%p11027_p6), %s11037_s24, 448, %s11041_s26, %s12578_s27, %s12576_s28, %s12576_s28, %s12577_s22  }
  0x36   : > { %s9413_s19 = smul.u32 896, %s11024_s18  ;;  %s12607_s3 = sld [smem:[#allocation29_spill]] }
  0x37   : > { %s9043_s25 = smul.u32 14336, %s10908_s12  ;;  %s12580_s16 = scalar_lea.sflag [#allocation9], %s11021_s17 }
  0x38   : > { %s365_s21 = scalar_lea.vmem [#allocation8], %s9413_s19 }
  0x39   : > { %s373_s1 = sshll.u32 %s365_s21, 4  ;;  %s11083_s1 = int_to_ptr.vmem [resolvable:$true] %s373_s1 }
  0x3c   : > { %s11081_s23 = scalar_lea.hbm %s12607_s3, %s9043_s25  ;;  %s10623_s14 = scalar_lea.hbm %s12607_s3, 28672 }
  0x3d   : > { %s10618_s13 = scalar_lea.hbm %s11081_s23, 14336  ;;  %p10624_p13 = scmp.lt.u32.totalorder %s11081_s23, %s12607_s3 }
  0x3e   : > { %p10619_p0 = scmp.ne.s32.totalorder %s11081_s23, %s10618_s13  ;;  %p10625_p1 = scmp.lt.u32.totalorder %s10623_s14, %s10618_s13 }
  0x3f   : > { %p10627_p4 = scmp.lt.u32.totalorder %s10618_s13, %s11081_s23 }
  0x40   : > { %p10621_p3 = pnand %p10619_p0, %p11048_p8  ;;  %p10626_p2 = por %p10625_p1, %p10624_p13 }
  0x42   : > { %p10622_p10 = pneg %p10621_p3  ;;  %p10628_p5 = por %p10627_p4, %p10626_p2 }
  0x44   : > { %p10629_p7 = pnand %p10628_p5, %p10622_p10 }
  0x46   : > { %10632 = shalt.err (!%p10629_p7)
}
  0x47   : > { %s10633_s21 = scalar_lea.vmem %s11083_s1, 14336  ;;  %s10913_s19 = smov [#allocation8]  }
  0x48   : > { %p10634_p9 = scmp.ne.s32.totalorder %s11083_s1, %s10633_s21  ;;  %s10638_s24 = sshll.u32 %s10913_s19, 4  ;;  %s10639_s24 = int_to_ptr.vmem [resolvable:$false] %s10638_s24 }
  0x49   : > { %s10640_s26 = scalar_lea.vmem %s10639_s24, 28672  ;;  %p10641_p0 = scmp.lt.s32.totalorder %s11083_s1, %s10639_s24 }
  0x4a   : > { %p10636_p11 = pnand %p10634_p9, %p11048_p8  ;;  %p10642_p3 = scmp.lt.s32.totalorder %s10640_s26, %s10633_s21 }
  0x4c   : > { %p10637_p12 = pneg %p10636_p11  ;;  %p10643_p13 = por %p10642_p3, %p10641_p0 }
  0x4e   : > { %p10644_p1 = pnand %p10643_p13, %p10637_p12 }
  0x50   : > { %10647 = shalt.err (!%p10644_p1)
}
  0x51   : > { %s10914_s13 = smov 128   ;;  %s10915_s14 = smov 8  }
  0x52   : > { %9456 = dma.hbm_to_vmem [thread:$0]  (!%p11027_p6), %s11081_s23, 14336, %s11083_s1, %s12580_s16, %s10914_s13, %s10914_s13, %s10915_s14  }
  0x53   : > { %s9415_s25 = smul.u32 3584, %s11024_s18  ;;  %s12608_s5 = sld [smem:[#allocation30_spill]] }
  0x54   : > { %s9045_s15 = smul.u32 57344, %s10908_s12  ;;  %s12579_s22 = scalar_lea.sflag [#allocation12], %s11021_s17 }
  0x55   : > { %s409_s26 = scalar_lea.vmem [#allocation11], %s9415_s25 }
  0x56   : > { %s417_s28 = sshll.u32 %s409_s26, 4  ;;  %s11116_s28 = int_to_ptr.vmem [resolvable:$true] %s417_s28 }
  0x59   : > { %s11114_s24 = scalar_lea.hbm %s12608_s5, %s9045_s15  ;;  %s10653_s13 = scalar_lea.hbm %s12608_s5, 114688 }
  0x5a   : > { %s10648_s27 = scalar_lea.hbm %s11114_s24, 57344  ;;  %p10654_p5 = scmp.lt.u32.totalorder %s11114_s24, %s12608_s5 }
  0x5b   : > { %p10649_p10 = scmp.ne.s32.totalorder %s11114_s24, %s10648_s27  ;;  %p10655_p7 = scmp.lt.u32.totalorder %s10653_s13, %s10648_s27 }
  0x5c   : > { %p10657_p11 = scmp.lt.u32.totalorder %s10648_s27, %s11114_s24 }
  0x5d   : > { %p10651_p2 = pnand %p10649_p10, %p11048_p8  ;;  %p10656_p9 = por %p10655_p7, %p10654_p5 }
  0x5f   : > { %p10652_p4 = pneg %p10651_p2  ;;  %p10658_p12 = por %p10657_p11, %p10656_p9 }
  0x61   : > { %p10659_p0 = pnand %p10658_p12, %p10652_p4 }
  0x63   : > { %10662 = shalt.err (!%p10659_p0)
}
  0x64   : > { %s10663_s25 = scalar_lea.vmem %s11116_s28, 57344  ;;  %s10916_s19 = smov [#allocation11]  }
  0x65   : > { %p10664_p3 = scmp.ne.s32.totalorder %s11116_s28, %s10663_s25  ;;  %s10668_s21 = sshll.u32 %s10916_s19, 4  ;;  %s10669_s21 = int_to_ptr.vmem [resolvable:$false] %s10668_s21 }
  0x66   : > { %s10670_s26 = scalar_lea.vmem %s10669_s21, 114688  ;;  %p10671_p10 = scmp.lt.s32.totalorder %s11116_s28, %s10669_s21 }
  0x67   : > { %p10666_p13 = pnand %p10664_p3, %p11048_p8  ;;  %p10672_p2 = scmp.lt.s32.totalorder %s10670_s26, %s10663_s25 }
  0x69   : > { %p10667_p1 = pneg %p10666_p13  ;;  %p10673_p5 = por %p10672_p2, %p10671_p10 }
  0x6b   : > { %p10674_p7 = pnand %p10673_p5, %p10667_p1 }
  0x6d   : > { %10677 = shalt.err (!%p10674_p7)
}
  0x6e   : > { %s10917_s27 = smov 256   ;;  %s12581_s1 = smov 16  }
  0x6f   : > { %9462 = dma.hbm_to_vmem [thread:$0]  (!%p11027_p6), %s11114_s24, 57344, %s11116_s28, %s12579_s22, %s10917_s27, %s10917_s27, %s12581_s1  }
  0x70   : > { %s11144_s23 = sadd.s32 4294967295, %s10908_s12   ;;  %s8203_s13 = sadd.s32 4294967294, %s10908_s12  }
  0x71   : > { %p76_p4 = scmp.ne.s32.totalorder %s10900_s10, %s10896_s30  ;;  %p12588_p9 = scmp.eq.s32.totalorder %s11144_s23, 0 }
  0x72   : > { %p282_p11 = scmp.eq.s32.totalorder %s11144_s23, 1  ;;  %p288_p12 = scmp.eq.s32.totalorder %s8203_s13, 1 }
  0x73   : > { %p11153_p0 = por %p12588_p9, %p76_p4  ;;  %p8204_p3 = scmp.ge.s32.totalorder %s10908_s12, 1 }
  0x74   : > { %p12610_p13 = scmp.ne.s32.totalorder %s10904_s11, %s10900_s10  ;;  %p11165_p10 = por %p288_p12, %p76_p4 }
  0x75   : > { %s12609_s14 = scalar_select %p11153_p0, 1, 0 }
  0x76   : > { %p11161_p1 = por %p282_p11, %p12610_p13  ;;  %p295_p2 = scmp.lt.s32.totalorder %s10908_s12, 3 }
  0x77   : > { %s12612_s24 = scalar_select %p11165_p10, 1, 0 }
  0x78   : > { %s12611_s28 = scalar_select %p11161_p1, 1, 0 }
  0x79   : > { %12613 = sst [smem:[#allocation27_spill]] %s12612_s24  ;;  %s12585_s15 = smul.u32 7, %s11024_s18 }
  0x7a   : > { %p11171_p5 = pnand %p8204_p3, %p295_p2  ;;  %s10919_s19 = smov [#allocation2]  }
  0x7b   : > { %s308_s21 = sshll.u32 %s10919_s19, 4  ;;  %s12587_s26 = smul.u32 112, %s10908_s12  ;;  %s309_s21 = int_to_ptr.vmem [resolvable:$true] %s308_s21 }
  0x7c   : > { %s12614_s25 = scalar_select %p11171_p5, 1, 0 }
  0x7d   : > { %p9443_p7 = pneg %p11171_p5  ;;  %s344_s27 = scalar_lea.vmem [#allocation7], %s12585_s15 }
  0x7e   : > { %s351_s13 = sshll.u32 %s344_s27, 4  ;;  %s11191_s3 = scalar_lea.hbm %s12563_s2, %s12587_s26  ;;  %s11193_s13 = int_to_ptr.vmem [resolvable:$true] %s351_s13 }
  0x7f   : > { %p11182_p4 = pnand %p9443_p7, %p12588_p9  ;;  %s9414_s19 = smul.u32 14, %s11024_s18 }
  0x80   : > { %s9044_s5 = smul.u32 224, %s10908_s12  ;;  %s10678_s27 = scalar_lea.hbm %s12561_s0, 32 }
  0x81   : > { %p10679_p11 = scmp.ne.s32.totalorder %s12561_s0, %s10678_s27  ;;  %p10680_p12 = pneg %p11182_p4 }
  0x82   : > { %p10685_p2 = scmp.lt.u32.totalorder %s10678_s27, %s12561_s0 }
  0x83   : > { %p10681_p3 = pnand %p10680_p12, %p10679_p11 }
  0x85   : > { %p10682_p13 = pneg %p10681_p3 }
  0x87   : > { %p10687_p7 = pnand %p10685_p2, %p10682_p13 }
  0x89   : > { %10690 = shalt.err (!%p10687_p7)
}
  0x8a   : > { %s10691_s26 = scalar_lea.vmem %s309_s21, 32  ;;  %p10699_p0 = scmp.lt.s32.totalorder %s309_s21, %s309_s21 }
  0x8b   : > { %p10692_p9 = scmp.ne.s32.totalorder %s309_s21, %s10691_s26  ;;  %p10700_p5 = scmp.lt.s32.totalorder %s10691_s26, %s10691_s26 }
  0x8d   : > { %p10694_p10 = pnand %p10692_p9, %p10680_p12  ;;  %p10701_p6 = por %p10700_p5, %p10699_p0 }
  0x8f   : > { %p10695_p1 = pneg %p10694_p10 }
  0x91   : > { %p10702_p8 = pnand %p10701_p6, %p10695_p1 }
  0x93   : > { %10705 = shalt.err (!%p10702_p8)
}
  0x94   : > { %9446 = dma.hbm_to_vmem [thread:$0]  (!%p11182_p4), %s12561_s0, 32, %s309_s21, [#allocation3]  }
  0x95   : > { %s10706_s24 = scalar_lea.hbm %s11191_s3, 112  ;;  %p12616_p9 = scmp.ne.s32.totalorder %s12606_s29, 0 }
  0x96   : > { %p10707_p11 = scmp.ne.s32.totalorder %s11191_s3, %s10706_s24  ;;  %s10711_s27 = scalar_lea.hbm %s12563_s2, 224 }
  0x97   : > { %p10712_p6 = scmp.lt.u32.totalorder %s11191_s3, %s12563_s2  ;;  %p10713_p8 = scmp.lt.u32.totalorder %s10711_s27, %s10706_s24 }
  0x98   : > { %p10709_p10 = pnand %p10707_p11, %p12616_p9  ;;  %p10715_p1 = scmp.lt.u32.totalorder %s10706_s24, %s11191_s3 }
  0x99   : > { %p10714_p0 = por %p10713_p8, %p10712_p6 }
  0x9a   : > { %p10710_p12 = pneg %p10709_p10 }
  0x9b   : > { %p10716_p5 = por %p10715_p1, %p10714_p0 }
  0x9d   : > { %p10717_p3 = pnand %p10716_p5, %p10710_p12 }
  0x9f   : > { %10720 = shalt.err (!%p10717_p3)
}
  0xa0   : > { %s10721_s21 = scalar_lea.vmem %s11193_s13, 112  ;;  %s10920_s1 = smov [#allocation7]  }
  0xa1   : > { %p10722_p4 = scmp.ne.s32.totalorder %s11193_s13, %s10721_s21  ;;  %s10726_s30 = sshll.u32 %s10920_s1, 4  ;;  %s10727_s30 = int_to_ptr.vmem [resolvable:$false] %s10726_s30 }
  0xa2   : > { %s10728_s11 = scalar_lea.vmem %s10727_s30, 224  ;;  %p10729_p7 = scmp.lt.s32.totalorder %s11193_s13, %s10727_s30 }
  0xa3   : > { %p10724_p13 = pnand %p10722_p4, %p12616_p9  ;;  %p10730_p11 = scmp.lt.s32.totalorder %s10728_s11, %s10721_s21 }
  0xa5   : > { %p10725_p2 = pneg %p10724_p13  ;;  %p10731_p10 = por %p10730_p11, %p10729_p7 }
  0xa7   : > { %p10732_p6 = pnand %p10731_p10, %p10725_p2 }
  0xa9   : > { %10735 = shalt.err (!%p10732_p6)
}
  0xaa   : > { %s12596_s24 = smov 1   ;;  %p12617_p12 = scmp.ne.s32.totalorder %s12604_s20, 0 }
  0xab   : > { %s12618_s15 = smov 16   ;;  %s12619_s26 = scalar_lea.sflag [#allocation6], %s11021_s17 }
  0xac   : > { %9453 = dma.hbm_to_vmem [thread:$0]  (!%p12617_p12), %s11191_s3, 112, %s11193_s13, %s12619_s26, %s12618_s15, %s12618_s15, %s12596_s24  }
  0xad   : > { %s11244_s22 = scalar_lea.hbm %s12565_s4, %s9044_s5  ;;  %s387_s21 = scalar_lea.vmem [#allocation10], %s9414_s19 }
  0xae   : > { %s395_s1 = sshll.u32 %s387_s21, 4  ;;  %s10736_s30 = scalar_lea.hbm %s11244_s22, 224  ;;  %s11248_s1 = int_to_ptr.vmem [resolvable:$true] %s395_s1 }
  0xaf   : > { %p10737_p8 = scmp.ne.s32.totalorder %s11244_s22, %s10736_s30  ;;  %s10741_s11 = scalar_lea.hbm %s12565_s4, 448 }
  0xb0   : > { %p10742_p5 = scmp.lt.u32.totalorder %s11244_s22, %s12565_s4  ;;  %p10743_p3 = scmp.lt.u32.totalorder %s10741_s11, %s10736_s30 }
  0xb1   : > { %p10739_p0 = pnand %p10737_p8, %p12616_p9  ;;  %p10745_p13 = scmp.lt.u32.totalorder %s10736_s30, %s11244_s22 }
  0xb2   : > { %p10744_p4 = por %p10743_p3, %p10742_p5 }
  0xb3   : > { %p10740_p1 = pneg %p10739_p0 }
  0xb4   : > { %p10746_p2 = por %p10745_p13, %p10744_p4 }
  0xb6   : > { %p10747_p7 = pnand %p10746_p2, %p10740_p1 }
  0xb8   : > { %10750 = shalt.err (!%p10747_p7)
}
  0xb9   : > { %s10751_s19 = scalar_lea.vmem %s11248_s1, 224  ;;  %s10922_s27 = smov [#allocation10]  }
  0xba   : > { %p10752_p11 = scmp.ne.s32.totalorder %s11248_s1, %s10751_s19  ;;  %s10756_s16 = sshll.u32 %s10922_s27, 4  ;;  %s10757_s16 = int_to_ptr.vmem [resolvable:$false] %s10756_s16 }
  0xbb   : > { %s10758_s21 = scalar_lea.vmem %s10757_s16, 448  ;;  %p10759_p8 = scmp.lt.s32.totalorder %s11248_s1, %s10757_s16 }
  0xbc   : > { %p10754_p10 = pnand %p10752_p11, %p12616_p9  ;;  %p10760_p0 = scmp.lt.s32.totalorder %s10758_s21, %s10751_s19 }
  0xbe   : > { %p10755_p6 = pneg %p10754_p10  ;;  %p10761_p5 = por %p10760_p0, %p10759_p8 }
  0xc0   : > { %p10762_p3 = pnand %p10761_p5, %p10755_p6 }
  0xc2   : > { %10765 = shalt.err (!%p10762_p3)
}
  0xc3   : > { %s10923_s30 = smov 32   ;;  %s10924_s3 = smov 2  }
  0xc4   : > { %s12620_s13 = scalar_lea.sflag [#allocation9], %s11021_s17  ;;  %s12621_s11 = smul.u32 448, %s10908_s12 }
  0xc5   : > { %9459 = dma.hbm_to_vmem [thread:$0]  (!%p12617_p12), %s11244_s22, 224, %s11248_s1, %s12620_s13, %s10923_s30, %s10923_s30, %s10924_s3  }
  0xc6   : > { %s11278_s19 = scalar_lea.hbm %s12567_s6, %s12621_s11  ;;  %s12622_s27 = smul.u32 28, %s11024_s18 }
  0xc7   : > { %s10766_s24 = scalar_lea.hbm %s11278_s19, 448  ;;  %s10771_s30 = scalar_lea.hbm %s12567_s6, 896 }
  0xc8   : > { %s431_s16 = scalar_lea.vmem [#allocation13], %s12622_s27  ;;  %p10767_p1 = scmp.ne.s32.totalorder %s11278_s19, %s10766_s24 }
  0xc9   : > { %s439_s21 = sshll.u32 %s431_s16, 4  ;;  %p10772_p2 = scmp.lt.u32.totalorder %s11278_s19, %s12567_s6  ;;  %s11282_s21 = int_to_ptr.vmem [resolvable:$true] %s439_s21 }
  0xca   : > { %p10769_p4 = pnand %p10767_p1, %p12616_p9  ;;  %p10773_p7 = scmp.lt.u32.totalorder %s10771_s30, %s10766_s24 }
  0xcb   : > { %p10775_p10 = scmp.lt.u32.totalorder %s10766_s24, %s11278_s19 }
  0xcc   : > { %p10770_p13 = pneg %p10769_p4  ;;  %p10774_p11 = por %p10773_p7, %p10772_p2 }
  0xce   : > { %p10776_p6 = por %p10775_p10, %p10774_p11 }
  0xd0   : > { %p10777_p8 = pnand %p10776_p6, %p10770_p13 }
  0xd2   : > { %10780 = shalt.err (!%p10777_p8)
}
  0xd3   : > { %s10781_s11 = scalar_lea.vmem %s11282_s21, 448  ;;  %s10925_s5 = smov [#allocation13]  }
  0xd4   : > { %p10782_p0 = scmp.ne.s32.totalorder %s11282_s21, %s10781_s11  ;;  %s10786_s26 = sshll.u32 %s10925_s5, 4  ;;  %s10787_s26 = int_to_ptr.vmem [resolvable:$false] %s10786_s26 }
  0xd5   : > { %s10788_s27 = scalar_lea.vmem %s10787_s26, 896  ;;  %p10789_p1 = scmp.lt.s32.totalorder %s11282_s21, %s10787_s26 }
  0xd6   : > { %p10784_p5 = pnand %p10782_p0, %p12616_p9  ;;  %p10790_p4 = scmp.lt.s32.totalorder %s10788_s27, %s10781_s11 }
  0xd8   : > { %p10785_p3 = pneg %p10784_p5  ;;  %p10791_p2 = por %p10790_p4, %p10789_p1 }
  0xda   : > { %p10792_p7 = pnand %p10791_p2, %p10785_p3 }
  0xdc   : > { %10795 = shalt.err (!%p10792_p7)
}
  0xdd   : > { %s12623_s24 = smov 4   ;;  %s12624_s16 = smov 64  }
  0xde   : > { %s12625_s22 = scalar_lea.sflag [#allocation12], %s11021_s17  ;;  %s12626_s1 = smul.u32 112, %s10908_s12 }
  0xdf   : > { %9465 = dma.hbm_to_vmem [thread:$0]  (!%p12617_p12), %s11278_s19, 448, %s11282_s21, %s12625_s22, %s12624_s16, %s12624_s16, %s12623_s24  }
  0xe0   : > { %s11315_s13 = scalar_lea.hbm %s12569_s8, %s12626_s1  ;;  %s12627_s11 = smul.u32 7, %s11024_s18 }
  0xe1   : > { %s460_s26 = scalar_lea.sflag [#allocation15], %s11024_s18  ;;  %s10796_s27 = scalar_lea.hbm %s11315_s13, 112 }
  0xe2   : > { %s463_s5 = scalar_lea.vmem [#allocation14], %s12627_s11  ;;  %p10797_p13 = scmp.ne.s32.totalorder %s11315_s13, %s10796_s27 }
  0xe3   : > { %s470_s17 = sshll.u32 %s463_s5, 4  ;;  %s10801_s24 = scalar_lea.hbm %s12569_s8, 224  ;;  %s11319_s17 = int_to_ptr.vmem [resolvable:$true] %s470_s17 }
  0xe4   : > { %p10799_p11 = pnand %p10797_p13, %p12616_p9  ;;  %p10802_p6 = scmp.lt.u32.totalorder %s11315_s13, %s12569_s8 }
  0xe5   : > { %p10803_p8 = scmp.lt.u32.totalorder %s10801_s24, %s10796_s27  ;;  %p10805_p5 = scmp.lt.u32.totalorder %s10796_s27, %s11315_s13 }
  0xe6   : > { %p10800_p10 = pneg %p10799_p11 }
  0xe7   : > { %p10804_p0 = por %p10803_p8, %p10802_p6 }
  0xe9   : > { %p10806_p3 = por %p10805_p5, %p10804_p0 }
  0xeb   : > { %p10807_p1 = pnand %p10806_p3, %p10800_p10 }
  0xed   : > { %10810 = shalt.err (!%p10807_p1)
}
  0xee   : > { %s10811_s1 = scalar_lea.vmem %s11319_s17, 112  ;;  %s10926_s30 = smov [#allocation14]  }
  0xef   : > { %p10812_p4 = scmp.ne.s32.totalorder %s11319_s17, %s10811_s1  ;;  %s10816_s3 = sshll.u32 %s10926_s30, 4  ;;  %s10817_s3 = int_to_ptr.vmem [resolvable:$false] %s10816_s3 }
  0xf0   : > { %s10818_s11 = scalar_lea.vmem %s10817_s3, 224  ;;  %p10819_p13 = scmp.lt.s32.totalorder %s11319_s17, %s10817_s3 }
  0xf1   : > { %p10814_p2 = pnand %p10812_p4, %p12616_p9  ;;  %p10820_p11 = scmp.lt.s32.totalorder %s10818_s11, %s10811_s1 }
  0xf3   : > { %p10815_p7 = pneg %p10814_p2  ;;  %p10821_p6 = por %p10820_p11, %p10819_p13 }
  0xf5   : > { %p10822_p8 = pnand %p10821_p6, %p10815_p7 }
  0xf7   : > { %10825 = shalt.err (!%p10822_p8)
}
  0xf8   : > { %s12628_s5 = smov 1   ;;  %p12629_p9 = scmp.ne.s32.totalorder %s12614_s25, 0 }
  0xf9   : > { %9468 = dma.hbm_to_vmem [thread:$0]  (!%p12617_p12), %s11315_s13, 112, %s11319_s17, %s460_s26, %s12618_s15, %s12618_s15, %s12628_s5  }
  0xfa   : > { %482 = sbr.rel (%p12629_p9) target bundleno = 1562 (0x61a), region = 56  ;;  %p12630_p10 = scmp.eq.s32.totalorder (!%p12629_p9), %s11144_s23, 0 }
 0x101   : > { %10871 = dma.done.wait (%p12630_p10), [#allocation3], 32   ;;  %p12631_p0 = pmov %p12630_p10 }
 0x102   : > { %s488_s20 = sand.u32 1, %s11144_s23   ;;  %s11356_s29 = sand.u32 1, %s10900_s10  }
 0x103   : > { %10873 = vsyncadd (%p12631_p0), [#allocation3], 4294967264  ;;  %s9418_s18 = smul.u32 28, %s11356_s29  ;;  %s489_s27 = scalar_lea.sflag [#allocation6], %s488_s20 }
 0x104   : > { %p12632_p12 = scmp.ne.s32.totalorder %s12609_s14, 0 }
 0x105   : > { %s11359_s19 = scalar_lea.vmem [#allocation5], %s9418_s18 }
 0x106   : > { %10875 = dma.done.wait (%p12632_p12), %s489_s27, 560  }
 0x107   : > { %10877 = vsyncadd (%p12632_p12), %s489_s27, 4294966736  ;;  %s9419_s25 = smul.u32 7, %s11356_s29  ;;  %s507_s17 = scalar_lea.sflag [#allocation9], %s488_s20 }
 0x108   : > { %s9420_s15 = smul.u32 896, %s11356_s29 }
 0x109   : > { %s11367_s13 = scalar_lea.vmem [#allocation7], %s9419_s25 }
 0x10a   : > { %s11369_s26 = scalar_lea.vmem [#allocation8], %s9420_s15 }
 0x10b   : > { %10879 = dma.done.wait (%p12632_p12), %s507_s17, 14560  }
 0x10c   : > { %10881 = vsyncadd (%p12632_p12), %s507_s17, 4294952736  ;;  %s9421_s21 = smul.u32 14, %s11356_s29  ;;  %s525_s22 = scalar_lea.sflag [#allocation12], %s488_s20 }
 0x10d   : > { %s9422_s24 = smul.u32 3584, %s11356_s29 }
 0x10e   : > { %s11379_s16 = scalar_lea.vmem [#allocation10], %s9421_s21 }
 0x10f   : > { %s11381_s1 = scalar_lea.vmem [#allocation11], %s9422_s24 }
 0x110   : > { %10883 = dma.done.wait (%p12632_p12), %s525_s22, 57792  }
 0x111   : > { %10885 = vsyncadd (%p12632_p12), %s525_s22, 4294909504  ;;  %s11387_s30 = scalar_lea.vmem [#allocation13], %s9418_s18  ;;  %s543_s3 = scalar_lea.sflag [#allocation15], %s11356_s29 }
 0x112   : > { %s11390_s11 = scalar_lea.vmem [#allocation14], %s9419_s25 }
 0x113   : > { %10887 = dma.done.wait (%p12632_p12), %s543_s3, 112  }
 0x114   : > { %10889 = vsyncadd (%p12632_p12), %s543_s3, 4294967184  ;;  %v10927_v0 = vmov 0.0   ;;  %vm10928_vm0 = vmmov 0   ;;  %vm695_vm1 = vcmask 1043456   ;;  %v635_v1 = vld [vmem:[%s11359_s19] sm:$0xf] }
 0x115   : > { %9369 = vmatprep.subr.bf16.mxu0 %v10927_v0  ;;  %9371 = vmatprep.mubr.msk.bf16.mxu0 %vm10928_vm0, %v10927_v0  ;;  %v633_v2 = vld [vmem:[#allocation2] sm:$0x3]  ;;  %v636_v3 = vld [vmem:[%s11359_s19 + $0x4] sm:$0xf]  ;;  %v697_v4 = vsel %vm695_vm1, %v635_v1, 0  ;;  %vm691_vm2 = vcmask 64512  }
 0x116   : > { %9387 = vmatprep.subr.bf16.mxu1 %v10927_v0  ;;  %9389 = vmatprep.mubr.msk.bf16.mxu1 %vm10928_vm0, %v10927_v0  ;;  %v634_v5 = vpack.c.bf16 %v633_v2, %v633_v2  ;;  %v638_v6 = vld [vmem:[%s11359_s19 + $0xc] sm:$0xf]  ;;  %v640_v8 = vld [vmem:[%s11359_s19 + $0x14] sm:$0xf]  ;;  %v740_v9 = vsel %vm695_vm1, %v636_v3, 0  ;;  %v10929_v33 = vmov 0  }
 0x117   : > { %9370 = vmatpush3.bf16.msra.mxu0 %v697_v4  ;;  %v826_v7 = vsel %vm695_vm1, %v638_v6, 0  ;;  %v912_v10 = vsel %vm695_vm1, %v640_v8, 0  ;;  %v9526_v11 = vld [vmem:[%s11369_s26 + $0x4] ss:$8 sps:$4 sm:$0xff]   ;;  %v9524_v14 = vld [vmem:[%s11369_s26] ss:$8 sps:$4 sm:$0xff]  }
 0x118   : > { %9375 = vmatprep.subr.bf16.mxu0 %v10927_v0  ;;  %9388 = vmatpush3.bf16.msra.mxu1 %v826_v7  ;;  %v637_v12 = vld [vmem:[%s11359_s19 + $0x8] sm:$0xf]  ;;  %v639_v16 = vld [vmem:[%s11359_s19 + $0x10] sm:$0xf]  ;;  %v9527_v17 = vld [vmem:[%s11369_s26 + $0x10] ss:$8 sps:$4 sm:$0xff]  }
 0x119   : > { %9399 = vmatprep.subr.bf16.mxu1 %v10927_v0  ;;  %v783_v13 = vsel %vm695_vm1, %v637_v12, 0  ;;  %v9529_v15 = vld [vmem:[%s11369_s26 + $0x14] ss:$8 sps:$4 sm:$0xff]   ;;  %v9532_v18 = vld [vmem:[%s11369_s26 + $0x24] ss:$8 sps:$4 sm:$0xff]   ;;  %v869_v20 = vsel %vm695_vm1, %v639_v16, 0 }
 0x11a   : > { %9372 = vmatmul.mubr.msk.bf16.vlgmr.msra.gmra.mrb[0].mxu0 %vm691_vm2, %v634_v5  ;;  %v9530_v19 = vld [vmem:[%s11369_s26 + $0x20] ss:$8 sps:$4 sm:$0xff]   ;;  %v9535_v21 = vld [vmem:[%s11369_s26 + $0x34] ss:$8 sps:$4 sm:$0xff]   ;;  %v9533_v23 = vld [vmem:[%s11369_s26 + $0x30] ss:$8 sps:$4 sm:$0xff]  }
 0x11b   : > { %9376 = vmatpush3.bf16.msra.mxu0 %v740_v9  ;;  %9377 = vmatprep.mubr.msk.bf16.mxu0 %vm10928_vm0, %v10927_v0  ;;  %v641_v22 = vld [vmem:[%s11359_s19 + $0x18] sm:$0xf]  ;;  %v9536_v25 = vld [vmem:[%s11369_s26 + $0x40] ss:$8 sps:$4 sm:$0xff]   ;;  %s623_s14 = smul.u32 7, %s11144_s23  ;;  %vm7955_vm3 = vcmask 517120  }
 0x11c   : > { %9381 = vmatprep.subr.bf16.mxu0 %v10927_v0  ;;  %9390 = vmatmul.mubr.msk.bf16.vlgmr.msra.gmra.mrb[0].mxu1 %vm691_vm2, %v634_v5  ;;  %v9538_v24 = vld [vmem:[%s11369_s26 + $0x44] ss:$8 sps:$4 sm:$0xff]   ;;  %v955_v26 = vsel %vm695_vm1, %v641_v22, 0  ;;  %v9541_v27 = vld [vmem:[%s11369_s26 + $0x54] ss:$8 sps:$4 sm:$0xff]   ;;  %s12488_s19 = scalar_lea.vmem [#allocation16], %s9421_s21 }
 0x11d   : > { %9400 = vmatpush3.bf16.msra.mxu1 %v912_v10  ;;  %9401 = vmatprep.mubr.msk.bf16.mxu1 %vm10928_vm0, %v10927_v0  ;;  %v9539_v28 = vld [vmem:[%s11369_s26 + $0x50] ss:$8 sps:$4 sm:$0xff]   ;;  %v9544_v29 = vld [vmem:[%s11369_s26 + $0x64] ss:$8 sps:$4 sm:$0xff]   ;;  %v9542_v30 = vld [vmem:[%s11369_s26 + $0x60] ss:$8 sps:$4 sm:$0xff]  }
 0x11e   : > { %1287 = vmatprep.subr.bf16.mxu1 %v9526_v11  ;;  %v9547_v31 = vld [vmem:[%s11369_s26 + $0x74] ss:$8 sps:$4 sm:$0xff]   ;;  %v9545_v32 = vld [vmem:[%s11369_s26 + $0x70] ss:$8 sps:$4 sm:$0xff]   ;;  %v9548_v34 = vld [vmem:[%s11369_s26 + $0x80] ss:$8 sps:$4 sm:$0xff]  }
 0x11f   : > { %v9550_v35 = vld [vmem:[%s11369_s26 + $0x84] ss:$8 sps:$4 sm:$0xff]   ;;  %v9553_v36 = vld [vmem:[%s11369_s26 + $0x94] ss:$8 sps:$4 sm:$0xff]   ;;  %v9551_v37 = vld [vmem:[%s11369_s26 + $0x90] ss:$8 sps:$4 sm:$0xff]  }
 0x120   : > { %v9556_v38 = vld [vmem:[%s11369_s26 + $0xa4] ss:$8 sps:$4 sm:$0xff]   ;;  %v9554_v39 = vld [vmem:[%s11369_s26 + $0xa0] ss:$8 sps:$4 sm:$0xff]   ;;  %v9559_v41 = vld [vmem:[%s11369_s26 + $0xb4] ss:$8 sps:$4 sm:$0xff]  }
 0x121   : > { %v9574_v40 = vld [vmem:[%s11369_s26 + $0x104] ss:$8 sps:$4 sm:$0xff]   ;;  %v9557_v42 = vld [vmem:[%s11369_s26 + $0xb0] ss:$8 sps:$4 sm:$0xff]   ;;  %v9560_v44 = vld [vmem:[%s11369_s26 + $0xc0] ss:$8 sps:$4 sm:$0xff]  }
 0x122   : > { %9378 = vmatmul.mubr.msk.bf16.vlgmr.msra.gmra.mrb[4].mxu0 %vm691_vm2, %v634_v5  ;;  %v9562_v43 = vld [vmem:[%s11369_s26 + $0xc4] ss:$8 sps:$4 sm:$0xff]   ;;  %v9565_v45 = vld [vmem:[%s11369_s26 + $0xd4] ss:$8 sps:$4 sm:$0xff]   ;;  %v9563_v46 = vld [vmem:[%s11369_s26 + $0xd0] ss:$8 sps:$4 sm:$0xff]  }
 0x123   : > { %9382 = vmatpush3.bf16.msra.mxu0 %v783_v13  ;;  %9383 = vmatprep.mubr.msk.bf16.mxu0 %vm10928_vm0, %v10927_v0  ;;  %v9568_v47 = vld [vmem:[%s11369_s26 + $0xe4] ss:$8 sps:$4 sm:$0xff]   ;;  %v9566_v48 = vld [vmem:[%s11369_s26 + $0xe0] ss:$8 sps:$4 sm:$0xff]   ;;  %v9571_v49 = vld [vmem:[%s11369_s26 + $0xf4] ss:$8 sps:$4 sm:$0xff]  }
 0x124   : > { %9393 = vmatprep.subr.bf16.mxu0 %v10927_v0  ;;  %9402 = vmatmul.mubr.msk.bf16.vlgmr.msra.gmra.mrb[4].mxu1 %vm691_vm2, %v634_v5  ;;  %v9569_v50 = vld [vmem:[%s11369_s26 + $0xf0] ss:$8 sps:$4 sm:$0xff]   ;;  %v9598_v51 = vld [vmem:[%s11369_s26 + $0x184] ss:$8 sps:$4 sm:$0xff]   ;;  %v9572_v61 = vld [vmem:[%s11369_s26 + $0x100] ss:$8 sps:$4 sm:$0xff]  }
 0x125   : > { %1288 = vmatpush1.bf16.msra.mxu1 %v9524_v14  ;;  %1319 = vmatprep.mubr.bf16.mxu1 %v10929_v33  ;;  %v8222_v52 = vld [vmem:[%s11367_s13] ss:$0 sm:$0xff]  ;;  %v9577_v1 = vld [vmem:[%s11369_s26 + $0x114] ss:$8 sps:$4 sm:$0xff]   ;;  %v9580_v7 = vld [vmem:[%s11369_s26 + $0x124] ss:$8 sps:$4 sm:$0xff]  }
 0x126   : > { %1289 = vmatprep.subr.bf16.mxu1 %v9529_v15  ;;  %v9575_v4 = vld [vmem:[%s11369_s26 + $0x110] ss:$8 sps:$4 sm:$0xff]   ;;  %v9578_v13 = vld [vmem:[%s11369_s26 + $0x120] ss:$8 sps:$4 sm:$0xff]   ;;  %p624_p5 = scmp.lt.s32.totalorder %s623_s14, 13  ;;  %s9042_s25 = smul.u32 224, %s11144_s23 }
 0x127   : > { %v9596_v14 = vld [vmem:[%s11369_s26 + $0x180] ss:$8 sps:$4 sm:$0xff]   ;;  %v9602_v22 = vld [vmem:[%s11369_s26 + $0x190] ss:$8 sps:$4 sm:$0xff]   ;;  %s7977_s15 = sshll.u32 %s12488_s19, 4  ;;  %s7964_s23 = scalar_lea.sflag [#allocation4], %s11356_s29  ;;  %s12515_s15 = int_to_ptr.vmem [resolvable:$true] %s7977_s15 }
 0x128   : > { %s12644_s14 = smov (!%p624_p5, %s623_s14), 13  ;;  %s10826_s21 = scalar_lea.vmem %s12515_s15, 224 }
 0x129   : > { %1290 = vmatpush1.bf16.msra.mxu1 %v9527_v17  ;;  %v9583_v17 = vld [vmem:[%s11369_s26 + $0x134] ss:$8 sps:$4 sm:$0xff]   ;;  %s9041_s5 = sshll.u32 %s12644_s14, 8  ;;  %p10827_p3 = scmp.ne.s32.totalorder %s12515_s15, %s10826_s21 }
 0x12a   : > { %9384 = vmatmul.mubr.msk.bf16.vlgmr.msra.gmra.mrb[8].mxu0 %vm691_vm2, %v634_v5  ;;  %1291 = vmatprep.subr.bf16.mxu1 %v9532_v18  ;;  %v9604_v18 = vld [vmem:[%s11369_s26 + $0x194] ss:$8 sps:$4 sm:$0xff]   ;;  %s11991_s27 = scalar_lea.vmem %s12568_s7, %s9041_s5  ;;  %p12633_p1 = scmp.ne.s32.totalorder %s12611_s28, 0 }
 0x12b   : > { %9394 = vmatpush3.bf16.msra.mxu0 %v869_v20  ;;  %9395 = vmatprep.mubr.msk.bf16.mxu0 %vm10928_vm0, %v10927_v0  ;;  %v9581_v20 = vld [vmem:[%s11369_s26 + $0x130] ss:$8 sps:$4 sm:$0xff]   ;;  %s10930_s24 = smov [#allocation16]  }
 0x12c   : > { %9405 = vmatprep.subr.bf16.mxu0 %v10927_v0  ;;  %p10828_p4 = pnand %p10827_p3, %p12633_p1 }
 0x12d   : > { %1292 = vmatpush1.bf16.msra.mxu1 %v9530_v19 }
 0x12e   : > { %1293 = vmatprep.subr.bf16.mxu1 %v9535_v21  ;;  %p10829_p2 = pneg %p10828_p4 }
 0x131   : > { %1294 = vmatpush1.bf16.msra.mxu1 %v9533_v23  ;;  %v9586_v23 = vld [vmem:[%s11369_s26 + $0x144] ss:$8 sps:$4 sm:$0xff]  }
 0x132   : > { %9396 = vmatmul.mubr.msk.bf16.vlgmr.msra.gmra.mrb[12].mxu0 %vm691_vm2, %v634_v5  ;;  %1295 = vmatprep.subr.bf16.mxu1 %v9538_v24 }
 0x133   : > { %9406 = vmatpush3.bf16.msra.mxu0 %v955_v26  ;;  %9407 = vmatprep.mubr.msk.bf16.mxu0 %vm10928_vm0, %v10927_v0  ;;  %v8223_v0 = vld [vmem:[%s11367_s13 + $0x1] ss:$0 sm:$0xff] }
 0x134   : > { %1408 = vmatprep.subr.bf16.mxu0 %v9550_v35  ;;  %v9614_v35 = vld [vmem:[%s11369_s26 + $0x1b0] ss:$8 sps:$4 sm:$0xff]  }
 0x135   : > { %1296 = vmatpush1.bf16.msra.mxu1 %v9536_v25  ;;  %v9610_v25 = vld [vmem:[%s11369_s26 + $0x1a4] ss:$8 sps:$4 sm:$0xff]  }
 0x136   : > { %1297 = vmatprep.subr.bf16.mxu1 %v9541_v27 }
 0x139   : > { %1298 = vmatpush1.bf16.msra.mxu1 %v9539_v28  ;;  %v9584_v28 = vld [vmem:[%s11369_s26 + $0x140] ss:$8 sps:$4 sm:$0xff]  }
 0x13a   : > { %9408 = vmatmul.mubr.msk.bf16.vlgmr.msra.gmra.mrb[16].mxu0 %vm691_vm2, %v634_v5  ;;  %1299 = vmatprep.subr.bf16.mxu1 %v9544_v29  ;;  %v9589_v29 = vld [vmem:[%s11369_s26 + $0x154] ss:$8 sps:$4 sm:$0xff]  }
 0x13b   : > { %1440 = vmatprep.mubr.bf16.mxu0 %v10929_v33  ;;  %1409 = vmatpush1.bf16.msra.mxu0 %v9548_v34  ;;  %v8224_v34 = vld [vmem:[%s11367_s13 + $0x2] ss:$0 sm:$0xff] }
 0x13c   : > { %1410 = vmatprep.subr.bf16.mxu0 %v9553_v36 }
 0x13d   : > { %1300 = vmatpush1.bf16.msra.mxu1 %v9542_v30  ;;  %v9608_v30 = vld [vmem:[%s11369_s26 + $0x1a0] ss:$8 sps:$4 sm:$0xff]  }
 0x13e   : > { %1301 = vmatprep.subr.bf16.mxu1 %v9547_v31  ;;  %v9616_v31 = vld [vmem:[%s11369_s26 + $0x1b4] ss:$8 sps:$4 sm:$0xff]  }
 0x13f   : > { %1411 = vmatpush1.bf16.msra.mxu0 %v9551_v37  ;;  %v9592_v37 = vld [vmem:[%s11369_s26 + $0x164] ss:$8 sps:$4 sm:$0xff]  }
 0x140   : > { %1412 = vmatprep.subr.bf16.mxu0 %v9556_v38  ;;  %v9622_v38 = vld [vmem:[%s11369_s26 + $0x1c4] ss:$8 sps:$4 sm:$0xff]  }
 0x141   : > { %1302 = vmatpush1.bf16.msra.mxu1 %v9545_v32  ;;  %v9587_v32 = vld [vmem:[%s11369_s26 + $0x150] ss:$8 sps:$4 sm:$0xff]  }
 0x142   : > { %1529 = vmatprep.subr.bf16.mxu1 %v9574_v40  ;;  %v9590_v40 = vld [vmem:[%s11369_s26 + $0x160] ss:$8 sps:$4 sm:$0xff]  }
 0x143   : > { %1413 = vmatpush1.bf16.msra.mxu0 %v9554_v39 }
 0x144   : > { %1414 = vmatprep.subr.bf16.mxu0 %v9559_v41  ;;  %v9620_v41 = vld [vmem:[%s11369_s26 + $0x1c0] ss:$8 sps:$4 sm:$0xff]  }
 0x147   : > { %1415 = vmatpush1.bf16.msra.mxu0 %v9557_v42 }
 0x148   : > { %1416 = vmatprep.subr.bf16.mxu0 %v9562_v43 }
 0x14b   : > { %1417 = vmatpush1.bf16.msra.mxu0 %v9560_v44  ;;  %v9595_v44 = vld [vmem:[%s11369_s26 + $0x174] ss:$8 sps:$4 sm:$0xff]  }
 0x14c   : > { %1418 = vmatprep.subr.bf16.mxu0 %v9565_v45 }
 0x14f   : > { %1419 = vmatpush1.bf16.msra.mxu0 %v9563_v46  ;;  %v9628_v46 = vld [vmem:[%s11369_s26 + $0x1d4] ss:$8 sps:$4 sm:$0xff]  }
 0x150   : > { %1420 = vmatprep.subr.bf16.mxu0 %v9568_v47  ;;  %v9593_v47 = vld [vmem:[%s11369_s26 + $0x170] ss:$8 sps:$4 sm:$0xff]  }
 0x153   : > { %1421 = vmatpush1.bf16.msra.mxu0 %v9566_v48  ;;  %v9626_v48 = vld [vmem:[%s11369_s26 + $0x1d0] ss:$8 sps:$4 sm:$0xff]  }
 0x154   : > { %1422 = vmatprep.subr.bf16.mxu0 %v9571_v49  ;;  %v8225_v49 = vld [vmem:[%s11367_s13 + $0x3] ss:$0 sm:$0xff] }
 0x157   : > { %1423 = vmatpush1.bf16.msra.mxu0 %v9569_v50 }
 0x158   : > { %1650 = vmatprep.subr.bf16.mxu0 %v9598_v51 }
 0x1ed   : > { %v733_v53 = vpop.f32.mrb[0].mxu0 }
 0x1ee   : > { %v734_v54 = vadd.f32 %v8222_v52, %v733_v53  ;;  %v9373_v55 = vpop.f32.mrb[1].mxu0  ;;  %v9601_v52 = vld [vmem:[%s11369_s26 + $0x204] ss:$8 sps:$4 sm:$0xff]  }
 0x1ef   : > { %v736_v56 = vpop.f32.mrb[2].mxu0  ;;  %v11475_v57 = vpop.f32.mrb[0].mxu1  ;;  %v9634_v53 = vld [vmem:[%s11369_s26 + $0x1e4] ss:$8 sps:$4 sm:$0xff]  }
 0x1f0   : > { %v997_v58 = vmax.f32 %v734_v54, 0.0  ;;  %v9374_v59 = vpop.f32.mrb[3].mxu0  ;;  %v9391_v60 = vpop.f32.mrb[1].mxu1 }
 0x1f1   : > { %v865_v62 = vpop.f32.mrb[2].mxu1  ;;  %v9599_v60 = vld [vmem:[%s11369_s26 + $0x200] ss:$8 sps:$4 sm:$0xff]  }
 0x1f2   : > { %v1004_v63 = vpack.c.bf16 %v997_v58, %v997_v58  ;;  %v9392_v2 = vpop.f32.mrb[3].mxu1  ;;  %v863_v58 = vadd.f32 %v8225_v49, %v11475_v57  ;;  %v9607_v62 = vld [vmem:[%s11369_s26 + $0x214] ss:$8 sps:$4 sm:$0xff]   ;;  %v9638_v57 = vld [vmem:[%s11369_s26 + $0x1f0] ss:$8 sps:$4 sm:$0xff]  }
 0x1f3   : > { %v9613_v2 = vld [vmem:[%s11369_s26 + $0x224] ss:$8 sps:$4 sm:$0xff]   ;;  %v9700_v49 = vld [vmem:[%s11381_s1 + $0x24] ss:$16 sps:$4 sm:$0xff]  }
 0x1f4   : > { %1320 = vmatmul.mubr.bf16.vlgmr.msra.gmra.mrb[8].mxu1 %v1004_v63  ;;  %v9640_v63 = vld [vmem:[%s11369_s26 + $0x1f4] ss:$8 sps:$4 sm:$0xff]  }
 0x1f5   : > { %v776_v3 = vpop.f32.mrb[4].mxu0  ;;  %1530 = vmatpush1.bf16.msra.mxu1 %v9572_v61  ;;  %1561 = vmatprep.mubr.bf16.mxu1 %v10929_v33  ;;  %v9632_v61 = vld [vmem:[%s11369_s26 + $0x1e0] ss:$8 sps:$4 sm:$0xff]  }
 0x1f6   : > { %v777_v5 = vadd.f32 %v8223_v0, %v776_v3  ;;  %v9379_v6 = vpop.f32.mrb[5].mxu0  ;;  %1531 = vmatprep.subr.bf16.mxu1 %v9577_v1  ;;  %v1000_v0 = vmax.f32 %v863_v58, 0.0  ;;  %v9605_v1 = vld [vmem:[%s11369_s26 + $0x210] ss:$8 sps:$4 sm:$0xff]   ;;  %v9646_v3 = vld [vmem:[%s11369_s26 + $0x284] ss:$8 sps:$4 sm:$0xff]  }
 0x1f7   : > { %v779_v8 = vpop.f32.mrb[6].mxu0  ;;  %v11483_v9 = vpop.f32.mrb[4].mxu1  ;;  %v9644_v6 = vld [vmem:[%s11369_s26 + $0x280] ss:$8 sps:$4 sm:$0xff]  }
 0x1f8   : > { %v998_v10 = vmax.f32 %v777_v5, 0.0  ;;  %v9380_v11 = vpop.f32.mrb[7].mxu0  ;;  %v9403_v12 = vpop.f32.mrb[5].mxu1  ;;  %v9611_v5 = vld [vmem:[%s11369_s26 + $0x220] ss:$8 sps:$4 sm:$0xff]  }
 0x1f9   : > { %1532 = vmatpush1.bf16.msra.mxu1 %v9575_v4  ;;  %v951_v15 = vpop.f32.mrb[6].mxu1  ;;  %v1007_v4 = vpack.c.bf16 %v1000_v0, %v1000_v0  ;;  %v9652_v8 = vld [vmem:[%s11369_s26 + $0x294] ss:$8 sps:$4 sm:$0xff]   ;;  %v9650_v11 = vld [vmem:[%s11369_s26 + $0x290] ss:$8 sps:$4 sm:$0xff]  }
 0x1fa   : > { %v1005_v16 = vpack.c.bf16 %v998_v10, %v998_v10  ;;  %1533 = vmatprep.subr.bf16.mxu1 %v9580_v7  ;;  %v9404_v19 = vpop.f32.mrb[7].mxu1  ;;  %v9619_v7 = vld [vmem:[%s11369_s26 + $0x234] ss:$8 sps:$4 sm:$0xff]   ;;  %v9617_v10 = vld [vmem:[%s11369_s26 + $0x230] ss:$8 sps:$4 sm:$0xff]  }
 0x1fb   : > { %v9625_v12 = vld [vmem:[%s11369_s26 + $0x244] ss:$8 sps:$4 sm:$0xff]   ;;  %v9656_v15 = vld [vmem:[%s11369_s26 + $0x2a0] ss:$8 sps:$4 sm:$0xff]   ;;  %v8226_v19 = vld [vmem:[%s11367_s13 + $0x4] ss:$0 sm:$0xff] }
 0x1fc   : > { %1441 = vmatmul.mubr.bf16.vlgmr.msra.gmra.mrb[20].mxu0 %v1005_v16  ;;  %v9631_v16 = vld [vmem:[%s11369_s26 + $0x254] ss:$8 sps:$4 sm:$0xff]   ;;  %v9712_v58 = vld [vmem:[%s11381_s1 + $0x64] ss:$16 sps:$4 sm:$0xff]  }
 0x1fd   : > { %1534 = vmatpush1.bf16.msra.mxu1 %v9578_v13  ;;  %v819_v21 = vpop.f32.mrb[8].mxu0  ;;  %1651 = vmatpush1.bf16.msra.mxu0 %v9596_v14  ;;  %v9658_v13 = vld [vmem:[%s11369_s26 + $0x2a4] ss:$8 sps:$4 sm:$0xff]   ;;  %v9623_v14 = vld [vmem:[%s11369_s26 + $0x240] ss:$8 sps:$4 sm:$0xff]  }
 0x1fe   : > { %1535 = vmatprep.subr.bf16.mxu1 %v9583_v17  ;;  %v9385_v24 = vpop.f32.mrb[9].mxu0  ;;  %1652 = vmatprep.subr.bf16.mxu0 %v9604_v18  ;;  %v820_v43 = vadd.f32 %v8224_v34, %v819_v21  ;;  %v9664_v17 = vld [vmem:[%s11369_s26 + $0x2b4] ss:$8 sps:$4 sm:$0xff]   ;;  %v9629_v18 = vld [vmem:[%s11369_s26 + $0x250] ss:$8 sps:$4 sm:$0xff]  }
 0x1ff   : > { %v822_v26 = vpop.f32.mrb[10].mxu0  ;;  %1682 = vmatprep.mubr.bf16.mxu0 %v10929_v33  ;;  %v9637_v21 = vld [vmem:[%s11369_s26 + $0x264] ss:$8 sps:$4 sm:$0xff]   ;;  %v9635_v24 = vld [vmem:[%s11369_s26 + $0x260] ss:$8 sps:$4 sm:$0xff]  }
 0x200   : > { %v9386_v27 = vpop.f32.mrb[11].mxu0  ;;  %v999_v50 = vmax.f32 %v820_v43, 0.0  ;;  %v9643_v26 = vld [vmem:[%s11369_s26 + $0x274] ss:$8 sps:$4 sm:$0xff]   ;;  %v9682_v34 = vld [vmem:[%s11369_s26 + $0x2e4] ss:$8 sps:$4 sm:$0xff]  }
 0x201   : > { %1536 = vmatpush1.bf16.msra.mxu1 %v9581_v20  ;;  %1653 = vmatpush1.bf16.msra.mxu0 %v9602_v22  ;;  %v9662_v20 = vld [vmem:[%s11369_s26 + $0x2b0] ss:$8 sps:$4 sm:$0xff]   ;;  %v9670_v22 = vld [vmem:[%s11369_s26 + $0x2c4] ss:$8 sps:$4 sm:$0xff]   ;;  %v9676_v27 = vld [vmem:[%s11369_s26 + $0x2d4] ss:$8 sps:$4 sm:$0xff]  }
 0x202   : > { %1537 = vmatprep.subr.bf16.mxu1 %v9586_v23  ;;  %1654 = vmatprep.subr.bf16.mxu0 %v9610_v25  ;;  %v1006_v56 = vpack.c.bf16 %v999_v50, %v999_v50  ;;  %v9668_v25 = vld [vmem:[%s11369_s26 + $0x2c0] ss:$8 sps:$4 sm:$0xff]   ;;  %v9661_v43 = vld [vmem:[%s11369_s26 + $0x324] ss:$8 sps:$4 sm:$0xff]   ;;  %v9665_v50 = vld [vmem:[%s11369_s26 + $0x330] ss:$8 sps:$4 sm:$0xff]  }
 0x205   : > { %1538 = vmatpush1.bf16.msra.mxu1 %v9584_v28  ;;  %1655 = vmatpush1.bf16.msra.mxu0 %v9608_v30  ;;  %v11501_v36 = vpop.f32.mrb[12].mxu0  ;;  %v9674_v30 = vld [vmem:[%s11369_s26 + $0x2d0] ss:$8 sps:$4 sm:$0xff]  }
 0x206   : > { %1539 = vmatprep.subr.bf16.mxu1 %v9589_v29  ;;  %1656 = vmatprep.subr.bf16.mxu0 %v9616_v31  ;;  %v9397_v39 = vpop.f32.mrb[13].mxu0  ;;  %v906_v23 = vadd.f32 %v8226_v19, %v11501_v36  ;;  %v9641_v29 = vld [vmem:[%s11369_s26 + $0x270] ss:$8 sps:$4 sm:$0xff]   ;;  %v8227_v31 = vld [vmem:[%s11367_s13 + $0x5] ss:$0 sm:$0xff] }
 0x207   : > { %v908_v42 = vpop.f32.mrb[14].mxu0  ;;  %v949_v36 = vadd.f32 %v8227_v31, %v11483_v9  ;;  %v9655_v39 = vld [vmem:[%s11369_s26 + $0x314] ss:$8 sps:$4 sm:$0xff]   ;;  %v9686_v9 = vld [vmem:[%s11369_s26 + $0x2f0] ss:$8 sps:$4 sm:$0xff]  }
 0x208   : > { %v9398_v45 = vpop.f32.mrb[15].mxu0  ;;  %v1001_v28 = vmax.f32 %v906_v23, 0.0  ;;  %v9653_v42 = vld [vmem:[%s11369_s26 + $0x310] ss:$8 sps:$4 sm:$0xff]   ;;  %v9740_v19 = vld [vmem:[%s11381_s1 + $0x100] ss:$16 sps:$4 sm:$0xff]  }
 0x209   : > { %1540 = vmatpush1.bf16.msra.mxu1 %v9587_v32  ;;  %1657 = vmatpush1.bf16.msra.mxu0 %v9614_v35  ;;  %v9649_v32 = vld [vmem:[%s11369_s26 + $0x304] ss:$8 sps:$4 sm:$0xff]  }
 0x20a   : > { %1541 = vmatprep.subr.bf16.mxu1 %v9592_v37  ;;  %1658 = vmatprep.subr.bf16.mxu0 %v9622_v38  ;;  %v1008_v35 = vpack.c.bf16 %v1001_v28, %v1001_v28  ;;  %v9647_v37 = vld [vmem:[%s11369_s26 + $0x300] ss:$8 sps:$4 sm:$0xff]   ;;  %v9746_v23 = vld [vmem:[%s11381_s1 + $0x120] ss:$16 sps:$4 sm:$0xff]  }
 0x20b   : > { %v9680_v38 = vld [vmem:[%s11369_s26 + $0x2e0] ss:$8 sps:$4 sm:$0xff]   ;;  %v9758_v31 = vld [vmem:[%s11381_s1 + $0x160] ss:$16 sps:$4 sm:$0xff]  }
 0x20c   : > { %v9727_v28 = vld [vmem:[%s11381_s1 + $0xac] ss:$16 sps:$4 sm:$0xff]  }
 0x20d   : > { %1542 = vmatpush1.bf16.msra.mxu1 %v9590_v40  ;;  %1659 = vmatpush1.bf16.msra.mxu0 %v9620_v41  ;;  %v11512_v51 = vpop.f32.mrb[16].mxu0  ;;  %v9688_v40 = vld [vmem:[%s11369_s26 + $0x2f4] ss:$8 sps:$4 sm:$0xff]   ;;  %v1002_v41 = vmax.f32 %v949_v36, 0.0 }
 0x20e   : > { %1543 = vmatprep.subr.bf16.mxu1 %v9595_v44  ;;  %1660 = vmatprep.subr.bf16.mxu0 %v9628_v46  ;;  %v9409_v54 = vpop.f32.mrb[17].mxu0  ;;  %v9694_v44 = vld [vmem:[%s11381_s1 + $0x4] ss:$16 sps:$4 sm:$0xff]   ;;  %v9764_v36 = vld [vmem:[%s11381_s1 + $0x180] ss:$16 sps:$4 sm:$0xff]  }
 0x20f   : > { %v994_v55 = vpop.f32.mrb[18].mxu0  ;;  %v1009_v45 = vpack.c.bf16 %v1002_v41, %v1002_v41  ;;  %v9659_v46 = vld [vmem:[%s11369_s26 + $0x320] ss:$8 sps:$4 sm:$0xff]  }
 0x210   : > { %v9410_v59 = vpop.f32.mrb[19].mxu0  ;;  %v9671_v54 = vld [vmem:[%s11369_s26 + $0x340] ss:$8 sps:$4 sm:$0xff]   ;;  %v9704_v55 = vld [vmem:[%s11381_s1 + $0x40] ss:$16 sps:$4 sm:$0xff]  }
 0x211   : > { %1544 = vmatpush1.bf16.msra.mxu1 %v9593_v47  ;;  %1661 = vmatpush1.bf16.msra.mxu0 %v9626_v48  ;;  %v9692_v47 = vld [vmem:[%s11381_s1] ss:$16 sps:$4 sm:$0xff]   ;;  %v9677_v59 = vld [vmem:[%s11369_s26 + $0x350] ss:$8 sps:$4 sm:$0xff]  }
 0x212   : > { %1771 = vmatprep.subr.bf16.mxu1 %v9601_v52  ;;  %1662 = vmatprep.subr.bf16.mxu0 %v9634_v53  ;;  %v9667_v48 = vld [vmem:[%s11369_s26 + $0x334] ss:$8 sps:$4 sm:$0xff]   ;;  %v9673_v52 = vld [vmem:[%s11369_s26 + $0x344] ss:$8 sps:$4 sm:$0xff]   ;;  %v9706_v53 = vld [vmem:[%s11381_s1 + $0x44] ss:$16 sps:$4 sm:$0xff]  }
 0x213   : > { %v9745_v41 = vld [vmem:[%s11381_s1 + $0x10c] ss:$16 sps:$4 sm:$0xff]  }
 0x214   : > { %1562 = vmatmul.mubr.bf16.vlgmr.msra.gmra.mrb[12].mxu1 %v1006_v56  ;;  %v9679_v56 = vld [vmem:[%s11369_s26 + $0x354] ss:$8 sps:$4 sm:$0xff]  }
 0x215   : > { %1772 = vmatpush1.bf16.msra.mxu1 %v9599_v60  ;;  %1663 = vmatpush1.bf16.msra.mxu0 %v9632_v61  ;;  %v8228_v60 = vld [vmem:[%s11367_s13 + $0x6] ss:$0 sm:$0xff] }
 0x216   : > { %1773 = vmatprep.subr.bf16.mxu1 %v9607_v62  ;;  %1664 = vmatprep.subr.bf16.mxu0 %v9640_v63  ;;  %v9710_v61 = vld [vmem:[%s11381_s1 + $0x60] ss:$16 sps:$4 sm:$0xff]   ;;  %v9718_v63 = vld [vmem:[%s11381_s1 + $0x84] ss:$16 sps:$4 sm:$0xff]   ;;  %v992_v0 = vadd.f32 %v8228_v60, %v11512_v51  ;;  %v9697_v51 = vld [vmem:[%s11381_s1 + $0xc] ss:$16 sps:$4 sm:$0xff]  }
 0x217   : > { %1803 = vmatprep.mubr.bf16.mxu1 %v10929_v33  ;;  %v9685_v62 = vld [vmem:[%s11369_s26 + $0x364] ss:$8 sps:$4 sm:$0xff]   ;;  %v9787_v60 = vld [vmem:[%s11381_s1 + $0x1ec] ss:$16 sps:$4 sm:$0xff]  }
 0x219   : > { %1774 = vmatpush1.bf16.msra.mxu1 %v9605_v1  ;;  %1665 = vmatpush1.bf16.msra.mxu0 %v9638_v57  ;;  %v9683_v1 = vld [vmem:[%s11369_s26 + $0x360] ss:$8 sps:$4 sm:$0xff]   ;;  %v9716_v57 = vld [vmem:[%s11381_s1 + $0x80] ss:$16 sps:$4 sm:$0xff]  }
 0x21a   : > { %1775 = vmatprep.subr.bf16.mxu1 %v9613_v2  ;;  %1892 = vmatprep.subr.bf16.mxu0 %v9646_v3  ;;  %v9691_v2 = vld [vmem:[%s11369_s26 + $0x374] ss:$8 sps:$4 sm:$0xff]   ;;  %v9724_v3 = vld [vmem:[%s11381_s1 + $0xa4] ss:$16 sps:$4 sm:$0xff]  }
 0x21c   : > { %1683 = vmatmul.mubr.bf16.vlgmr.msra.gmra.mrb[24].mxu0 %v1007_v4  ;;  %v1003_v4 = vmax.f32 %v992_v0, 0.0 }
 0x21d   : > { %1776 = vmatpush1.bf16.msra.mxu1 %v9611_v5  ;;  %1893 = vmatpush1.bf16.msra.mxu0 %v9644_v6  ;;  %v9689_v5 = vld [vmem:[%s11369_s26 + $0x370] ss:$8 sps:$4 sm:$0xff]   ;;  %v9722_v6 = vld [vmem:[%s11381_s1 + $0xa0] ss:$16 sps:$4 sm:$0xff]   ;;  %s12513_s26 = scalar_lea.hbm %s12570_s9, %s9042_s25 }
 0x21e   : > { %1777 = vmatprep.subr.bf16.mxu1 %v9619_v7  ;;  %1894 = vmatprep.subr.bf16.mxu0 %v9652_v8  ;;  %v9730_v7 = vld [vmem:[%s11381_s1 + $0xc4] ss:$16 sps:$4 sm:$0xff]   ;;  %v1010_v8 = vpack.c.bf16 %v1003_v4, %v1003_v4 }
 0x21f   : > { %1924 = vmatprep.mubr.bf16.mxu0 %v10929_v33 }
 0x221   : > { %1778 = vmatpush1.bf16.msra.mxu1 %v9617_v10  ;;  %1895 = vmatpush1.bf16.msra.mxu0 %v9650_v11  ;;  %v9695_v10 = vld [vmem:[%s11381_s1 + $0x8] ss:$16 sps:$4 sm:$0xff]   ;;  %v9728_v11 = vld [vmem:[%s11381_s1 + $0xc0] ss:$16 sps:$4 sm:$0xff]  }
 0x222   : > { %1779 = vmatprep.subr.bf16.mxu1 %v9625_v12  ;;  %1896 = vmatprep.subr.bf16.mxu0 %v9658_v13  ;;  %v9703_v12 = vld [vmem:[%s11381_s1 + $0x2c] ss:$16 sps:$4 sm:$0xff]   ;;  %v9736_v13 = vld [vmem:[%s11381_s1 + $0xe4] ss:$16 sps:$4 sm:$0xff]  }
 0x225   : > { %1780 = vmatpush1.bf16.msra.mxu1 %v9623_v14  ;;  %1897 = vmatpush1.bf16.msra.mxu0 %v9656_v15  ;;  %v9701_v14 = vld [vmem:[%s11381_s1 + $0x28] ss:$16 sps:$4 sm:$0xff]   ;;  %v9734_v15 = vld [vmem:[%s11381_s1 + $0xe0] ss:$16 sps:$4 sm:$0xff]  }
 0x226   : > { %1781 = vmatprep.subr.bf16.mxu1 %v9631_v16  ;;  %1898 = vmatprep.subr.bf16.mxu0 %v9664_v17  ;;  %v9709_v16 = vld [vmem:[%s11381_s1 + $0x4c] ss:$16 sps:$4 sm:$0xff]   ;;  %v9742_v17 = vld [vmem:[%s11381_s1 + $0x104] ss:$16 sps:$4 sm:$0xff]  }
 0x229   : > { %1782 = vmatpush1.bf16.msra.mxu1 %v9629_v18  ;;  %1899 = vmatpush1.bf16.msra.mxu0 %v9662_v20  ;;  %v9707_v18 = vld [vmem:[%s11381_s1 + $0x48] ss:$16 sps:$4 sm:$0xff]   ;;  %v9715_v20 = vld [vmem:[%s11381_s1 + $0x6c] ss:$16 sps:$4 sm:$0xff]  }
 0x22a   : > { %1783 = vmatprep.subr.bf16.mxu1 %v9637_v21  ;;  %1900 = vmatprep.subr.bf16.mxu0 %v9670_v22  ;;  %v9748_v21 = vld [vmem:[%s11381_s1 + $0x124] ss:$16 sps:$4 sm:$0xff]   ;;  %v9713_v22 = vld [vmem:[%s11381_s1 + $0x68] ss:$16 sps:$4 sm:$0xff]  }
 0x22d   : > { %1784 = vmatpush1.bf16.msra.mxu1 %v9635_v24  ;;  %1901 = vmatpush1.bf16.msra.mxu0 %v9668_v25  ;;  %v9721_v24 = vld [vmem:[%s11381_s1 + $0x8c] ss:$16 sps:$4 sm:$0xff]   ;;  %v9754_v25 = vld [vmem:[%s11381_s1 + $0x144] ss:$16 sps:$4 sm:$0xff]  }
 0x22e   : > { %1785 = vmatprep.subr.bf16.mxu1 %v9643_v26  ;;  %1902 = vmatprep.subr.bf16.mxu0 %v9676_v27  ;;  %v9719_v26 = vld [vmem:[%s11381_s1 + $0x88] ss:$16 sps:$4 sm:$0xff]   ;;  %v9752_v27 = vld [vmem:[%s11381_s1 + $0x140] ss:$16 sps:$4 sm:$0xff]  }
 0x231   : > { %1786 = vmatpush1.bf16.msra.mxu1 %v9641_v29  ;;  %1903 = vmatpush1.bf16.msra.mxu0 %v9674_v30  ;;  %v9760_v29 = vld [vmem:[%s11381_s1 + $0x164] ss:$16 sps:$4 sm:$0xff]   ;;  %v9725_v30 = vld [vmem:[%s11381_s1 + $0xa8] ss:$16 sps:$4 sm:$0xff]  }
 0x232   : > { %2013 = vmatprep.subr.bf16.mxu1 %v9649_v32  ;;  %1904 = vmatprep.subr.bf16.mxu0 %v9682_v34  ;;  %v9733_v32 = vld [vmem:[%s11381_s1 + $0xcc] ss:$16 sps:$4 sm:$0xff]   ;;  %v9766_v34 = vld [vmem:[%s11381_s1 + $0x184] ss:$16 sps:$4 sm:$0xff]  }
 0x234   : > { %1804 = vmatmul.mubr.bf16.vlgmr.msra.gmra.mrb[16].mxu1 %v1008_v35  ;;  %v9731_v35 = vld [vmem:[%s11381_s1 + $0xc8] ss:$16 sps:$4 sm:$0xff]  }
 0x235   : > { %2014 = vmatpush1.bf16.msra.mxu1 %v9647_v37  ;;  %1905 = vmatpush1.bf16.msra.mxu0 %v9680_v38  ;;  %v9739_v37 = vld [vmem:[%s11381_s1 + $0xec] ss:$16 sps:$4 sm:$0xff]   ;;  %v9772_v38 = vld [vmem:[%s11381_s1 + $0x1a4] ss:$16 sps:$4 sm:$0xff]  }
 0x236   : > { %2015 = vmatprep.subr.bf16.mxu1 %v9655_v39  ;;  %1906 = vmatprep.subr.bf16.mxu0 %v9688_v40  ;;  %v9737_v39 = vld [vmem:[%s11381_s1 + $0xe8] ss:$16 sps:$4 sm:$0xff]   ;;  %v9770_v40 = vld [vmem:[%s11381_s1 + $0x1a0] ss:$16 sps:$4 sm:$0xff]  }
 0x237   : > { %2045 = vmatprep.mubr.bf16.mxu1 %v10929_v33  ;;  %v9698_v33 = vld [vmem:[%s11381_s1 + $0x20] ss:$16 sps:$4 sm:$0xff]  }
 0x239   : > { %2016 = vmatpush1.bf16.msra.mxu1 %v9653_v42  ;;  %1907 = vmatpush1.bf16.msra.mxu0 %v9686_v9  ;;  %v9778_v42 = vld [vmem:[%s11381_s1 + $0x1c4] ss:$16 sps:$4 sm:$0xff]   ;;  %v9743_v9 = vld [vmem:[%s11381_s1 + $0x108] ss:$16 sps:$4 sm:$0xff]  }
 0x23a   : > { %2017 = vmatprep.subr.bf16.mxu1 %v9661_v43  ;;  %3004 = vmatprep.subr.bf16.mxu0 %v9694_v44  ;;  %v9776_v43 = vld [vmem:[%s11381_s1 + $0x1c0] ss:$16 sps:$4 sm:$0xff]   ;;  %v9751_v44 = vld [vmem:[%s11381_s1 + $0x12c] ss:$16 sps:$4 sm:$0xff]  }
 0x23c   : > { %1925 = vmatmul.mubr.bf16.vlgmr.msra.gmra.mrb[28].mxu0 %v1009_v45  ;;  %v9784_v45 = vld [vmem:[%s11381_s1 + $0x1e4] ss:$16 sps:$4 sm:$0xff]  }
 0x23d   : > { %2018 = vmatpush1.bf16.msra.mxu1 %v9659_v46  ;;  %3005 = vmatpush1.bf16.msra.mxu0 %v9692_v47  ;;  %v9749_v46 = vld [vmem:[%s11381_s1 + $0x128] ss:$16 sps:$4 sm:$0xff]   ;;  %v9782_v47 = vld [vmem:[%s11381_s1 + $0x1e0] ss:$16 sps:$4 sm:$0xff]  }
 0x23e   : > { %2019 = vmatprep.subr.bf16.mxu1 %v9667_v48  ;;  %3006 = vmatprep.subr.bf16.mxu0 %v9700_v49  ;;  %v9757_v48 = vld [vmem:[%s11381_s1 + $0x14c] ss:$16 sps:$4 sm:$0xff]   ;;  %v9790_v49 = vld [vmem:[%s11381_s1 + $0x204] ss:$16 sps:$4 sm:$0xff]  }
 0x241   : > { %2020 = vmatpush1.bf16.msra.mxu1 %v9665_v50  ;;  %3007 = vmatpush1.bf16.msra.mxu0 %v9698_v33  ;;  %v9755_v50 = vld [vmem:[%s11381_s1 + $0x148] ss:$16 sps:$4 sm:$0xff]   ;;  %v9763_v33 = vld [vmem:[%s11381_s1 + $0x16c] ss:$16 sps:$4 sm:$0xff]  }
 0x242   : > { %2021 = vmatprep.subr.bf16.mxu1 %v9673_v52  ;;  %3008 = vmatprep.subr.bf16.mxu0 %v9706_v53  ;;  %v9761_v52 = vld [vmem:[%s11381_s1 + $0x168] ss:$16 sps:$4 sm:$0xff]   ;;  %v9769_v53 = vld [vmem:[%s11381_s1 + $0x18c] ss:$16 sps:$4 sm:$0xff]  }
 0x245   : > { %2022 = vmatpush1.bf16.msra.mxu1 %v9671_v54  ;;  %3009 = vmatpush1.bf16.msra.mxu0 %v9704_v55  ;;  %v9767_v54 = vld [vmem:[%s11381_s1 + $0x188] ss:$16 sps:$4 sm:$0xff]   ;;  %v9775_v55 = vld [vmem:[%s11381_s1 + $0x1ac] ss:$16 sps:$4 sm:$0xff]  }
 0x246   : > { %2023 = vmatprep.subr.bf16.mxu1 %v9679_v56  ;;  %3010 = vmatprep.subr.bf16.mxu0 %v9712_v58  ;;  %v9773_v56 = vld [vmem:[%s11381_s1 + $0x1a8] ss:$16 sps:$4 sm:$0xff]   ;;  %v9781_v58 = vld [vmem:[%s11381_s1 + $0x1cc] ss:$16 sps:$4 sm:$0xff]  }
 0x249   : > { %2024 = vmatpush1.bf16.msra.mxu1 %v9677_v59  ;;  %3011 = vmatpush1.bf16.msra.mxu0 %v9710_v61  ;;  %v9779_v59 = vld [vmem:[%s11381_s1 + $0x1c8] ss:$16 sps:$4 sm:$0xff]  }
 0x24a   : > { %2025 = vmatprep.subr.bf16.mxu1 %v9685_v62  ;;  %3012 = vmatprep.subr.bf16.mxu0 %v9718_v63  ;;  %v9785_v61 = vld [vmem:[%s11381_s1 + $0x1e8] ss:$16 sps:$4 sm:$0xff]   ;;  %v9793_v62 = vld [vmem:[%s11381_s1 + $0x20c] ss:$16 sps:$4 sm:$0xff]   ;;  %v1137_v63 = vlaneseq }
 0x24c   : > { %v11642_v0 = vshrl.u32 %v1137_v63, 7  ;;  %v9844_v63 = vld [vmem:[%s11381_s1 + $0x324] ss:$16 sps:$4 sm:$0xff]  }
 0x24d   : > { %2026 = vmatpush1.bf16.msra.mxu1 %v9683_v1  ;;  %3013 = vmatpush1.bf16.msra.mxu0 %v9716_v57  ;;  %v1123_v57 = vld [vmem:[%s11379_s16] sm:$0x3] }
 0x24e   : > { %2027 = vmatprep.subr.bf16.mxu1 %v9691_v2  ;;  %3014 = vmatprep.subr.bf16.mxu0 %v9724_v3  ;;  %v11645_v1 = vsub.s32 0, %v11642_v0  ;;  %v11649_v2 = vsub.s32 1, %v11642_v0 }
 0x250   : > { %v1140_v3 = vrot.slane %v1123_v57, %v11645_v1  ;;  %v1144_v4 = vrot.slane %v1123_v57, %v11649_v2  ;;  %v9847_v57 = vld [vmem:[%s11381_s1 + $0x32c] ss:$16 sps:$4 sm:$0xff]  }
 0x251   : > { %2028 = vmatpush1.bf16.msra.mxu1 %v9689_v5  ;;  %3015 = vmatpush1.bf16.msra.mxu0 %v9722_v6 }
 0x252   : > { %3045 = vmatprep.subr.bf16.mxu1 %v9697_v51  ;;  %3016 = vmatprep.subr.bf16.mxu0 %v9730_v7 }
 0x254   : > { %2046 = vmatmul.mubr.bf16.vlgmr.msra.gmra.mrb[20].mxu1 %v1010_v8 }
 0x255   : > { %3046 = vmatpush1.bf16.msra.mxu1 %v9695_v10  ;;  %3017 = vmatpush1.bf16.msra.mxu0 %v9728_v11 }
 0x256   : > { %3047 = vmatprep.subr.bf16.mxu1 %v9703_v12  ;;  %3018 = vmatprep.subr.bf16.mxu0 %v9736_v13  ;;  %v11654_v12 = vld [vmem:[%s11379_s16 + $0x2] sm:$0x3] }
 0x259   : > { %3048 = vmatpush1.bf16.msra.mxu1 %v9701_v14  ;;  %3019 = vmatpush1.bf16.msra.mxu0 %v9734_v15  ;;  %v9788_v15 = vld [vmem:[%s11381_s1 + $0x200] ss:$16 sps:$4 sm:$0xff]  }
 0x25a   : > { %3049 = vmatprep.subr.bf16.mxu1 %v9709_v16  ;;  %3020 = vmatprep.subr.bf16.mxu0 %v9742_v17  ;;  %v9791_v16 = vld [vmem:[%s11381_s1 + $0x208] ss:$16 sps:$4 sm:$0xff]   ;;  %v1152_v17 = vrot.slane %v11654_v12, %v11649_v2 }
 0x25d   : > { %3050 = vmatpush1.bf16.msra.mxu1 %v9707_v18  ;;  %3021 = vmatpush1.bf16.msra.mxu0 %v9740_v19  ;;  %v9796_v19 = vld [vmem:[%s11381_s1 + $0x224] ss:$16 sps:$4 sm:$0xff]  }
 0x25e   : > { %3051 = vmatprep.subr.bf16.mxu1 %v9715_v20  ;;  %3022 = vmatprep.subr.bf16.mxu0 %v9748_v21  ;;  %v9799_v20 = vld [vmem:[%s11381_s1 + $0x22c] ss:$16 sps:$4 sm:$0xff]  }
 0x261   : > { %3052 = vmatpush1.bf16.msra.mxu1 %v9713_v22  ;;  %3023 = vmatpush1.bf16.msra.mxu0 %v9746_v23  ;;  %v9794_v23 = vld [vmem:[%s11381_s1 + $0x220] ss:$16 sps:$4 sm:$0xff]  }
 0x262   : > { %3053 = vmatprep.subr.bf16.mxu1 %v9721_v24  ;;  %3024 = vmatprep.subr.bf16.mxu0 %v9754_v25  ;;  %v9797_v24 = vld [vmem:[%s11381_s1 + $0x228] ss:$16 sps:$4 sm:$0xff]  }
 0x265   : > { %3054 = vmatpush1.bf16.msra.mxu1 %v9719_v26  ;;  %3025 = vmatpush1.bf16.msra.mxu0 %v9752_v27  ;;  %v9802_v27 = vld [vmem:[%s11381_s1 + $0x244] ss:$16 sps:$4 sm:$0xff]  }
 0x266   : > { %3055 = vmatprep.subr.bf16.mxu1 %v9727_v28  ;;  %3026 = vmatprep.subr.bf16.mxu0 %v9760_v29  ;;  %v9805_v28 = vld [vmem:[%s11381_s1 + $0x24c] ss:$16 sps:$4 sm:$0xff]  }
 0x269   : > { %3056 = vmatpush1.bf16.msra.mxu1 %v9725_v30  ;;  %3027 = vmatpush1.bf16.msra.mxu0 %v9758_v31  ;;  %v9800_v31 = vld [vmem:[%s11381_s1 + $0x240] ss:$16 sps:$4 sm:$0xff]  }
 0x26a   : > { %3057 = vmatprep.subr.bf16.mxu1 %v9733_v32  ;;  %3028 = vmatprep.subr.bf16.mxu0 %v9766_v34  ;;  %v9803_v32 = vld [vmem:[%s11381_s1 + $0x248] ss:$16 sps:$4 sm:$0xff]  }
 0x26d   : > { %3058 = vmatpush1.bf16.msra.mxu1 %v9731_v35  ;;  %3029 = vmatpush1.bf16.msra.mxu0 %v9764_v36  ;;  %v9808_v35 = vld [vmem:[%s11381_s1 + $0x264] ss:$16 sps:$4 sm:$0xff]   ;;  %v9811_v36 = vld [vmem:[%s11381_s1 + $0x26c] ss:$16 sps:$4 sm:$0xff]  }
 0x26e   : > { %3059 = vmatprep.subr.bf16.mxu1 %v9739_v37  ;;  %3030 = vmatprep.subr.bf16.mxu0 %v9772_v38  ;;  %v9806_v37 = vld [vmem:[%s11381_s1 + $0x260] ss:$16 sps:$4 sm:$0xff]   ;;  %v9809_v38 = vld [vmem:[%s11381_s1 + $0x268] ss:$16 sps:$4 sm:$0xff]  }
 0x271   : > { %3060 = vmatpush1.bf16.msra.mxu1 %v9737_v39  ;;  %3031 = vmatpush1.bf16.msra.mxu0 %v9770_v40  ;;  %v9814_v39 = vld [vmem:[%s11381_s1 + $0x284] ss:$16 sps:$4 sm:$0xff]   ;;  %v9817_v40 = vld [vmem:[%s11381_s1 + $0x28c] ss:$16 sps:$4 sm:$0xff]  }
 0x272   : > { %3061 = vmatprep.subr.bf16.mxu1 %v9745_v41  ;;  %3032 = vmatprep.subr.bf16.mxu0 %v9778_v42  ;;  %v9812_v41 = vld [vmem:[%s11381_s1 + $0x280] ss:$16 sps:$4 sm:$0xff]   ;;  %v9815_v42 = vld [vmem:[%s11381_s1 + $0x288] ss:$16 sps:$4 sm:$0xff]  }
 0x275   : > { %3062 = vmatpush1.bf16.msra.mxu1 %v9743_v9  ;;  %3033 = vmatpush1.bf16.msra.mxu0 %v9776_v43  ;;  %v9820_v9 = vld [vmem:[%s11381_s1 + $0x2a4] ss:$16 sps:$4 sm:$0xff]   ;;  %v9823_v43 = vld [vmem:[%s11381_s1 + $0x2ac] ss:$16 sps:$4 sm:$0xff]  }
 0x276   : > { %3063 = vmatprep.subr.bf16.mxu1 %v9751_v44  ;;  %3034 = vmatprep.subr.bf16.mxu0 %v9784_v45  ;;  %v9818_v44 = vld [vmem:[%s11381_s1 + $0x2a0] ss:$16 sps:$4 sm:$0xff]   ;;  %v9821_v45 = vld [vmem:[%s11381_s1 + $0x2a8] ss:$16 sps:$4 sm:$0xff]  }
 0x279   : > { %3064 = vmatpush1.bf16.msra.mxu1 %v9749_v46  ;;  %3035 = vmatpush1.bf16.msra.mxu0 %v9782_v47  ;;  %v9826_v46 = vld [vmem:[%s11381_s1 + $0x2c4] ss:$16 sps:$4 sm:$0xff]   ;;  %v9829_v47 = vld [vmem:[%s11381_s1 + $0x2cc] ss:$16 sps:$4 sm:$0xff]  }
 0x27a   : > { %3065 = vmatprep.subr.bf16.mxu1 %v9757_v48  ;;  %3406 = vmatprep.subr.bf16.mxu0 %v9790_v49  ;;  %v9824_v48 = vld [vmem:[%s11381_s1 + $0x2c0] ss:$16 sps:$4 sm:$0xff]   ;;  %v9827_v49 = vld [vmem:[%s11381_s1 + $0x2c8] ss:$16 sps:$4 sm:$0xff]  }
 0x27d   : > { %3066 = vmatpush1.bf16.msra.mxu1 %v9755_v50  ;;  %v9832_v50 = vld [vmem:[%s11381_s1 + $0x2e4] ss:$16 sps:$4 sm:$0xff]  }
 0x27e   : > { %3067 = vmatprep.subr.bf16.mxu1 %v9763_v33  ;;  %v9835_v33 = vld [vmem:[%s11381_s1 + $0x2ec] ss:$16 sps:$4 sm:$0xff]  }
 0x281   : > { %3068 = vmatpush1.bf16.msra.mxu1 %v9761_v52 }
 0x282   : > { %3069 = vmatprep.subr.bf16.mxu1 %v9769_v53 }
 0x285   : > { %3070 = vmatpush1.bf16.msra.mxu1 %v9767_v54  ;;  %v9830_v54 = vld [vmem:[%s11381_s1 + $0x2e0] ss:$16 sps:$4 sm:$0xff]  }
 0x286   : > { %3071 = vmatprep.subr.bf16.mxu1 %v9775_v55  ;;  %v9833_v55 = vld [vmem:[%s11381_s1 + $0x2e8] ss:$16 sps:$4 sm:$0xff]  }
 0x289   : > { %3072 = vmatpush1.bf16.msra.mxu1 %v9773_v56 }
 0x28a   : > { %3073 = vmatprep.subr.bf16.mxu1 %v9781_v58  ;;  %v9838_v58 = vld [vmem:[%s11381_s1 + $0x304] ss:$16 sps:$4 sm:$0xff]  }
 0x28d   : > { %3074 = vmatpush1.bf16.msra.mxu1 %v9779_v59  ;;  %v9841_v59 = vld [vmem:[%s11381_s1 + $0x30c] ss:$16 sps:$4 sm:$0xff]  }
 0x28e   : > { %3075 = vmatprep.subr.bf16.mxu1 %v9787_v60 }
 0x291   : > { %3076 = vmatpush1.bf16.msra.mxu1 %v9785_v61  ;;  %v9836_v61 = vld [vmem:[%s11381_s1 + $0x300] ss:$16 sps:$4 sm:$0xff]  }
 0x292   : > { %3447 = vmatprep.subr.bf16.mxu1 %v9793_v62  ;;  %v9839_v62 = vld [vmem:[%s11381_s1 + $0x308] ss:$16 sps:$4 sm:$0xff]  }
 0x2c7   : > { %v1321_v5 = vpop.f32.mrb[8].mxu1 }
 0x2c8   : > { %v1322_v6 = vadd.f32 %v1321_v5, %v1140_v3  ;;  %v1323_v51 = vpop.f32.mrb[9].mxu1  ;;  %v9842_v5 = vld [vmem:[%s11381_s1 + $0x320] ss:$16 sps:$4 sm:$0xff]  }
 0x2c9   : > { %v1324_v7 = vadd.f32 %v1323_v51, %v1144_v4  ;;  %v1325_v8 = vpop.f32.mrb[10].mxu1 }
 0x2ca   : > { %v2054_v10 = vmax.f32 %v1322_v6, 0.0  ;;  %v1326_v11 = vpop.f32.mrb[11].mxu1  ;;  %v9845_v6 = vld [vmem:[%s11381_s1 + $0x328] ss:$16 sps:$4 sm:$0xff]   ;;  %v9853_v8 = vld [vmem:[%s11381_s1 + $0x34c] ss:$16 sps:$4 sm:$0xff]  }
 0x2cb   : > { %v2055_v13 = vmax.f32 %v1324_v7, 0.0  ;;  %v9850_v7 = vld [vmem:[%s11381_s1 + $0x344] ss:$16 sps:$4 sm:$0xff]   ;;  %v9848_v11 = vld [vmem:[%s11381_s1 + $0x340] ss:$16 sps:$4 sm:$0xff]  }
 0x2cc   : > { %v2068_v18 = vpack.c.bf16 %v2054_v10, %v2054_v10 }
 0x2cd   : > { %v2069_v14 = vpack.c.bf16 %v2055_v13, %v2055_v13  ;;  %v9851_v13 = vld [vmem:[%s11381_s1 + $0x348] ss:$16 sps:$4 sm:$0xff]  }
 0x2cf   : > { %3036 = vmatprep.mubr.bf16.mxu0 %v2069_v14  ;;  %3077 = vmatprep.mubr.bf16.mxu1 %v2069_v14  ;;  %v11662_v21 = vpop.f32.mrb[20].mxu0  ;;  %v9856_v14 = vld [vmem:[%s11381_s1 + $0x364] ss:$16 sps:$4 sm:$0xff]  }
 0x2d0   : > { %3037 = vmatmul.mubr.bf16.vlgmr.msra.gmra.mrb[32].mxu0 %v2068_v18  ;;  %3078 = vmatmul.mubr.bf16.vlgmr.msra.gmra.mrb[24].mxu1 %v2068_v18  ;;  %v1444_v22 = vpop.f32.mrb[21].mxu0  ;;  %v9862_v18 = vld [vmem:[%s11381_s1 + $0x384] ss:$16 sps:$4 sm:$0xff]  }
 0x2d1   : > { %3407 = vmatpush1.bf16.msra.mxu0 %v9788_v15  ;;  %3448 = vmatpush1.bf16.msra.mxu1 %v9791_v16  ;;  %v1445_v25 = vadd.f32 %v1444_v22, %v1152_v17  ;;  %v1446_v26 = vpop.f32.mrb[22].mxu0  ;;  %v9859_v15 = vld [vmem:[%s11381_s1 + $0x36c] ss:$16 sps:$4 sm:$0xff]   ;;  %v9854_v16 = vld [vmem:[%s11381_s1 + $0x360] ss:$16 sps:$4 sm:$0xff]  }
 0x2d2   : > { %3408 = vmatprep.subr.bf16.mxu0 %v9796_v19  ;;  %3449 = vmatprep.subr.bf16.mxu1 %v9799_v20  ;;  %v1447_v29 = vpop.f32.mrb[23].mxu0  ;;  %v9857_v17 = vld [vmem:[%s11381_s1 + $0x368] ss:$16 sps:$4 sm:$0xff]   ;;  %v9865_v19 = vld [vmem:[%s11381_s1 + $0x38c] ss:$16 sps:$4 sm:$0xff]  }
 0x2d3   : > { %v2057_v30 = vmax.f32 %v1445_v25, 0.0  ;;  %v9860_v20 = vld [vmem:[%s11381_s1 + $0x380] ss:$16 sps:$4 sm:$0xff]   ;;  %v9863_v22 = vld [vmem:[%s11381_s1 + $0x388] ss:$16 sps:$4 sm:$0xff]   ;;  %v1148_v25 = vrot.slane %v11654_v12, %v11645_v1 }
 0x2d4   : > { %v11723_v26 = vld [vmem:[%s11379_s16 + $0x4] sm:$0x3]  ;;  %v9872_v12 = vld [vmem:[%s11381_s1 + $0x3c0] ss:$16 sps:$4 sm:$0xff]  }
 0x2d5   : > { %3409 = vmatpush1.bf16.msra.mxu0 %v9794_v23  ;;  %3450 = vmatpush1.bf16.msra.mxu1 %v9797_v24  ;;  %v2071_v34 = vpack.c.bf16 %v2057_v30, %v2057_v30  ;;  %v9868_v23 = vld [vmem:[%s11381_s1 + $0x3a4] ss:$16 sps:$4 sm:$0xff]   ;;  %v9871_v24 = vld [vmem:[%s11381_s1 + $0x3ac] ss:$16 sps:$4 sm:$0xff]  }
 0x2d6   : > { %3410 = vmatprep.subr.bf16.mxu0 %v9802_v27  ;;  %3451 = vmatprep.subr.bf16.mxu1 %v9805_v28  ;;  %v9866_v27 = vld [vmem:[%s11381_s1 + $0x3a0] ss:$16 sps:$4 sm:$0xff]   ;;  %v9869_v28 = vld [vmem:[%s11381_s1 + $0x3a8] ss:$16 sps:$4 sm:$0xff]   ;;  %v9874_v29 = vld [vmem:[%s11381_s1 + $0x3c4] ss:$16 sps:$4 sm:$0xff]  }
 0x2d7   : > { %3438 = vmatprep.mubr.bf16.mxu0 %v2071_v34  ;;  %3479 = vmatprep.mubr.bf16.mxu1 %v2071_v34  ;;  %v9877_v30 = vld [vmem:[%s11381_s1 + $0x3cc] ss:$16 sps:$4 sm:$0xff]   ;;  %v9875_v34 = vld [vmem:[%s11381_s1 + $0x3c8] ss:$16 sps:$4 sm:$0xff]  }
 0x2d9   : > { %3411 = vmatpush1.bf16.msra.mxu0 %v9800_v31  ;;  %3452 = vmatpush1.bf16.msra.mxu1 %v9803_v32  ;;  %v1160_v31 = vrot.slane %v11723_v26, %v11649_v2  ;;  %v1443_v32 = vadd.f32 %v11662_v21, %v1148_v25  ;;  %v9878_v21 = vld [vmem:[%s11381_s1 + $0x3e0] ss:$16 sps:$4 sm:$0xff]  }
 0x2da   : > { %3412 = vmatprep.subr.bf16.mxu0 %v9808_v35  ;;  %3453 = vmatprep.subr.bf16.mxu1 %v9811_v36  ;;  %v9880_v35 = vld [vmem:[%s11381_s1 + $0x3e4] ss:$16 sps:$4 sm:$0xff]   ;;  %v9883_v36 = vld [vmem:[%s11381_s1 + $0x3ec] ss:$16 sps:$4 sm:$0xff]  }
 0x2dd   : > { %3413 = vmatpush1.bf16.msra.mxu0 %v9806_v37  ;;  %3454 = vmatpush1.bf16.msra.mxu1 %v9809_v38 }
 0x2de   : > { %3414 = vmatprep.subr.bf16.mxu0 %v9814_v39  ;;  %3455 = vmatprep.subr.bf16.mxu1 %v9817_v40  ;;  %v2056_v39 = vmax.f32 %v1443_v32, 0.0 }
 0x2e1   : > { %3415 = vmatpush1.bf16.msra.mxu0 %v9812_v41  ;;  %3456 = vmatpush1.bf16.msra.mxu1 %v9815_v42  ;;  %v9881_v41 = vld [vmem:[%s11381_s1 + $0x3e8] ss:$16 sps:$4 sm:$0xff]  }
 0x2e2   : > { %3416 = vmatprep.subr.bf16.mxu0 %v9820_v9  ;;  %3457 = vmatprep.subr.bf16.mxu1 %v9823_v43  ;;  %v9886_v9 = vld [vmem:[%s11381_s1 + $0x404] ss:$16 sps:$4 sm:$0xff]   ;;  %v9889_v43 = vld [vmem:[%s11381_s1 + $0x40c] ss:$16 sps:$4 sm:$0xff]  }
 0x2e5   : > { %3417 = vmatpush1.bf16.msra.mxu0 %v9818_v44  ;;  %3458 = vmatpush1.bf16.msra.mxu1 %v9821_v45 }
 0x2e6   : > { %3418 = vmatprep.subr.bf16.mxu0 %v9826_v46  ;;  %3459 = vmatprep.subr.bf16.mxu1 %v9829_v47  ;;  %v2070_v46 = vpack.c.bf16 %v2056_v39, %v2056_v39  ;;  %v9884_v47 = vld [vmem:[%s11381_s1 + $0x400] ss:$16 sps:$4 sm:$0xff]   ;;  %v9941_v39 = vld [vmem:[%s11381_s1 + $0x528] ss:$16 sps:$4 sm:$0xff]  }
 0x2e7   : > { %v11688_v52 = vpop.f32.mrb[12].mxu1 }
 0x2e8   : > { %v11690_v53 = vpop.f32.mrb[13].mxu1 }
 0x2e9   : > { %3419 = vmatpush1.bf16.msra.mxu0 %v9824_v48  ;;  %3460 = vmatpush1.bf16.msra.mxu1 %v9827_v49  ;;  %v1567_v56 = vpop.f32.mrb[14].mxu1  ;;  %v1566_v37 = vadd.f32 %v11690_v53, %v1160_v31  ;;  %v9887_v48 = vld [vmem:[%s11381_s1 + $0x408] ss:$16 sps:$4 sm:$0xff]   ;;  %v9892_v49 = vld [vmem:[%s11381_s1 + $0x424] ss:$16 sps:$4 sm:$0xff]  }
 0x2ea   : > { %3420 = vmatprep.subr.bf16.mxu0 %v9832_v50  ;;  %3461 = vmatprep.subr.bf16.mxu1 %v9835_v33  ;;  %v1568_v60 = vpop.f32.mrb[15].mxu1  ;;  %v9895_v50 = vld [vmem:[%s11381_s1 + $0x42c] ss:$16 sps:$4 sm:$0xff]   ;;  %v9893_v56 = vld [vmem:[%s11381_s1 + $0x428] ss:$16 sps:$4 sm:$0xff]  }
 0x2eb   : > { %v2059_v45 = vmax.f32 %v1566_v37, 0.0  ;;  %v9901_v60 = vld [vmem:[%s11381_s1 + $0x44c] ss:$16 sps:$4 sm:$0xff]   ;;  %v9938_v37 = vld [vmem:[%s11381_s1 + $0x520] ss:$16 sps:$4 sm:$0xff]  }
 0x2ec   : > { %v9937_v31 = vld [vmem:[%s11381_s1 + $0x50c] ss:$16 sps:$4 sm:$0xff]  }
 0x2ed   : > { %3421 = vmatpush1.bf16.msra.mxu0 %v9830_v54  ;;  %3462 = vmatpush1.bf16.msra.mxu1 %v9833_v55  ;;  %v2073_v33 = vpack.c.bf16 %v2059_v45, %v2059_v45  ;;  %v9890_v55 = vld [vmem:[%s11381_s1 + $0x420] ss:$16 sps:$4 sm:$0xff]  }
 0x2ee   : > { %3422 = vmatprep.subr.bf16.mxu0 %v9838_v58  ;;  %3463 = vmatprep.subr.bf16.mxu1 %v9841_v59  ;;  %v9898_v59 = vld [vmem:[%s11381_s1 + $0x444] ss:$16 sps:$4 sm:$0xff]   ;;  %v9950_v45 = vld [vmem:[%s11381_s1 + $0x560] ss:$16 sps:$4 sm:$0xff]  }
 0x2ef   : > { %v11700_v3 = vpop.f32.mrb[24].mxu0 }
 0x2f0   : > { %v11702_v4 = vpop.f32.mrb[25].mxu0 }
 0x2f1   : > { %3423 = vmatpush1.bf16.msra.mxu0 %v9836_v61  ;;  %3464 = vmatpush1.bf16.msra.mxu1 %v9839_v62  ;;  %v1688_v51 = vpop.f32.mrb[26].mxu0  ;;  %v9896_v62 = vld [vmem:[%s11381_s1 + $0x440] ss:$16 sps:$4 sm:$0xff]  }
 0x2f2   : > { %3424 = vmatprep.subr.bf16.mxu0 %v9844_v63  ;;  %3465 = vmatprep.subr.bf16.mxu1 %v9847_v57  ;;  %v1689_v10 = vpop.f32.mrb[27].mxu0  ;;  %v9899_v63 = vld [vmem:[%s11381_s1 + $0x448] ss:$16 sps:$4 sm:$0xff]   ;;  %v9904_v57 = vld [vmem:[%s11381_s1 + $0x464] ss:$16 sps:$4 sm:$0xff]  }
 0x2f3   : > { %v9905_v51 = vld [vmem:[%s11381_s1 + $0x468] ss:$16 sps:$4 sm:$0xff]   ;;  %v9908_v10 = vld [vmem:[%s11381_s1 + $0x480] ss:$16 sps:$4 sm:$0xff]  }
 0x2f5   : > { %3425 = vmatpush1.bf16.msra.mxu0 %v9842_v5  ;;  %3466 = vmatpush1.bf16.msra.mxu1 %v9845_v6  ;;  %v9907_v5 = vld [vmem:[%s11381_s1 + $0x46c] ss:$16 sps:$4 sm:$0xff]   ;;  %v9902_v6 = vld [vmem:[%s11381_s1 + $0x460] ss:$16 sps:$4 sm:$0xff]  }
 0x2f6   : > { %3426 = vmatprep.subr.bf16.mxu0 %v9850_v7  ;;  %3467 = vmatprep.subr.bf16.mxu1 %v9853_v8  ;;  %v9910_v7 = vld [vmem:[%s11381_s1 + $0x484] ss:$16 sps:$4 sm:$0xff]   ;;  %v9913_v8 = vld [vmem:[%s11381_s1 + $0x48c] ss:$16 sps:$4 sm:$0xff]  }
 0x2f9   : > { %3427 = vmatpush1.bf16.msra.mxu0 %v9848_v11  ;;  %3468 = vmatpush1.bf16.msra.mxu1 %v9851_v13  ;;  %v9911_v11 = vld [vmem:[%s11381_s1 + $0x488] ss:$16 sps:$4 sm:$0xff]   ;;  %v9916_v13 = vld [vmem:[%s11381_s1 + $0x4a4] ss:$16 sps:$4 sm:$0xff]  }
 0x2fa   : > { %3428 = vmatprep.subr.bf16.mxu0 %v9856_v14  ;;  %3469 = vmatprep.subr.bf16.mxu1 %v9859_v15  ;;  %v9919_v14 = vld [vmem:[%s11381_s1 + $0x4ac] ss:$16 sps:$4 sm:$0xff]   ;;  %v9914_v15 = vld [vmem:[%s11381_s1 + $0x4a0] ss:$16 sps:$4 sm:$0xff]  }
 0x2fd   : > { %3429 = vmatpush1.bf16.msra.mxu0 %v9854_v16  ;;  %3470 = vmatpush1.bf16.msra.mxu1 %v9857_v17  ;;  %v9917_v16 = vld [vmem:[%s11381_s1 + $0x4a8] ss:$16 sps:$4 sm:$0xff]   ;;  %v9922_v17 = vld [vmem:[%s11381_s1 + $0x4c4] ss:$16 sps:$4 sm:$0xff]  }
 0x2fe   : > { %3430 = vmatprep.subr.bf16.mxu0 %v9862_v18  ;;  %3471 = vmatprep.subr.bf16.mxu1 %v9865_v19  ;;  %v9925_v18 = vld [vmem:[%s11381_s1 + $0x4cc] ss:$16 sps:$4 sm:$0xff]   ;;  %v9920_v19 = vld [vmem:[%s11381_s1 + $0x4c0] ss:$16 sps:$4 sm:$0xff]  }
 0x301   : > { %3431 = vmatpush1.bf16.msra.mxu0 %v9860_v20  ;;  %3472 = vmatpush1.bf16.msra.mxu1 %v9863_v22  ;;  %v9923_v20 = vld [vmem:[%s11381_s1 + $0x4c8] ss:$16 sps:$4 sm:$0xff]   ;;  %v9928_v22 = vld [vmem:[%s11381_s1 + $0x4e4] ss:$16 sps:$4 sm:$0xff]  }
 0x302   : > { %3432 = vmatprep.subr.bf16.mxu0 %v9868_v23  ;;  %3473 = vmatprep.subr.bf16.mxu1 %v9871_v24  ;;  %v9931_v23 = vld [vmem:[%s11381_s1 + $0x4ec] ss:$16 sps:$4 sm:$0xff]  }
 0x305   : > { %3433 = vmatpush1.bf16.msra.mxu0 %v9866_v27  ;;  %3474 = vmatpush1.bf16.msra.mxu1 %v9869_v28  ;;  %v9926_v27 = vld [vmem:[%s11381_s1 + $0x4e0] ss:$16 sps:$4 sm:$0xff]   ;;  %v9929_v28 = vld [vmem:[%s11381_s1 + $0x4e8] ss:$16 sps:$4 sm:$0xff]  }
 0x306   : > { %3434 = vmatprep.subr.bf16.mxu0 %v9874_v29  ;;  %3475 = vmatprep.subr.bf16.mxu1 %v9877_v30  ;;  %v9934_v30 = vld [vmem:[%s11381_s1 + $0x504] ss:$16 sps:$4 sm:$0xff]  }
 0x307   : > { %v11737_v38 = vpop.f32.mrb[16].mxu1 }
 0x308   : > { %v11739_v40 = vpop.f32.mrb[17].mxu1 }
 0x309   : > { %3435 = vmatpush1.bf16.msra.mxu0 %v9872_v12  ;;  %3476 = vmatpush1.bf16.msra.mxu1 %v9875_v34  ;;  %v1809_v42 = vpop.f32.mrb[18].mxu1  ;;  %v9932_v12 = vld [vmem:[%s11381_s1 + $0x500] ss:$16 sps:$4 sm:$0xff]   ;;  %v9935_v34 = vld [vmem:[%s11381_s1 + $0x508] ss:$16 sps:$4 sm:$0xff]  }
 0x30a   : > { %3436 = vmatprep.subr.bf16.mxu0 %v9880_v35  ;;  %3477 = vmatprep.subr.bf16.mxu1 %v9883_v36  ;;  %v1810_v44 = vpop.f32.mrb[19].mxu1  ;;  %v9940_v35 = vld [vmem:[%s11381_s1 + $0x524] ss:$16 sps:$4 sm:$0xff]   ;;  %v9943_v36 = vld [vmem:[%s11381_s1 + $0x52c] ss:$16 sps:$4 sm:$0xff]  }
 0x30b   : > { %v9944_v42 = vld [vmem:[%s11381_s1 + $0x540] ss:$16 sps:$4 sm:$0xff]   ;;  %v9955_v44 = vld [vmem:[%s11381_s1 + $0x56c] ss:$16 sps:$4 sm:$0xff]  }
 0x30d   : > { %3437 = vmatpush1.bf16.msra.mxu0 %v9878_v21  ;;  %3478 = vmatpush1.bf16.msra.mxu1 %v9881_v41  ;;  %v9946_v21 = vld [vmem:[%s11381_s1 + $0x544] ss:$16 sps:$4 sm:$0xff]   ;;  %v9949_v41 = vld [vmem:[%s11381_s1 + $0x54c] ss:$16 sps:$4 sm:$0xff]  }
 0x30e   : > { %3808 = vmatprep.subr.bf16.mxu0 %v9886_v9  ;;  %3849 = vmatprep.subr.bf16.mxu1 %v9889_v43  ;;  %v9947_v9 = vld [vmem:[%s11381_s1 + $0x548] ss:$16 sps:$4 sm:$0xff]   ;;  %v9952_v43 = vld [vmem:[%s11381_s1 + $0x564] ss:$16 sps:$4 sm:$0xff]  }
 0x30f   : > { %v11749_v53 = vpop.f32.mrb[28].mxu0 }
 0x310   : > { %3439 = vmatmul.mubr.bf16.vlgmr.msra.gmra.mrb[36].mxu0 %v2070_v46  ;;  %3480 = vmatmul.mubr.bf16.vlgmr.msra.gmra.mrb[28].mxu1 %v2070_v46  ;;  %v11751_v54 = vpop.f32.mrb[29].mxu0  ;;  %v9953_v46 = vld [vmem:[%s11381_s1 + $0x568] ss:$16 sps:$4 sm:$0xff]  }
 0x311   : > { %3809 = vmatpush1.bf16.msra.mxu0 %v9884_v47  ;;  %3850 = vmatpush1.bf16.msra.mxu1 %v9887_v48  ;;  %v1930_v58 = vpop.f32.mrb[30].mxu0  ;;  %v9958_v47 = vld [vmem:[%s11381_s1 + $0x584] ss:$16 sps:$4 sm:$0xff]   ;;  %v9961_v48 = vld [vmem:[%s11381_s1 + $0x58c] ss:$16 sps:$4 sm:$0xff]  }
 0x312   : > { %3810 = vmatprep.subr.bf16.mxu0 %v9892_v49  ;;  %3851 = vmatprep.subr.bf16.mxu1 %v9895_v50  ;;  %v1931_v61 = vpop.f32.mrb[31].mxu0  ;;  %v9956_v49 = vld [vmem:[%s11381_s1 + $0x580] ss:$16 sps:$4 sm:$0xff]   ;;  %v9959_v50 = vld [vmem:[%s11381_s1 + $0x588] ss:$16 sps:$4 sm:$0xff]  }
 0x313   : > { %3840 = vmatprep.mubr.bf16.mxu0 %v2073_v33  ;;  %3881 = vmatprep.mubr.bf16.mxu1 %v2073_v33  ;;  %v9964_v33 = vld [vmem:[%s11381_s1 + $0x5a4] ss:$16 sps:$4 sm:$0xff]   ;;  %v9962_v58 = vld [vmem:[%s11381_s1 + $0x5a0] ss:$16 sps:$4 sm:$0xff]  }
 0x314   : > { %v9970_v61 = vld [vmem:[%s11381_s1 + $0x5c4] ss:$16 sps:$4 sm:$0xff]  }
 0x315   : > { %3811 = vmatpush1.bf16.msra.mxu0 %v9890_v55  ;;  %3852 = vmatpush1.bf16.msra.mxu1 %v9893_v56  ;;  %v9967_v55 = vld [vmem:[%s11381_s1 + $0x5ac] ss:$16 sps:$4 sm:$0xff]   ;;  %v11806_v56 = vld [vmem:[%s11379_s16 + $0x6] sm:$0x3] }
 0x316   : > { %3812 = vmatprep.subr.bf16.mxu0 %v9898_v59  ;;  %3853 = vmatprep.subr.bf16.mxu1 %v9901_v60  ;;  %v9965_v59 = vld [vmem:[%s11381_s1 + $0x5a8] ss:$16 sps:$4 sm:$0xff]   ;;  %v1156_v60 = vrot.slane %v11723_v26, %v11645_v1  ;;  %v9976_v26 = vld [vmem:[%s11381_s1 + $0x5e4] ss:$16 sps:$4 sm:$0xff]  }
 0x319   : > { %3813 = vmatpush1.bf16.msra.mxu0 %v9896_v62  ;;  %3854 = vmatpush1.bf16.msra.mxu1 %v9899_v63  ;;  %v9973_v62 = vld [vmem:[%s11381_s1 + $0x5cc] ss:$16 sps:$4 sm:$0xff]   ;;  %v1168_v63 = vrot.slane %v11806_v56, %v11649_v2 }
 0x31a   : > { %3814 = vmatprep.subr.bf16.mxu0 %v9904_v57  ;;  %3855 = vmatprep.subr.bf16.mxu1 %v9907_v5  ;;  %v9968_v57 = vld [vmem:[%s11381_s1 + $0x5c0] ss:$16 sps:$4 sm:$0xff]   ;;  %v9971_v5 = vld [vmem:[%s11381_s1 + $0x5c8] ss:$16 sps:$4 sm:$0xff]  }
 0x31d   : > { %3815 = vmatpush1.bf16.msra.mxu0 %v9902_v6  ;;  %3856 = vmatpush1.bf16.msra.mxu1 %v9905_v51  ;;  %v1564_v6 = vadd.f32 %v11688_v52, %v1156_v60  ;;  %v9979_v51 = vld [vmem:[%s11381_s1 + $0x5ec] ss:$16 sps:$4 sm:$0xff]  }
 0x31e   : > { %3816 = vmatprep.subr.bf16.mxu0 %v9910_v7  ;;  %3857 = vmatprep.subr.bf16.mxu1 %v9913_v8  ;;  %v1687_v7 = vadd.f32 %v11702_v4, %v1168_v63  ;;  %v9974_v8 = vld [vmem:[%s11381_s1 + $0x5e0] ss:$16 sps:$4 sm:$0xff]   ;;  %v10039_v60 = vld [vmem:[%s11381_s1 + $0x72c] ss:$16 sps:$4 sm:$0xff]   ;;  %v10042_v63 = vld [vmem:[%s11381_s1 + $0x744] ss:$16 sps:$4 sm:$0xff]  }
 0x320   : > { %v2061_v52 = vmax.f32 %v1687_v7, 0.0  ;;  %v10046_v7 = vld [vmem:[%s11381_s1 + $0x760] ss:$16 sps:$4 sm:$0xff]  }
 0x321   : > { %3817 = vmatpush1.bf16.msra.mxu0 %v9908_v10  ;;  %3858 = vmatpush1.bf16.msra.mxu1 %v9911_v11  ;;  %v9977_v10 = vld [vmem:[%s11381_s1 + $0x5e8] ss:$16 sps:$4 sm:$0xff]   ;;  %v2058_v11 = vmax.f32 %v1564_v6, 0.0 }
 0x322   : > { %3818 = vmatprep.subr.bf16.mxu0 %v9916_v13  ;;  %3859 = vmatprep.subr.bf16.mxu1 %v9919_v14  ;;  %v9982_v13 = vld [vmem:[%s11381_s1 + $0x604] ss:$16 sps:$4 sm:$0xff]   ;;  %v9985_v14 = vld [vmem:[%s11381_s1 + $0x60c] ss:$16 sps:$4 sm:$0xff]   ;;  %v10043_v6 = vld [vmem:[%s11381_s1 + $0x748] ss:$16 sps:$4 sm:$0xff]  }
 0x323   : > { %v2072_v4 = vpack.c.bf16 %v2058_v11, %v2058_v11  ;;  %v10057_v11 = vld [vmem:[%s11381_s1 + $0x78c] ss:$16 sps:$4 sm:$0xff]  }
 0x325   : > { %3819 = vmatpush1.bf16.msra.mxu0 %v9914_v15  ;;  %3860 = vmatpush1.bf16.msra.mxu1 %v9917_v16  ;;  %v9980_v15 = vld [vmem:[%s11381_s1 + $0x600] ss:$16 sps:$4 sm:$0xff]   ;;  %v9983_v16 = vld [vmem:[%s11381_s1 + $0x608] ss:$16 sps:$4 sm:$0xff]  }
 0x326   : > { %3820 = vmatprep.subr.bf16.mxu0 %v9922_v17  ;;  %3861 = vmatprep.subr.bf16.mxu1 %v9925_v18  ;;  %v2075_v17 = vpack.c.bf16 %v2061_v52, %v2061_v52  ;;  %v9988_v18 = vld [vmem:[%s11381_s1 + $0x624] ss:$16 sps:$4 sm:$0xff]  }
 0x327   : > { %v11777_v24 = vpop.f32.mrb[20].mxu1  ;;  %v10060_v52 = vld [vmem:[%s11381_s1 + $0x7a4] ss:$16 sps:$4 sm:$0xff]  }
 0x328   : > { %v11779_v25 = vpop.f32.mrb[21].mxu1 }
 0x329   : > { %3821 = vmatpush1.bf16.msra.mxu0 %v9920_v19  ;;  %3862 = vmatpush1.bf16.msra.mxu1 %v9923_v20  ;;  %v2051_v29 = vpop.f32.mrb[22].mxu1  ;;  %v9991_v19 = vld [vmem:[%s11381_s1 + $0x62c] ss:$16 sps:$4 sm:$0xff]   ;;  %v9986_v20 = vld [vmem:[%s11381_s1 + $0x620] ss:$16 sps:$4 sm:$0xff]  }
 0x32a   : > { %3822 = vmatprep.subr.bf16.mxu0 %v9928_v22  ;;  %3863 = vmatprep.subr.bf16.mxu1 %v9931_v23  ;;  %v2052_v32 = vpop.f32.mrb[23].mxu1  ;;  %v9989_v22 = vld [vmem:[%s11381_s1 + $0x628] ss:$16 sps:$4 sm:$0xff]   ;;  %v9994_v23 = vld [vmem:[%s11381_s1 + $0x644] ss:$16 sps:$4 sm:$0xff]  }
 0x32b   : > { %v9995_v29 = vld [vmem:[%s11381_s1 + $0x648] ss:$16 sps:$4 sm:$0xff]   ;;  %v9998_v32 = vld [vmem:[%s11381_s1 + $0x660] ss:$16 sps:$4 sm:$0xff]  }
 0x32d   : > { %3823 = vmatpush1.bf16.msra.mxu0 %v9926_v27  ;;  %3864 = vmatpush1.bf16.msra.mxu1 %v9929_v28  ;;  %v9997_v27 = vld [vmem:[%s11381_s1 + $0x64c] ss:$16 sps:$4 sm:$0xff]   ;;  %v9992_v28 = vld [vmem:[%s11381_s1 + $0x640] ss:$16 sps:$4 sm:$0xff]  }
 0x32e   : > { %3824 = vmatprep.subr.bf16.mxu0 %v9934_v30  ;;  %3865 = vmatprep.subr.bf16.mxu1 %v9937_v31  ;;  %v10000_v30 = vld [vmem:[%s11381_s1 + $0x664] ss:$16 sps:$4 sm:$0xff]   ;;  %v10003_v31 = vld [vmem:[%s11381_s1 + $0x66c] ss:$16 sps:$4 sm:$0xff]  }
 0x331   : > { %3825 = vmatpush1.bf16.msra.mxu0 %v9932_v12  ;;  %3866 = vmatpush1.bf16.msra.mxu1 %v9935_v34  ;;  %v10001_v12 = vld [vmem:[%s11381_s1 + $0x668] ss:$16 sps:$4 sm:$0xff]   ;;  %v10006_v34 = vld [vmem:[%s11381_s1 + $0x684] ss:$16 sps:$4 sm:$0xff]  }
 0x332   : > { %3826 = vmatprep.subr.bf16.mxu0 %v9940_v35  ;;  %3867 = vmatprep.subr.bf16.mxu1 %v9943_v36  ;;  %v10009_v35 = vld [vmem:[%s11381_s1 + $0x68c] ss:$16 sps:$4 sm:$0xff]   ;;  %v10004_v36 = vld [vmem:[%s11381_s1 + $0x680] ss:$16 sps:$4 sm:$0xff]  }
 0x335   : > { %3827 = vmatpush1.bf16.msra.mxu0 %v9938_v37  ;;  %3868 = vmatpush1.bf16.msra.mxu1 %v9941_v39  ;;  %v10007_v37 = vld [vmem:[%s11381_s1 + $0x688] ss:$16 sps:$4 sm:$0xff]   ;;  %v10012_v39 = vld [vmem:[%s11381_s1 + $0x6a4] ss:$16 sps:$4 sm:$0xff]  }
 0x336   : > { %3828 = vmatprep.subr.bf16.mxu0 %v9946_v21  ;;  %3869 = vmatprep.subr.bf16.mxu1 %v9949_v41  ;;  %v10015_v21 = vld [vmem:[%s11381_s1 + $0x6ac] ss:$16 sps:$4 sm:$0xff]   ;;  %v10010_v41 = vld [vmem:[%s11381_s1 + $0x6a0] ss:$16 sps:$4 sm:$0xff]  }
 0x339   : > { %3829 = vmatpush1.bf16.msra.mxu0 %v9944_v42  ;;  %3870 = vmatpush1.bf16.msra.mxu1 %v9947_v9  ;;  %v10013_v42 = vld [vmem:[%s11381_s1 + $0x6a8] ss:$16 sps:$4 sm:$0xff]   ;;  %v10018_v9 = vld [vmem:[%s11381_s1 + $0x6c4] ss:$16 sps:$4 sm:$0xff]  }
 0x33a   : > { %3830 = vmatprep.subr.bf16.mxu0 %v9952_v43  ;;  %3871 = vmatprep.subr.bf16.mxu1 %v9955_v44  ;;  %v10021_v43 = vld [vmem:[%s11381_s1 + $0x6cc] ss:$16 sps:$4 sm:$0xff]   ;;  %v10016_v44 = vld [vmem:[%s11381_s1 + $0x6c0] ss:$16 sps:$4 sm:$0xff]  }
 0x33d   : > { %3831 = vmatpush1.bf16.msra.mxu0 %v9950_v45  ;;  %3872 = vmatpush1.bf16.msra.mxu1 %v9953_v46  ;;  %v10019_v45 = vld [vmem:[%s11381_s1 + $0x6c8] ss:$16 sps:$4 sm:$0xff]   ;;  %v10024_v46 = vld [vmem:[%s11381_s1 + $0x6e4] ss:$16 sps:$4 sm:$0xff]  }
 0x33e   : > { %3832 = vmatprep.subr.bf16.mxu0 %v9958_v47  ;;  %3873 = vmatprep.subr.bf16.mxu1 %v9961_v48  ;;  %v10027_v47 = vld [vmem:[%s11381_s1 + $0x6ec] ss:$16 sps:$4 sm:$0xff]   ;;  %v10022_v48 = vld [vmem:[%s11381_s1 + $0x6e0] ss:$16 sps:$4 sm:$0xff]  }
 0x341   : > { %3833 = vmatpush1.bf16.msra.mxu0 %v9956_v49  ;;  %3874 = vmatpush1.bf16.msra.mxu1 %v9959_v50  ;;  %v10025_v49 = vld [vmem:[%s11381_s1 + $0x6e8] ss:$16 sps:$4 sm:$0xff]   ;;  %v10030_v50 = vld [vmem:[%s11381_s1 + $0x704] ss:$16 sps:$4 sm:$0xff]  }
 0x342   : > { %3834 = vmatprep.subr.bf16.mxu0 %v9964_v33  ;;  %3875 = vmatprep.subr.bf16.mxu1 %v9967_v55  ;;  %v10033_v33 = vld [vmem:[%s11381_s1 + $0x70c] ss:$16 sps:$4 sm:$0xff]   ;;  %v10028_v55 = vld [vmem:[%s11381_s1 + $0x700] ss:$16 sps:$4 sm:$0xff]  }
 0x345   : > { %3835 = vmatpush1.bf16.msra.mxu0 %v9962_v58  ;;  %3876 = vmatpush1.bf16.msra.mxu1 %v9965_v59  ;;  %v10031_v58 = vld [vmem:[%s11381_s1 + $0x708] ss:$16 sps:$4 sm:$0xff]   ;;  %v10036_v59 = vld [vmem:[%s11381_s1 + $0x724] ss:$16 sps:$4 sm:$0xff]  }
 0x346   : > { %3836 = vmatprep.subr.bf16.mxu0 %v9970_v61  ;;  %3877 = vmatprep.subr.bf16.mxu1 %v9973_v62  ;;  %v10034_v61 = vld [vmem:[%s11381_s1 + $0x720] ss:$16 sps:$4 sm:$0xff]   ;;  %v10037_v62 = vld [vmem:[%s11381_s1 + $0x728] ss:$16 sps:$4 sm:$0xff]  }
 0x349   : > { %3837 = vmatpush1.bf16.msra.mxu0 %v9968_v57  ;;  %3878 = vmatpush1.bf16.msra.mxu1 %v9971_v5  ;;  %v10045_v57 = vld [vmem:[%s11381_s1 + $0x74c] ss:$16 sps:$4 sm:$0xff]   ;;  %v10040_v5 = vld [vmem:[%s11381_s1 + $0x740] ss:$16 sps:$4 sm:$0xff]  }
 0x34a   : > { %3838 = vmatprep.subr.bf16.mxu0 %v9976_v26  ;;  %3879 = vmatprep.subr.bf16.mxu1 %v9979_v51  ;;  %v10048_v26 = vld [vmem:[%s11381_s1 + $0x764] ss:$16 sps:$4 sm:$0xff]   ;;  %v10051_v51 = vld [vmem:[%s11381_s1 + $0x76c] ss:$16 sps:$4 sm:$0xff]  }
 0x34d   : > { %3839 = vmatpush1.bf16.msra.mxu0 %v9974_v8  ;;  %3880 = vmatpush1.bf16.msra.mxu1 %v9977_v10  ;;  %v10049_v8 = vld [vmem:[%s11381_s1 + $0x768] ss:$16 sps:$4 sm:$0xff]   ;;  %v10054_v10 = vld [vmem:[%s11381_s1 + $0x784] ss:$16 sps:$4 sm:$0xff]  }
 0x34e   : > { %4210 = vmatprep.subr.bf16.mxu0 %v9982_v13  ;;  %4251 = vmatprep.subr.bf16.mxu1 %v9985_v14  ;;  %v10052_v13 = vld [vmem:[%s11381_s1 + $0x780] ss:$16 sps:$4 sm:$0xff]   ;;  %v10055_v14 = vld [vmem:[%s11381_s1 + $0x788] ss:$16 sps:$4 sm:$0xff]  }
 0x350   : > { %3841 = vmatmul.mubr.bf16.vlgmr.msra.gmra.mrb[40].mxu0 %v2072_v4  ;;  %3882 = vmatmul.mubr.bf16.vlgmr.msra.gmra.mrb[32].mxu1 %v2072_v4  ;;  %v11879_v4 = vld [vmem:[%s11379_s16 + $0x8] sm:$0x3] }
 0x351   : > { %4211 = vmatpush1.bf16.msra.mxu0 %v9980_v15  ;;  %4242 = vmatprep.mubr.bf16.mxu0 %v2075_v17  ;;  %v10063_v15 = vld [vmem:[%s11381_s1 + $0x7ac] ss:$16 sps:$4 sm:$0xff]  }
 0x352   : > { %4252 = vmatpush1.bf16.msra.mxu1 %v9983_v16  ;;  %4283 = vmatprep.mubr.bf16.mxu1 %v2075_v17  ;;  %v10058_v16 = vld [vmem:[%s11381_s1 + $0x7a0] ss:$16 sps:$4 sm:$0xff]   ;;  %v1164_v17 = vrot.slane %v11806_v56, %v11645_v1  ;;  %v10067_v56 = vld [vmem:[%s11381_s1 + $0x7c8] ss:$16 sps:$4 sm:$0xff]  }
 0x353   : > { %4212 = vmatprep.subr.bf16.mxu0 %v9988_v18  ;;  %4253 = vmatprep.subr.bf16.mxu1 %v9991_v19  ;;  %v10061_v18 = vld [vmem:[%s11381_s1 + $0x7a8] ss:$16 sps:$4 sm:$0xff]   ;;  %v10066_v19 = vld [vmem:[%s11381_s1 + $0x7c4] ss:$16 sps:$4 sm:$0xff]  }
 0x355   : > { %4213 = vmatpush1.bf16.msra.mxu0 %v9986_v20  ;;  %v10069_v20 = vld [vmem:[%s11381_s1 + $0x7cc] ss:$16 sps:$4 sm:$0xff]  }
 0x356   : > { %4254 = vmatpush1.bf16.msra.mxu1 %v9989_v22  ;;  %4214 = vmatprep.subr.bf16.mxu0 %v9994_v23  ;;  %v1176_v22 = vrot.slane %v11879_v4, %v11649_v2  ;;  %v10064_v23 = vld [vmem:[%s11381_s1 + $0x7c0] ss:$16 sps:$4 sm:$0xff]  }
 0x357   : > { %4255 = vmatprep.subr.bf16.mxu1 %v9997_v27  ;;  %v1685_v27 = vadd.f32 %v11700_v3, %v1164_v17  ;;  %v10078_v3 = vld [vmem:[%s11381_s1 + $0x804] ss:$16 sps:$4 sm:$0xff]   ;;  %v10118_v17 = vld [vmem:[%s11381_s1 + $0x8e0] ss:$16 sps:$4 sm:$0xff]  }
 0x359   : > { %4215 = vmatpush1.bf16.msra.mxu0 %v9992_v28  ;;  %v10072_v28 = vld [vmem:[%s11381_s1 + $0x7e4] ss:$16 sps:$4 sm:$0xff]  }
 0x35a   : > { %4256 = vmatpush1.bf16.msra.mxu1 %v9995_v29  ;;  %4216 = vmatprep.subr.bf16.mxu0 %v10000_v30  ;;  %v10075_v29 = vld [vmem:[%s11381_s1 + $0x7ec] ss:$16 sps:$4 sm:$0xff]   ;;  %v1808_v30 = vadd.f32 %v11739_v40, %v1176_v22  ;;  %v10079_v40 = vld [vmem:[%s11381_s1 + $0x808] ss:$16 sps:$4 sm:$0xff]   ;;  %v10124_v22 = vld [vmem:[%s11381_s1 + $0x900] ss:$16 sps:$4 sm:$0xff]  }
 0x35b   : > { %4257 = vmatprep.subr.bf16.mxu1 %v10003_v31  ;;  %v10070_v31 = vld [vmem:[%s11381_s1 + $0x7e0] ss:$16 sps:$4 sm:$0xff]  }
 0x35d   : > { %4217 = vmatpush1.bf16.msra.mxu0 %v9998_v32  ;;  %v2060_v32 = vmax.f32 %v1685_v27, 0.0  ;;  %v10132_v27 = vld [vmem:[%s11381_s1 + $0x924] ss:$16 sps:$4 sm:$0xff]  }
 0x35e   : > { %4258 = vmatpush1.bf16.msra.mxu1 %v10001_v12  ;;  %4218 = vmatprep.subr.bf16.mxu0 %v10006_v34  ;;  %v10073_v12 = vld [vmem:[%s11381_s1 + $0x7e8] ss:$16 sps:$4 sm:$0xff]   ;;  %v10081_v34 = vld [vmem:[%s11381_s1 + $0x80c] ss:$16 sps:$4 sm:$0xff]  }
 0x35f   : > { %4259 = vmatprep.subr.bf16.mxu1 %v10009_v35  ;;  %v2063_v35 = vmax.f32 %v1808_v30, 0.0  ;;  %v10138_v30 = vld [vmem:[%s11381_s1 + $0x944] ss:$16 sps:$4 sm:$0xff]  }
 0x361   : > { %4219 = vmatpush1.bf16.msra.mxu0 %v10004_v36  ;;  %v10076_v36 = vld [vmem:[%s11381_s1 + $0x800] ss:$16 sps:$4 sm:$0xff]  }
 0x362   : > { %4260 = vmatpush1.bf16.msra.mxu1 %v10007_v37  ;;  %4220 = vmatprep.subr.bf16.mxu0 %v10012_v39  ;;  %v2074_v37 = vpack.c.bf16 %v2060_v32, %v2060_v32  ;;  %v10084_v39 = vld [vmem:[%s11381_s1 + $0x824] ss:$16 sps:$4 sm:$0xff]   ;;  %v10136_v32 = vld [vmem:[%s11381_s1 + $0x940] ss:$16 sps:$4 sm:$0xff]  }
 0x363   : > { %4261 = vmatprep.subr.bf16.mxu1 %v10015_v21  ;;  %v2077_v21 = vpack.c.bf16 %v2063_v35, %v2063_v35  ;;  %v10142_v35 = vld [vmem:[%s11381_s1 + $0x960] ss:$16 sps:$4 sm:$0xff]  }
 0x365   : > { %4221 = vmatpush1.bf16.msra.mxu0 %v10010_v41  ;;  %v10087_v41 = vld [vmem:[%s11381_s1 + $0x82c] ss:$16 sps:$4 sm:$0xff]  }
 0x366   : > { %4262 = vmatpush1.bf16.msra.mxu1 %v10013_v42  ;;  %4222 = vmatprep.subr.bf16.mxu0 %v10018_v9  ;;  %v10082_v42 = vld [vmem:[%s11381_s1 + $0x820] ss:$16 sps:$4 sm:$0xff]   ;;  %v10085_v9 = vld [vmem:[%s11381_s1 + $0x828] ss:$16 sps:$4 sm:$0xff]  }
 0x367   : > { %4263 = vmatprep.subr.bf16.mxu1 %v10021_v43  ;;  %v10090_v43 = vld [vmem:[%s11381_s1 + $0x844] ss:$16 sps:$4 sm:$0xff]  }
 0x369   : > { %4223 = vmatpush1.bf16.msra.mxu0 %v10016_v44  ;;  %v10093_v44 = vld [vmem:[%s11381_s1 + $0x84c] ss:$16 sps:$4 sm:$0xff]  }
 0x36a   : > { %4264 = vmatpush1.bf16.msra.mxu1 %v10019_v45  ;;  %4224 = vmatprep.subr.bf16.mxu0 %v10024_v46  ;;  %v10088_v45 = vld [vmem:[%s11381_s1 + $0x840] ss:$16 sps:$4 sm:$0xff]   ;;  %v10091_v46 = vld [vmem:[%s11381_s1 + $0x848] ss:$16 sps:$4 sm:$0xff]  }
 0x36b   : > { %4265 = vmatprep.subr.bf16.mxu1 %v10027_v47  ;;  %v10096_v47 = vld [vmem:[%s11381_s1 + $0x864] ss:$16 sps:$4 sm:$0xff]  }
 0x36d   : > { %4225 = vmatpush1.bf16.msra.mxu0 %v10022_v48  ;;  %v10099_v48 = vld [vmem:[%s11381_s1 + $0x86c] ss:$16 sps:$4 sm:$0xff]  }
 0x36e   : > { %4266 = vmatpush1.bf16.msra.mxu1 %v10025_v49  ;;  %4226 = vmatprep.subr.bf16.mxu0 %v10030_v50  ;;  %v10094_v49 = vld [vmem:[%s11381_s1 + $0x860] ss:$16 sps:$4 sm:$0xff]   ;;  %v10097_v50 = vld [vmem:[%s11381_s1 + $0x868] ss:$16 sps:$4 sm:$0xff]  }
 0x36f   : > { %4267 = vmatprep.subr.bf16.mxu1 %v10033_v33  ;;  %v10102_v33 = vld [vmem:[%s11381_s1 + $0x884] ss:$16 sps:$4 sm:$0xff]  }
 0x371   : > { %4227 = vmatpush1.bf16.msra.mxu0 %v10028_v55  ;;  %v10105_v55 = vld [vmem:[%s11381_s1 + $0x88c] ss:$16 sps:$4 sm:$0xff]  }
 0x372   : > { %4268 = vmatpush1.bf16.msra.mxu1 %v10031_v58  ;;  %4228 = vmatprep.subr.bf16.mxu0 %v10036_v59  ;;  %v10100_v58 = vld [vmem:[%s11381_s1 + $0x880] ss:$16 sps:$4 sm:$0xff]   ;;  %v10103_v59 = vld [vmem:[%s11381_s1 + $0x888] ss:$16 sps:$4 sm:$0xff]  }
 0x373   : > { %4269 = vmatprep.subr.bf16.mxu1 %v10039_v60  ;;  %v10108_v60 = vld [vmem:[%s11381_s1 + $0x8a4] ss:$16 sps:$4 sm:$0xff]  }
 0x375   : > { %4229 = vmatpush1.bf16.msra.mxu0 %v10034_v61  ;;  %v10111_v61 = vld [vmem:[%s11381_s1 + $0x8ac] ss:$16 sps:$4 sm:$0xff]  }
 0x376   : > { %4270 = vmatpush1.bf16.msra.mxu1 %v10037_v62  ;;  %4230 = vmatprep.subr.bf16.mxu0 %v10042_v63  ;;  %v10106_v62 = vld [vmem:[%s11381_s1 + $0x8a0] ss:$16 sps:$4 sm:$0xff]   ;;  %v10109_v63 = vld [vmem:[%s11381_s1 + $0x8a8] ss:$16 sps:$4 sm:$0xff]  }
 0x377   : > { %4271 = vmatprep.subr.bf16.mxu1 %v10045_v57  ;;  %v10114_v57 = vld [vmem:[%s11381_s1 + $0x8c4] ss:$16 sps:$4 sm:$0xff]  }
 0x379   : > { %4231 = vmatpush1.bf16.msra.mxu0 %v10040_v5 }
 0x37a   : > { %4272 = vmatpush1.bf16.msra.mxu1 %v10043_v6  ;;  %4232 = vmatprep.subr.bf16.mxu0 %v10048_v26  ;;  %v10117_v26 = vld [vmem:[%s11381_s1 + $0x8cc] ss:$16 sps:$4 sm:$0xff]  }
 0x37b   : > { %4273 = vmatprep.subr.bf16.mxu1 %v10051_v51 }
 0x37d   : > { %4233 = vmatpush1.bf16.msra.mxu0 %v10046_v7 }
 0x37e   : > { %4274 = vmatpush1.bf16.msra.mxu1 %v10049_v8  ;;  %4234 = vmatprep.subr.bf16.mxu0 %v10054_v10 }
 0x37f   : > { %4275 = vmatprep.subr.bf16.mxu1 %v10057_v11  ;;  %v10112_v11 = vld [vmem:[%s11381_s1 + $0x8c0] ss:$16 sps:$4 sm:$0xff]  }
 0x381   : > { %4235 = vmatpush1.bf16.msra.mxu0 %v10052_v13 }
 0x382   : > { %4276 = vmatpush1.bf16.msra.mxu1 %v10055_v14  ;;  %4236 = vmatprep.subr.bf16.mxu0 %v10060_v52  ;;  %v10115_v52 = vld [vmem:[%s11381_s1 + $0x8c8] ss:$16 sps:$4 sm:$0xff]  }
 0x383   : > { %4277 = vmatprep.subr.bf16.mxu1 %v10063_v15  ;;  %v10120_v15 = vld [vmem:[%s11381_s1 + $0x8e4] ss:$16 sps:$4 sm:$0xff]  }
 0x385   : > { %4237 = vmatpush1.bf16.msra.mxu0 %v10058_v16  ;;  %v10123_v16 = vld [vmem:[%s11381_s1 + $0x8ec] ss:$16 sps:$4 sm:$0xff]  }
 0x386   : > { %4278 = vmatpush1.bf16.msra.mxu1 %v10061_v18  ;;  %4238 = vmatprep.subr.bf16.mxu0 %v10066_v19  ;;  %v10121_v18 = vld [vmem:[%s11381_s1 + $0x8e8] ss:$16 sps:$4 sm:$0xff]   ;;  %v10126_v19 = vld [vmem:[%s11381_s1 + $0x904] ss:$16 sps:$4 sm:$0xff]  }
 0x387   : > { %4279 = vmatprep.subr.bf16.mxu1 %v10069_v20  ;;  %v10129_v20 = vld [vmem:[%s11381_s1 + $0x90c] ss:$16 sps:$4 sm:$0xff]  }
 0x389   : > { %4239 = vmatpush1.bf16.msra.mxu0 %v10064_v23  ;;  %v10127_v23 = vld [vmem:[%s11381_s1 + $0x908] ss:$16 sps:$4 sm:$0xff]  }
 0x38a   : > { %4280 = vmatpush1.bf16.msra.mxu1 %v10067_v56  ;;  %4240 = vmatprep.subr.bf16.mxu0 %v10072_v28  ;;  %v10135_v56 = vld [vmem:[%s11381_s1 + $0x92c] ss:$16 sps:$4 sm:$0xff]   ;;  %v10130_v28 = vld [vmem:[%s11381_s1 + $0x920] ss:$16 sps:$4 sm:$0xff]  }
 0x38b   : > { %4281 = vmatprep.subr.bf16.mxu1 %v10075_v29  ;;  %v10133_v29 = vld [vmem:[%s11381_s1 + $0x928] ss:$16 sps:$4 sm:$0xff]  }
 0x38d   : > { %4241 = vmatpush1.bf16.msra.mxu0 %v10070_v31  ;;  %v10141_v31 = vld [vmem:[%s11381_s1 + $0x94c] ss:$16 sps:$4 sm:$0xff]  }
 0x38e   : > { %4282 = vmatpush1.bf16.msra.mxu1 %v10073_v12  ;;  %4612 = vmatprep.subr.bf16.mxu0 %v10078_v3  ;;  %v10139_v12 = vld [vmem:[%s11381_s1 + $0x948] ss:$16 sps:$4 sm:$0xff]   ;;  %v10144_v3 = vld [vmem:[%s11381_s1 + $0x964] ss:$16 sps:$4 sm:$0xff]  }
 0x38f   : > { %4653 = vmatprep.subr.bf16.mxu1 %v10081_v34  ;;  %v10147_v34 = vld [vmem:[%s11381_s1 + $0x96c] ss:$16 sps:$4 sm:$0xff]  }
 0x390   : > { %4243 = vmatmul.mubr.bf16.vlgmr.msra.gmra.mrb[44].mxu0 %v2074_v37 }
 0x391   : > { %4284 = vmatmul.mubr.bf16.vlgmr.msra.gmra.mrb[36].mxu1 %v2074_v37  ;;  %4613 = vmatpush1.bf16.msra.mxu0 %v10076_v36  ;;  %v10145_v36 = vld [vmem:[%s11381_s1 + $0x968] ss:$16 sps:$4 sm:$0xff]   ;;  %v10150_v37 = vld [vmem:[%s11381_s1 + $0x984] ss:$16 sps:$4 sm:$0xff]  }
 0x392   : > { %4644 = vmatprep.mubr.bf16.mxu0 %v2077_v21  ;;  %4654 = vmatpush1.bf16.msra.mxu1 %v10079_v40  ;;  %v10153_v40 = vld [vmem:[%s11381_s1 + $0x98c] ss:$16 sps:$4 sm:$0xff]  }
 0x393   : > { %4685 = vmatprep.mubr.bf16.mxu1 %v2077_v21  ;;  %4614 = vmatprep.subr.bf16.mxu0 %v10084_v39  ;;  %v10148_v39 = vld [vmem:[%s11381_s1 + $0x980] ss:$16 sps:$4 sm:$0xff]   ;;  %v10151_v21 = vld [vmem:[%s11381_s1 + $0x988] ss:$16 sps:$4 sm:$0xff]  }
 0x394   : > { %4655 = vmatprep.subr.bf16.mxu1 %v10087_v41  ;;  %v10156_v41 = vld [vmem:[%s11381_s1 + $0x9a4] ss:$16 sps:$4 sm:$0xff]  }
 0x395   : > { %4615 = vmatpush1.bf16.msra.mxu0 %v10082_v42  ;;  %v10159_v42 = vld [vmem:[%s11381_s1 + $0x9ac] ss:$16 sps:$4 sm:$0xff]  }
 0x396   : > { %4656 = vmatpush1.bf16.msra.mxu1 %v10085_v9  ;;  %4616 = vmatprep.subr.bf16.mxu0 %v10090_v43  ;;  %v1128_v9 = vld [vmem:[%s11379_s16 + $0xa] sm:$0x3]  ;;  %v10154_v43 = vld [vmem:[%s11381_s1 + $0x9a0] ss:$16 sps:$4 sm:$0xff]  }
 0x397   : > { %4657 = vmatprep.subr.bf16.mxu1 %v10093_v44  ;;  %v1172_v44 = vrot.slane %v11879_v4, %v11645_v1  ;;  %v10163_v4 = vld [vmem:[%s11381_s1 + $0x9c8] ss:$16 sps:$4 sm:$0xff]  }
 0x399   : > { %4617 = vmatpush1.bf16.msra.mxu0 %v10088_v45  ;;  %v10157_v45 = vld [vmem:[%s11381_s1 + $0x9a8] ss:$16 sps:$4 sm:$0xff]  }
 0x39a   : > { %4658 = vmatpush1.bf16.msra.mxu1 %v10091_v46  ;;  %4618 = vmatprep.subr.bf16.mxu0 %v10096_v47  ;;  %v10162_v46 = vld [vmem:[%s11381_s1 + $0x9c4] ss:$16 sps:$4 sm:$0xff]   ;;  %v10165_v47 = vld [vmem:[%s11381_s1 + $0x9cc] ss:$16 sps:$4 sm:$0xff]  }
 0x39b   : > { %4659 = vmatprep.subr.bf16.mxu1 %v10099_v48  ;;  %v1184_v48 = vrot.slane %v1128_v9, %v11649_v2 }
 0x39d   : > { %4619 = vmatpush1.bf16.msra.mxu0 %v10094_v49  ;;  %v10160_v49 = vld [vmem:[%s11381_s1 + $0x9c0] ss:$16 sps:$4 sm:$0xff]  }
 0x39e   : > { %4660 = vmatpush1.bf16.msra.mxu1 %v10097_v50  ;;  %4620 = vmatprep.subr.bf16.mxu0 %v10102_v33  ;;  %v1806_v50 = vadd.f32 %v11737_v38, %v1172_v44  ;;  %v10168_v33 = vld [vmem:[%s11381_s1 + $0x9e4] ss:$16 sps:$4 sm:$0xff]   ;;  %v10169_v38 = vld [vmem:[%s11381_s1 + $0x9e8] ss:$16 sps:$4 sm:$0xff]  }
 0x39f   : > { %4661 = vmatprep.subr.bf16.mxu1 %v10105_v55  ;;  %v10171_v55 = vld [vmem:[%s11381_s1 + $0x9ec] ss:$16 sps:$4 sm:$0xff]  }
 0x3a1   : > { %4621 = vmatpush1.bf16.msra.mxu0 %v10100_v58  ;;  %v1180_v58 = vrot.slane %v1128_v9, %v11645_v1  ;;  %v10211_v9 = vld [vmem:[%s11381_s1 + $0xac8] ss:$16 sps:$4 sm:$0xff]  }
 0x3a2   : > { %4662 = vmatpush1.bf16.msra.mxu1 %v10103_v59  ;;  %4622 = vmatprep.subr.bf16.mxu0 %v10108_v60  ;;  %v1929_v59 = vadd.f32 %v11751_v54, %v1184_v48  ;;  %v10166_v60 = vld [vmem:[%s11381_s1 + $0x9e0] ss:$16 sps:$4 sm:$0xff]   ;;  %v10217_v48 = vld [vmem:[%s11381_s1 + $0xae8] ss:$16 sps:$4 sm:$0xff]  }
 0x3a3   : > { %v11922_v5 = vpop.f32.mrb[32].mxu0  ;;  %v11924_v6 = vpop.f32.mrb[24].mxu1  ;;  %4663 = vmatprep.subr.bf16.mxu1 %v10111_v61  ;;  %v2062_v61 = vmax.f32 %v1806_v50, 0.0  ;;  %v10172_v54 = vld [vmem:[%s11381_s1 + $0xa00] ss:$16 sps:$4 sm:$0xff]  }
 0x3a4   : > { %v11927_v51 = vpop.f32.mrb[33].mxu0  ;;  %v11929_v7 = vpop.f32.mrb[25].mxu1  ;;  %v10225_v50 = vld [vmem:[%s11381_s1 + $0xb0c] ss:$16 sps:$4 sm:$0xff]  }
 0x3a5   : > { %4623 = vmatpush1.bf16.msra.mxu0 %v10106_v62  ;;  %v3042_v8 = vpop.f32.mrb[34].mxu0  ;;  %v3083_v10 = vpop.f32.mrb[26].mxu1  ;;  %v10174_v62 = vld [vmem:[%s11381_s1 + $0xa04] ss:$16 sps:$4 sm:$0xff]  }
 0x3a6   : > { %4664 = vmatpush1.bf16.msra.mxu1 %v10109_v63  ;;  %v3043_v13 = vpop.f32.mrb[35].mxu0  ;;  %v3084_v14 = vpop.f32.mrb[27].mxu1  ;;  %4624 = vmatprep.subr.bf16.mxu0 %v10114_v57  ;;  %v10177_v63 = vld [vmem:[%s11381_s1 + $0xa0c] ss:$16 sps:$4 sm:$0xff]   ;;  %v11980_v57 = vadd.f32 %v11749_v53, %v1180_v58  ;;  %v2076_v8 = vpack.c.bf16 %v2062_v61, %v2062_v61  ;;  %v10175_v10 = vld [vmem:[%s11381_s1 + $0xa08] ss:$16 sps:$4 sm:$0xff]  }
 0x3a7   : > { %4665 = vmatprep.subr.bf16.mxu1 %v10117_v26  ;;  %v2065_v26 = vmax.f32 %v1929_v59, 0.0  ;;  %v10178_v14 = vld [vmem:[%s11381_s1 + $0xa20] ss:$16 sps:$4 sm:$0xff]   ;;  %v10231_v58 = vld [vmem:[%s11381_s1 + $0xb2c] ss:$16 sps:$4 sm:$0xff]  }
 0x3a8   : > { %v2064_v13 = vmax.f32 %v11980_v57, 0.0  ;;  %v10226_v59 = vld [vmem:[%s11381_s1 + $0xb20] ss:$16 sps:$4 sm:$0xff]   ;;  %v10234_v61 = vld [vmem:[%s11381_s1 + $0xb44] ss:$16 sps:$4 sm:$0xff]  }
 0x3a9   : > { %4625 = vmatpush1.bf16.msra.mxu0 %v10112_v11  ;;  %v10180_v11 = vld [vmem:[%s11381_s1 + $0xa24] ss:$16 sps:$4 sm:$0xff]   ;;  %v2079_v53 = vpack.c.bf16 %v2065_v26, %v2065_v26  ;;  %v10277_v57 = vld [vmem:[%s11381_s1 + $0xc28] ss:$16 sps:$4 sm:$0xff]  }
 0x3aa   : > { %4666 = vmatpush1.bf16.msra.mxu1 %v10115_v52  ;;  %4626 = vmatprep.subr.bf16.mxu0 %v10120_v15  ;;  %v10183_v52 = vld [vmem:[%s11381_s1 + $0xa2c] ss:$16 sps:$4 sm:$0xff]   ;;  %v10181_v15 = vld [vmem:[%s11381_s1 + $0xa28] ss:$16 sps:$4 sm:$0xff]   ;;  %v10240_v26 = vld [vmem:[%s11381_s1 + $0xb64] ss:$16 sps:$4 sm:$0xff]  }
 0x3ab   : > { %4667 = vmatprep.subr.bf16.mxu1 %v10123_v16  ;;  %v10186_v16 = vld [vmem:[%s11381_s1 + $0xa44] ss:$16 sps:$4 sm:$0xff]  }
 0x3ad   : > { %4627 = vmatpush1.bf16.msra.mxu0 %v10118_v17  ;;  %v10189_v17 = vld [vmem:[%s11381_s1 + $0xa4c] ss:$16 sps:$4 sm:$0xff]  }
 0x3ae   : > { %4668 = vmatpush1.bf16.msra.mxu1 %v10121_v18  ;;  %4628 = vmatprep.subr.bf16.mxu0 %v10126_v19  ;;  %v10184_v18 = vld [vmem:[%s11381_s1 + $0xa40] ss:$16 sps:$4 sm:$0xff]   ;;  %v10187_v19 = vld [vmem:[%s11381_s1 + $0xa48] ss:$16 sps:$4 sm:$0xff]  }
 0x3af   : > { %4669 = vmatprep.subr.bf16.mxu1 %v10129_v20  ;;  %v10192_v20 = vld [vmem:[%s11381_s1 + $0xa64] ss:$16 sps:$4 sm:$0xff]  }
 0x3b1   : > { %4629 = vmatpush1.bf16.msra.mxu0 %v10124_v22  ;;  %v10195_v22 = vld [vmem:[%s11381_s1 + $0xa6c] ss:$16 sps:$4 sm:$0xff]  }
 0x3b2   : > { %4670 = vmatpush1.bf16.msra.mxu1 %v10127_v23  ;;  %4630 = vmatprep.subr.bf16.mxu0 %v10132_v27  ;;  %v10190_v23 = vld [vmem:[%s11381_s1 + $0xa60] ss:$16 sps:$4 sm:$0xff]   ;;  %v10193_v27 = vld [vmem:[%s11381_s1 + $0xa68] ss:$16 sps:$4 sm:$0xff]  }
 0x3b3   : > { %4671 = vmatprep.subr.bf16.mxu1 %v10135_v56  ;;  %v10198_v56 = vld [vmem:[%s11381_s1 + $0xa84] ss:$16 sps:$4 sm:$0xff]  }
 0x3b5   : > { %4631 = vmatpush1.bf16.msra.mxu0 %v10130_v28  ;;  %v10196_v28 = vld [vmem:[%s11381_s1 + $0xa80] ss:$16 sps:$4 sm:$0xff]  }
 0x3b6   : > { %4672 = vmatpush1.bf16.msra.mxu1 %v10133_v29  ;;  %4632 = vmatprep.subr.bf16.mxu0 %v10138_v30  ;;  %v10201_v29 = vld [vmem:[%s11381_s1 + $0xa8c] ss:$16 sps:$4 sm:$0xff]   ;;  %v10199_v30 = vld [vmem:[%s11381_s1 + $0xa88] ss:$16 sps:$4 sm:$0xff]  }
 0x3b7   : > { %4673 = vmatprep.subr.bf16.mxu1 %v10141_v31  ;;  %v10204_v31 = vld [vmem:[%s11381_s1 + $0xaa4] ss:$16 sps:$4 sm:$0xff]  }
 0x3b9   : > { %4633 = vmatpush1.bf16.msra.mxu0 %v10136_v32  ;;  %v10207_v32 = vld [vmem:[%s11381_s1 + $0xaac] ss:$16 sps:$4 sm:$0xff]  }
 0x3ba   : > { %4674 = vmatpush1.bf16.msra.mxu1 %v10139_v12  ;;  %4634 = vmatprep.subr.bf16.mxu0 %v10144_v3  ;;  %v10202_v12 = vld [vmem:[%s11381_s1 + $0xaa0] ss:$16 sps:$4 sm:$0xff]   ;;  %v10205_v3 = vld [vmem:[%s11381_s1 + $0xaa8] ss:$16 sps:$4 sm:$0xff]  }
 0x3bb   : > { %4675 = vmatprep.subr.bf16.mxu1 %v10147_v34  ;;  %v10210_v34 = vld [vmem:[%s11381_s1 + $0xac4] ss:$16 sps:$4 sm:$0xff]  }
 0x3bd   : > { %4635 = vmatpush1.bf16.msra.mxu0 %v10142_v35  ;;  %v10213_v35 = vld [vmem:[%s11381_s1 + $0xacc] ss:$16 sps:$4 sm:$0xff]  }
 0x3be   : > { %4676 = vmatpush1.bf16.msra.mxu1 %v10145_v36  ;;  %4636 = vmatprep.subr.bf16.mxu0 %v10150_v37 }
 0x3bf   : > { %4677 = vmatprep.subr.bf16.mxu1 %v10153_v40 }
 0x3c1   : > { %4637 = vmatpush1.bf16.msra.mxu0 %v10148_v39 }
 0x3c2   : > { %4678 = vmatpush1.bf16.msra.mxu1 %v10151_v21  ;;  %4638 = vmatprep.subr.bf16.mxu0 %v10156_v41  ;;  %v10208_v21 = vld [vmem:[%s11381_s1 + $0xac0] ss:$16 sps:$4 sm:$0xff]  }
 0x3c3   : > { %4679 = vmatprep.subr.bf16.mxu1 %v10159_v42 }
 0x3c5   : > { %4639 = vmatpush1.bf16.msra.mxu0 %v10154_v43 }
 0x3c6   : > { %4680 = vmatpush1.bf16.msra.mxu1 %v10157_v45  ;;  %4640 = vmatprep.subr.bf16.mxu0 %v10162_v46  ;;  %v10216_v45 = vld [vmem:[%s11381_s1 + $0xae4] ss:$16 sps:$4 sm:$0xff]   ;;  %v10214_v46 = vld [vmem:[%s11381_s1 + $0xae0] ss:$16 sps:$4 sm:$0xff]  }
 0x3c7   : > { %4681 = vmatprep.subr.bf16.mxu1 %v10165_v47  ;;  %v10219_v47 = vld [vmem:[%s11381_s1 + $0xaec] ss:$16 sps:$4 sm:$0xff]  }
 0x3c9   : > { %4641 = vmatpush1.bf16.msra.mxu0 %v10160_v49  ;;  %v10222_v49 = vld [vmem:[%s11381_s1 + $0xb04] ss:$16 sps:$4 sm:$0xff]  }
 0x3ca   : > { %4682 = vmatpush1.bf16.msra.mxu1 %v10163_v4  ;;  %4642 = vmatprep.subr.bf16.mxu0 %v10168_v33  ;;  %v10220_v4 = vld [vmem:[%s11381_s1 + $0xb00] ss:$16 sps:$4 sm:$0xff]   ;;  %v10223_v33 = vld [vmem:[%s11381_s1 + $0xb08] ss:$16 sps:$4 sm:$0xff]  }
 0x3cb   : > { %4683 = vmatprep.subr.bf16.mxu1 %v10171_v55  ;;  %v10228_v55 = vld [vmem:[%s11381_s1 + $0xb24] ss:$16 sps:$4 sm:$0xff]  }
 0x3cd   : > { %4643 = vmatpush1.bf16.msra.mxu0 %v10166_v60  ;;  %v10229_v60 = vld [vmem:[%s11381_s1 + $0xb28] ss:$16 sps:$4 sm:$0xff]  }
 0x3ce   : > { %4684 = vmatpush1.bf16.msra.mxu1 %v10169_v38  ;;  %5014 = vmatprep.subr.bf16.mxu0 %v10174_v62  ;;  %v10237_v38 = vld [vmem:[%s11381_s1 + $0xb4c] ss:$16 sps:$4 sm:$0xff]   ;;  %v10232_v62 = vld [vmem:[%s11381_s1 + $0xb40] ss:$16 sps:$4 sm:$0xff]  }
 0x3cf   : > { %5055 = vmatprep.subr.bf16.mxu1 %v10177_v63  ;;  %v10235_v63 = vld [vmem:[%s11381_s1 + $0xb48] ss:$16 sps:$4 sm:$0xff]  }
 0x3d0   : > { %4645 = vmatmul.mubr.bf16.vlgmr.msra.gmra.mrb[48].mxu0 %v2076_v8 }
 0x3d1   : > { %4686 = vmatmul.mubr.bf16.vlgmr.msra.gmra.mrb[40].mxu1 %v2076_v8  ;;  %5015 = vmatpush1.bf16.msra.mxu0 %v10172_v54  ;;  %v10243_v54 = vld [vmem:[%s11381_s1 + $0xb6c] ss:$16 sps:$4 sm:$0xff]   ;;  %v10238_v8 = vld [vmem:[%s11381_s1 + $0xb60] ss:$16 sps:$4 sm:$0xff]  }
 0x3d2   : > { %5046 = vmatprep.mubr.bf16.mxu0 %v2079_v53  ;;  %5056 = vmatpush1.bf16.msra.mxu1 %v10175_v10  ;;  %v10241_v10 = vld [vmem:[%s11381_s1 + $0xb68] ss:$16 sps:$4 sm:$0xff]  }
 0x3d3   : > { %5087 = vmatprep.mubr.bf16.mxu1 %v2079_v53  ;;  %5016 = vmatprep.subr.bf16.mxu0 %v10180_v11  ;;  %v10246_v11 = vld [vmem:[%s11381_s1 + $0xb84] ss:$16 sps:$4 sm:$0xff]   ;;  %v10249_v53 = vld [vmem:[%s11381_s1 + $0xb8c] ss:$16 sps:$4 sm:$0xff]  }
 0x3d4   : > { %5057 = vmatprep.subr.bf16.mxu1 %v10183_v52  ;;  %v10247_v52 = vld [vmem:[%s11381_s1 + $0xb88] ss:$16 sps:$4 sm:$0xff]  }
 0x3d5   : > { %5017 = vmatpush1.bf16.msra.mxu0 %v10178_v14  ;;  %v10244_v14 = vld [vmem:[%s11381_s1 + $0xb80] ss:$16 sps:$4 sm:$0xff]  }
 0x3d6   : > { %5058 = vmatpush1.bf16.msra.mxu1 %v10181_v15  ;;  %5018 = vmatprep.subr.bf16.mxu0 %v10186_v16  ;;  %v10252_v15 = vld [vmem:[%s11381_s1 + $0xba4] ss:$16 sps:$4 sm:$0xff]   ;;  %v12048_v16 = vld [vmem:[%s11379_s16 + $0xc] sm:$0x3]  ;;  %s10830_s16 = sshll.u32 %s10930_s24, 4  ;;  %s10831_s16 = int_to_ptr.vmem [resolvable:$false] %s10830_s16 }
 0x3d7   : > { %5059 = vmatprep.subr.bf16.mxu1 %v10189_v17  ;;  %v10255_v17 = vld [vmem:[%s11381_s1 + $0xbac] ss:$16 sps:$4 sm:$0xff]   ;;  %s10832_s22 = scalar_lea.vmem %s10831_s16, 448  ;;  %p10833_p7 = scmp.lt.s32.totalorder %s12515_s15, %s10831_s16 }
 0x3d8   : > { %p10834_p13 = scmp.lt.s32.totalorder %s10832_s22, %s10826_s21 }
 0x3d9   : > { %5019 = vmatpush1.bf16.msra.mxu0 %v10184_v18  ;;  %v10250_v18 = vld [vmem:[%s11381_s1 + $0xba0] ss:$16 sps:$4 sm:$0xff]  }
 0x3da   : > { %5060 = vmatpush1.bf16.msra.mxu1 %v10187_v19  ;;  %5020 = vmatprep.subr.bf16.mxu0 %v10192_v20  ;;  %v10253_v19 = vld [vmem:[%s11381_s1 + $0xba8] ss:$16 sps:$4 sm:$0xff]   ;;  %v10258_v20 = vld [vmem:[%s11381_s1 + $0xbc4] ss:$16 sps:$4 sm:$0xff]   ;;  %p10835_p11 = por %p10834_p13, %p10833_p7 }
 0x3db   : > { %5061 = vmatprep.subr.bf16.mxu1 %v10195_v22  ;;  %v10261_v22 = vld [vmem:[%s11381_s1 + $0xbcc] ss:$16 sps:$4 sm:$0xff]  }
 0x3dc   : > { %p10836_p6 = pnand %p10835_p11, %p10829_p2 }
 0x3dd   : > { %5021 = vmatpush1.bf16.msra.mxu0 %v10190_v23  ;;  %v1192_v23 = vrot.slane %v12048_v16, %v11649_v2 }
 0x3de   : > { %5062 = vmatpush1.bf16.msra.mxu1 %v10193_v27  ;;  %5022 = vmatprep.subr.bf16.mxu0 %v10198_v56  ;;  %v10256_v27 = vld [vmem:[%s11381_s1 + $0xbc0] ss:$16 sps:$4 sm:$0xff]   ;;  %v10259_v56 = vld [vmem:[%s11381_s1 + $0xbc8] ss:$16 sps:$4 sm:$0xff]  }
 0x3df   : > { %5063 = vmatprep.subr.bf16.mxu1 %v10201_v29  ;;  %v10267_v29 = vld [vmem:[%s11381_s1 + $0xbec] ss:$16 sps:$4 sm:$0xff]  }
 0x3e1   : > { %5023 = vmatpush1.bf16.msra.mxu0 %v10196_v28  ;;  %v10264_v28 = vld [vmem:[%s11381_s1 + $0xbe4] ss:$16 sps:$4 sm:$0xff]  }
 0x3e2   : > { %5064 = vmatpush1.bf16.msra.mxu1 %v10199_v30  ;;  %5024 = vmatprep.subr.bf16.mxu0 %v10204_v31  ;;  %v2050_v30 = vadd.f32 %v11779_v25, %v1192_v23  ;;  %v10262_v31 = vld [vmem:[%s11381_s1 + $0xbe0] ss:$16 sps:$4 sm:$0xff]   ;;  %v2078_v25 = vpack.c.bf16 %v2064_v13, %v2064_v13  ;;  %v10282_v13 = vld [vmem:[%s11381_s1 + $0xc44] ss:$16 sps:$4 sm:$0xff]   ;;  %v10313_v23 = vld [vmem:[%s11381_s1 + $0xce8] ss:$16 sps:$4 sm:$0xff]  }
 0x3e3   : > { %v12012_v36 = vpop.f32.mrb[36].mxu0  ;;  %v12014_v37 = vpop.f32.mrb[28].mxu1  ;;  %5065 = vmatprep.subr.bf16.mxu1 %v10207_v32  ;;  %v10265_v32 = vld [vmem:[%s11381_s1 + $0xbe8] ss:$16 sps:$4 sm:$0xff]  }
 0x3e4   : > { %v12016_v40 = vpop.f32.mrb[37].mxu0  ;;  %v12018_v39 = vpop.f32.mrb[29].mxu1 }
 0x3e5   : > { %v3444_v41 = vpop.f32.mrb[38].mxu0  ;;  %v3485_v42 = vpop.f32.mrb[30].mxu1  ;;  %5025 = vmatpush1.bf16.msra.mxu0 %v10202_v12  ;;  %v10270_v12 = vld [vmem:[%s11381_s1 + $0xc04] ss:$16 sps:$4 sm:$0xff]  }
 0x3e6   : > { %5066 = vmatpush1.bf16.msra.mxu1 %v10205_v3  ;;  %v3445_v43 = vpop.f32.mrb[39].mxu0  ;;  %v3486_v44 = vpop.f32.mrb[31].mxu1  ;;  %5026 = vmatprep.subr.bf16.mxu0 %v10210_v34  ;;  %v10273_v3 = vld [vmem:[%s11381_s1 + $0xc0c] ss:$16 sps:$4 sm:$0xff]   ;;  %v2067_v34 = vmax.f32 %v2050_v30, 0.0 }
 0x3e7   : > { %5067 = vmatprep.subr.bf16.mxu1 %v10213_v35  ;;  %v12067_v35 = vsub.s32 3, %v11642_v0  ;;  %v10271_v41 = vld [vmem:[%s11381_s1 + $0xc08] ss:$16 sps:$4 sm:$0xff]   ;;  %v10274_v42 = vld [vmem:[%s11381_s1 + $0xc20] ss:$16 sps:$4 sm:$0xff]  }
 0x3e8   : > { %v2081_v43 = vpack.c.bf16 %v2067_v34, %v2067_v34  ;;  %v10279_v44 = vld [vmem:[%s11381_s1 + $0xc2c] ss:$16 sps:$4 sm:$0xff]   ;;  %v10324_v30 = vld [vmem:[%s11381_s1 + $0xd24] ss:$16 sps:$4 sm:$0xff]  }
 0x3e9   : > { %5027 = vmatpush1.bf16.msra.mxu0 %v10208_v21  ;;  %v10268_v21 = vld [vmem:[%s11381_s1 + $0xc00] ss:$16 sps:$4 sm:$0xff]   ;;  %v10333_v34 = vld [vmem:[%s11381_s1 + $0xd4c] ss:$16 sps:$4 sm:$0xff]  }
 0x3ea   : > { %5068 = vmatpush1.bf16.msra.mxu1 %v10211_v9  ;;  %5028 = vmatprep.subr.bf16.mxu0 %v10216_v45  ;;  %v10276_v9 = vld [vmem:[%s11381_s1 + $0xc24] ss:$16 sps:$4 sm:$0xff]   ;;  %v10285_v45 = vld [vmem:[%s11381_s1 + $0xc4c] ss:$16 sps:$4 sm:$0xff]  }
 0x3eb   : > { %5069 = vmatprep.subr.bf16.mxu1 %v10219_v47  ;;  %v10283_v47 = vld [vmem:[%s11381_s1 + $0xc48] ss:$16 sps:$4 sm:$0xff]  }
 0x3ed   : > { %5029 = vmatpush1.bf16.msra.mxu0 %v10214_v46  ;;  %v10280_v46 = vld [vmem:[%s11381_s1 + $0xc40] ss:$16 sps:$4 sm:$0xff]  }
 0x3ee   : > { %5070 = vmatpush1.bf16.msra.mxu1 %v10217_v48  ;;  %5030 = vmatprep.subr.bf16.mxu0 %v10222_v49  ;;  %v10288_v48 = vld [vmem:[%s11381_s1 + $0xc64] ss:$16 sps:$4 sm:$0xff]   ;;  %v10291_v49 = vld [vmem:[%s11381_s1 + $0xc6c] ss:$16 sps:$4 sm:$0xff]  }
 0x3ef   : > { %5071 = vmatprep.subr.bf16.mxu1 %v10225_v50  ;;  %v10286_v50 = vld [vmem:[%s11381_s1 + $0xc60] ss:$16 sps:$4 sm:$0xff]  }
 0x3f1   : > { %5031 = vmatpush1.bf16.msra.mxu0 %v10220_v4  ;;  %v10289_v4 = vld [vmem:[%s11381_s1 + $0xc68] ss:$16 sps:$4 sm:$0xff]  }
 0x3f2   : > { %5072 = vmatpush1.bf16.msra.mxu1 %v10223_v33  ;;  %5032 = vmatprep.subr.bf16.mxu0 %v10228_v55  ;;  %v10294_v33 = vld [vmem:[%s11381_s1 + $0xc84] ss:$16 sps:$4 sm:$0xff]   ;;  %v10292_v55 = vld [vmem:[%s11381_s1 + $0xc80] ss:$16 sps:$4 sm:$0xff]  }
 0x3f3   : > { %5073 = vmatprep.subr.bf16.mxu1 %v10231_v58  ;;  %v10297_v58 = vld [vmem:[%s11381_s1 + $0xc8c] ss:$16 sps:$4 sm:$0xff]  }
 0x3f5   : > { %5033 = vmatpush1.bf16.msra.mxu0 %v10226_v59  ;;  %v10295_v59 = vld [vmem:[%s11381_s1 + $0xc88] ss:$16 sps:$4 sm:$0xff]  }
 0x3f6   : > { %5074 = vmatpush1.bf16.msra.mxu1 %v10229_v60  ;;  %5034 = vmatprep.subr.bf16.mxu0 %v10234_v61  ;;  %v10300_v60 = vld [vmem:[%s11381_s1 + $0xca4] ss:$16 sps:$4 sm:$0xff]   ;;  %v10303_v61 = vld [vmem:[%s11381_s1 + $0xcac] ss:$16 sps:$4 sm:$0xff]  }
 0x3f7   : > { %5075 = vmatprep.subr.bf16.mxu1 %v10237_v38  ;;  %v10298_v38 = vld [vmem:[%s11381_s1 + $0xca0] ss:$16 sps:$4 sm:$0xff]  }
 0x3f9   : > { %5035 = vmatpush1.bf16.msra.mxu0 %v10232_v62  ;;  %v10301_v62 = vld [vmem:[%s11381_s1 + $0xca8] ss:$16 sps:$4 sm:$0xff]  }
 0x3fa   : > { %5076 = vmatpush1.bf16.msra.mxu1 %v10235_v63  ;;  %5036 = vmatprep.subr.bf16.mxu0 %v10240_v26  ;;  %v10306_v63 = vld [vmem:[%s11381_s1 + $0xcc4] ss:$16 sps:$4 sm:$0xff]   ;;  %v10309_v26 = vld [vmem:[%s11381_s1 + $0xccc] ss:$16 sps:$4 sm:$0xff]  }
 0x3fb   : > { %5077 = vmatprep.subr.bf16.mxu1 %v10243_v54 }
 0x3fd   : > { %5037 = vmatpush1.bf16.msra.mxu0 %v10238_v8 }
 0x3fe   : > { %5078 = vmatpush1.bf16.msra.mxu1 %v10241_v10  ;;  %5038 = vmatprep.subr.bf16.mxu0 %v10246_v11  ;;  %v10304_v10 = vld [vmem:[%s11381_s1 + $0xcc0] ss:$16 sps:$4 sm:$0xff]  }
 0x3ff   : > { %5079 = vmatprep.subr.bf16.mxu1 %v10249_v53 }
 0x401   : > { %5039 = vmatpush1.bf16.msra.mxu0 %v10244_v14 }
 0x402   : > { %5080 = vmatpush1.bf16.msra.mxu1 %v10247_v52  ;;  %5040 = vmatprep.subr.bf16.mxu0 %v10252_v15 }
 0x403   : > { %5081 = vmatprep.subr.bf16.mxu1 %v10255_v17 }
 0x405   : > { %5041 = vmatpush1.bf16.msra.mxu0 %v10250_v18  ;;  %v10307_v18 = vld [vmem:[%s11381_s1 + $0xcc8] ss:$16 sps:$4 sm:$0xff]  }
 0x406   : > { %5082 = vmatpush1.bf16.msra.mxu1 %v10253_v19  ;;  %5042 = vmatprep.subr.bf16.mxu0 %v10258_v20  ;;  %v10312_v19 = vld [vmem:[%s11381_s1 + $0xce4] ss:$16 sps:$4 sm:$0xff]   ;;  %v10315_v20 = vld [vmem:[%s11381_s1 + $0xcec] ss:$16 sps:$4 sm:$0xff]  }
 0x407   : > { %5083 = vmatprep.subr.bf16.mxu1 %v10261_v22  ;;  %v10310_v22 = vld [vmem:[%s11381_s1 + $0xce0] ss:$16 sps:$4 sm:$0xff]  }
 0x409   : > { %5043 = vmatpush1.bf16.msra.mxu0 %v10256_v27  ;;  %v10318_v27 = vld [vmem:[%s11381_s1 + $0xd04] ss:$16 sps:$4 sm:$0xff]  }
 0x40a   : > { %5084 = vmatpush1.bf16.msra.mxu1 %v10259_v56  ;;  %5044 = vmatprep.subr.bf16.mxu0 %v10264_v28  ;;  %v10321_v56 = vld [vmem:[%s11381_s1 + $0xd0c] ss:$16 sps:$4 sm:$0xff]   ;;  %v10316_v28 = vld [vmem:[%s11381_s1 + $0xd00] ss:$16 sps:$4 sm:$0xff]  }
 0x40b   : > { %5085 = vmatprep.subr.bf16.mxu1 %v10267_v29  ;;  %v10319_v29 = vld [vmem:[%s11381_s1 + $0xd08] ss:$16 sps:$4 sm:$0xff]  }
 0x40d   : > { %5045 = vmatpush1.bf16.msra.mxu0 %v10262_v31  ;;  %v10327_v31 = vld [vmem:[%s11381_s1 + $0xd2c] ss:$16 sps:$4 sm:$0xff]  }
 0x40e   : > { %5086 = vmatpush1.bf16.msra.mxu1 %v10265_v32  ;;  %5416 = vmatprep.subr.bf16.mxu0 %v10270_v12  ;;  %v10322_v32 = vld [vmem:[%s11381_s1 + $0xd20] ss:$16 sps:$4 sm:$0xff]   ;;  %v10325_v12 = vld [vmem:[%s11381_s1 + $0xd28] ss:$16 sps:$4 sm:$0xff]  }
 0x40f   : > { %5457 = vmatprep.subr.bf16.mxu1 %v10273_v3  ;;  %v10330_v3 = vld [vmem:[%s11381_s1 + $0xd44] ss:$16 sps:$4 sm:$0xff]  }
 0x410   : > { %5047 = vmatmul.mubr.bf16.vlgmr.msra.gmra.mrb[52].mxu0 %v2078_v25 }
 0x411   : > { %5088 = vmatmul.mubr.bf16.vlgmr.msra.gmra.mrb[44].mxu1 %v2078_v25  ;;  %5417 = vmatpush1.bf16.msra.mxu0 %v10268_v21  ;;  %v10328_v21 = vld [vmem:[%s11381_s1 + $0xd40] ss:$16 sps:$4 sm:$0xff]   ;;  %v10331_v25 = vld [vmem:[%s11381_s1 + $0xd48] ss:$16 sps:$4 sm:$0xff]  }
 0x412   : > { %5448 = vmatprep.mubr.bf16.mxu0 %v2081_v43  ;;  %5458 = vmatpush1.bf16.msra.mxu1 %v10271_v41  ;;  %v10336_v41 = vld [vmem:[%s11381_s1 + $0xd64] ss:$16 sps:$4 sm:$0xff]  }
 0x413   : > { %5489 = vmatprep.mubr.bf16.mxu1 %v2081_v43  ;;  %5418 = vmatprep.subr.bf16.mxu0 %v10276_v9  ;;  %v10334_v9 = vld [vmem:[%s11381_s1 + $0xd60] ss:$16 sps:$4 sm:$0xff]   ;;  %v10337_v43 = vld [vmem:[%s11381_s1 + $0xd68] ss:$16 sps:$4 sm:$0xff]  }
 0x414   : > { %5459 = vmatprep.subr.bf16.mxu1 %v10279_v44  ;;  %v10342_v44 = vld [vmem:[%s11381_s1 + $0xd84] ss:$16 sps:$4 sm:$0xff]  }
 0x415   : > { %5419 = vmatpush1.bf16.msra.mxu0 %v10274_v42  ;;  %v10339_v42 = vld [vmem:[%s11381_s1 + $0xd6c] ss:$16 sps:$4 sm:$0xff]  }
 0x416   : > { %5460 = vmatpush1.bf16.msra.mxu1 %v10277_v57  ;;  %5420 = vmatprep.subr.bf16.mxu0 %v10282_v13  ;;  %v10345_v57 = vld [vmem:[%s11381_s1 + $0xd8c] ss:$16 sps:$4 sm:$0xff]   ;;  %v10340_v13 = vld [vmem:[%s11381_s1 + $0xd80] ss:$16 sps:$4 sm:$0xff]  }
 0x417   : > { %5461 = vmatprep.subr.bf16.mxu1 %v10285_v45  ;;  %v10343_v45 = vld [vmem:[%s11381_s1 + $0xd88] ss:$16 sps:$4 sm:$0xff]  }
 0x419   : > { %5421 = vmatpush1.bf16.msra.mxu0 %v10280_v46  ;;  %v10348_v46 = vld [vmem:[%s11381_s1 + $0xda4] ss:$16 sps:$4 sm:$0xff]  }
 0x41a   : > { %5462 = vmatpush1.bf16.msra.mxu1 %v10283_v47  ;;  %5422 = vmatprep.subr.bf16.mxu0 %v10288_v48  ;;  %v12132_v47 = vld [vmem:[%s11387_s30] sm:$0xf] }
 0x41b   : > { %5463 = vmatprep.subr.bf16.mxu1 %v10291_v49  ;;  %v10351_v48 = vld [vmem:[%s11381_s1 + $0xdac] ss:$16 sps:$4 sm:$0xff]   ;;  %v10346_v49 = vld [vmem:[%s11381_s1 + $0xda0] ss:$16 sps:$4 sm:$0xff]  }
 0x41d   : > { %5423 = vmatpush1.bf16.msra.mxu0 %v10286_v50  ;;  %v10349_v50 = vld [vmem:[%s11381_s1 + $0xda8] ss:$16 sps:$4 sm:$0xff]  }
 0x41e   : > { %5464 = vmatpush1.bf16.msra.mxu1 %v10289_v4  ;;  %5424 = vmatprep.subr.bf16.mxu0 %v10294_v33  ;;  %v1188_v4 = vrot.slane %v12048_v16, %v11645_v1  ;;  %v10354_v33 = vld [vmem:[%s11381_s1 + $0xdc4] ss:$16 sps:$4 sm:$0xff]  }
 0x41f   : > { %5465 = vmatprep.subr.bf16.mxu1 %v10297_v58  ;;  %v2551_v58 = vrot.slane %v12132_v47, %v11649_v2 }
 0x420   : > { %v2048_v16 = vadd.f32 %v11777_v24, %v1188_v4  ;;  %v10364_v24 = vld [vmem:[%s11991_s27 + $0x40] sm:$0xff]  }
 0x421   : > { %5425 = vmatpush1.bf16.msra.mxu0 %v10292_v55  ;;  %v10357_v55 = vld [vmem:[%s11381_s1 + $0xdcc] ss:$16 sps:$4 sm:$0xff]  }
 0x422   : > { %5466 = vmatpush1.bf16.msra.mxu1 %v10295_v59  ;;  %5426 = vmatprep.subr.bf16.mxu0 %v10300_v60  ;;  %v10352_v59 = vld [vmem:[%s11381_s1 + $0xdc0] ss:$16 sps:$4 sm:$0xff]   ;;  %v2559_v60 = vrot.slane %v12132_v47, %v12067_v35 }
 0x423   : > { %v12096_v54 = vpop.f32.mrb[40].mxu0  ;;  %v12098_v8 = vpop.f32.mrb[32].mxu1  ;;  %5467 = vmatprep.subr.bf16.mxu1 %v10303_v61  ;;  %v10355_v61 = vld [vmem:[%s11381_s1 + $0xdc8] ss:$16 sps:$4 sm:$0xff]  }
 0x424   : > { %v12101_v11 = vpop.f32.mrb[41].mxu0  ;;  %v12103_v53 = vpop.f32.mrb[33].mxu1 }
 0x425   : > { %v3846_v14 = vpop.f32.mrb[42].mxu0  ;;  %v3887_v52 = vpop.f32.mrb[34].mxu1  ;;  %5427 = vmatpush1.bf16.msra.mxu0 %v10298_v38  ;;  %v10360_v38 = vld [vmem:[%s11381_s1 + $0xde4] ss:$16 sps:$4 sm:$0xff]  }
 0x426   : > { %5468 = vmatpush1.bf16.msra.mxu1 %v10301_v62  ;;  %v3847_v15 = vpop.f32.mrb[43].mxu0  ;;  %v3888_v17 = vpop.f32.mrb[35].mxu1  ;;  %5428 = vmatprep.subr.bf16.mxu0 %v10306_v63  ;;  %v10363_v62 = vld [vmem:[%s11381_s1 + $0xdec] ss:$16 sps:$4 sm:$0xff]   ;;  %v3041_v63 = vadd.f32 %v11927_v51, %v2551_v58  ;;  %v10361_v14 = vld [vmem:[%s11381_s1 + $0xde8] ss:$16 sps:$4 sm:$0xff]  }
 0x427   : > { %5469 = vmatprep.subr.bf16.mxu1 %v10309_v26  ;;  %v10358_v26 = vld [vmem:[%s11381_s1 + $0xde0] ss:$16 sps:$4 sm:$0xff]   ;;  %v2066_v52 = vmax.f32 %v2048_v16, 0.0 }
 0x428   : > { %v10365_v15 = vld [vmem:[%s11991_s27 + $0xc0] sm:$0xff]   ;;  %v5499_v17 = vmax.f32 %v3041_v63, 0.0  ;;  %v10391_v63 = vld [vmem:[%s11991_s27 + $0xb0] sm:$0xff]  }
 0x429   : > { %5429 = vmatpush1.bf16.msra.mxu0 %v10304_v10  ;;  %v3082_v10 = vadd.f32 %v11929_v7, %v2559_v60  ;;  %v10367_v51 = vld [vmem:[%s11991_s27 + $0x80] sm:$0xff]   ;;  %v10368_v7 = vld [vmem:[%s11991_s27 + $0x48] sm:$0xff]  }
 0x42a   : > { %5470 = vmatpush1.bf16.msra.mxu1 %v10307_v18  ;;  %5430 = vmatprep.subr.bf16.mxu0 %v10312_v19  ;;  %v10366_v18 = vld [vmem:[%s11991_s27] sm:$0xff]  }
 0x42b   : > { %5471 = vmatprep.subr.bf16.mxu1 %v10315_v20  ;;  %v5501_v19 = vmax.f32 %v3082_v10, 0.0  ;;  %v2080_v20 = vpack.c.bf16 %v2066_v52, %v2066_v52  ;;  %v10393_v52 = vld [vmem:[%s11991_s27 + $0xf8] sm:$0xff]  }
 0x42d   : > { %5431 = vmatpush1.bf16.msra.mxu0 %v10310_v22  ;;  %v10369_v22 = vld [vmem:[%s11991_s27 + $0xc8] sm:$0xff]  }
 0x42e   : > { %5472 = vmatpush1.bf16.msra.mxu1 %v10313_v23  ;;  %5432 = vmatprep.subr.bf16.mxu0 %v10318_v27  ;;  %v5527_v23 = vpack.c.bf16 %v5499_v17, %v5499_v17  ;;  %v10370_v27 = vld [vmem:[%s11991_s27 + $0x8] sm:$0xff]   ;;  %v10395_v17 = vld [vmem:[%s11991_s27 + $0xb8] sm:$0xff]  }
 0x42f   : > { %5473 = vmatprep.subr.bf16.mxu1 %v10321_v56  ;;  %v5529_v56 = vpack.c.bf16 %v5501_v19, %v5501_v19  ;;  %v10396_v19 = vld [vmem:[%s11991_s27 + $0x140] sm:$0xff]  }
 0x431   : > { %5433 = vmatpush1.bf16.msra.mxu0 %v10316_v28  ;;  %v10371_v28 = vld [vmem:[%s11991_s27 + $0x88] sm:$0xff]  }
 0x432   : > { %5474 = vmatpush1.bf16.msra.mxu1 %v10319_v29  ;;  %5434 = vmatprep.subr.bf16.mxu0 %v10324_v30  ;;  %v10372_v29 = vld [vmem:[%s11991_s27 + $0x50] sm:$0xff]  }
 0x433   : > { %5475 = vmatprep.subr.bf16.mxu1 %v10327_v31  ;;  %v10373_v30 = vld [vmem:[%s11991_s27 + $0xd0] sm:$0xff]  }
 0x434   : > { %v10374_v31 = vld [vmem:[%s11991_s27 + $0x10] sm:$0xff]  }
 0x435   : > { %5435 = vmatpush1.bf16.msra.mxu0 %v10322_v32  ;;  %v10375_v32 = vld [vmem:[%s11991_s27 + $0x90] sm:$0xff]  }
 0x436   : > { %5476 = vmatpush1.bf16.msra.mxu1 %v10325_v12  ;;  %5436 = vmatprep.subr.bf16.mxu0 %v10330_v3  ;;  %v10376_v12 = vld [vmem:[%s11991_s27 + $0x58] sm:$0xff]  }
 0x437   : > { %5477 = vmatprep.subr.bf16.mxu1 %v10333_v34  ;;  %v10377_v3 = vld [vmem:[%s11991_s27 + $0xd8] sm:$0xff]  }
 0x438   : > { %v10378_v34 = vld [vmem:[%s11991_s27 + $0x18] sm:$0xff]  }
 0x439   : > { %5437 = vmatpush1.bf16.msra.mxu0 %v10328_v21  ;;  %v10379_v21 = vld [vmem:[%s11991_s27 + $0x98] sm:$0xff]  }
 0x43a   : > { %5478 = vmatpush1.bf16.msra.mxu1 %v10331_v25  ;;  %5438 = vmatprep.subr.bf16.mxu0 %v10336_v41  ;;  %v10380_v25 = vld [vmem:[%s11991_s27 + $0x60] sm:$0xff]  }
 0x43b   : > { %5479 = vmatprep.subr.bf16.mxu1 %v10339_v42  ;;  %v10381_v41 = vld [vmem:[%s11991_s27 + $0xe0] sm:$0xff]  }
 0x43c   : > { %v10382_v42 = vld [vmem:[%s11991_s27 + $0x20] sm:$0xff]  }
 0x43d   : > { %5439 = vmatpush1.bf16.msra.mxu0 %v10334_v9  ;;  %v10383_v9 = vld [vmem:[%s11991_s27 + $0xa0] sm:$0xff]  }
 0x43e   : > { %5480 = vmatpush1.bf16.msra.mxu1 %v10337_v43  ;;  %5440 = vmatprep.subr.bf16.mxu0 %v10342_v44  ;;  %v10384_v43 = vld [vmem:[%s11991_s27 + $0x68] sm:$0xff]   ;;  %v12176_v44 = vsub.s32 2, %v11642_v0  ;;  %v10389_v0 = vld [vmem:[%s11991_s27 + $0xf0] sm:$0xff]  }
 0x43f   : > { %5481 = vmatprep.subr.bf16.mxu1 %v10345_v57  ;;  %v12179_v57 = vld [vmem:[%s11387_s30 + $0x4] sm:$0xf] }
 0x440   : > { %v2575_v60 = vrot.slane %v12179_v57, %v12067_v35 }
 0x441   : > { %5441 = vmatpush1.bf16.msra.mxu0 %v10340_v13  ;;  %v10385_v13 = vld [vmem:[%s11991_s27 + $0xe8] sm:$0xff]  }
 0x442   : > { %5482 = vmatpush1.bf16.msra.mxu1 %v10343_v45  ;;  %5442 = vmatprep.subr.bf16.mxu0 %v10348_v46  ;;  %v10386_v45 = vld [vmem:[%s11991_s27 + $0x28] sm:$0xff]  }
 0x443   : > { %5483 = vmatprep.subr.bf16.mxu1 %v10351_v48  ;;  %v10387_v46 = vld [vmem:[%s11991_s27 + $0xa8] sm:$0xff]   ;;  %v2547_v48 = vrot.slane %v12132_v47, %v11645_v1 }
 0x445   : > { %5443 = vmatpush1.bf16.msra.mxu0 %v10346_v49  ;;  %v10388_v49 = vld [vmem:[%s11991_s27 + $0x70] sm:$0xff]   ;;  %v3039_v16 = vadd.f32 %v11922_v5, %v2547_v48  ;;  %v3484_v5 = vadd.f32 %v12018_v39, %v2575_v60  ;;  %v10400_v39 = vld [vmem:[%s11991_s27 + $0x148] sm:$0xff]   ;;  %v2571_v60 = vrot.slane %v12179_v57, %v12176_v44 }
 0x446   : > { %5484 = vmatpush1.bf16.msra.mxu1 %v10349_v50  ;;  %5444 = vmatprep.subr.bf16.mxu0 %v10354_v33  ;;  %v2555_v50 = vrot.slane %v12132_v47, %v12176_v44  ;;  %v2567_v33 = vrot.slane %v12179_v57, %v11649_v2  ;;  %v12234_v48 = vld [vmem:[%s11387_s30 + $0x8] sm:$0xf] }
 0x447   : > { %5485 = vmatprep.subr.bf16.mxu1 %v10357_v55 }
 0x448   : > { %v3080_v10 = vadd.f32 %v11924_v6, %v2555_v50  ;;  %v10397_v6 = vld [vmem:[%s11991_s27 + $0x1c0] sm:$0xff]   ;;  %v10418_v50 = vld [vmem:[%s11991_s27 + $0x128] sm:$0xff]  }
 0x449   : > { %5445 = vmatpush1.bf16.msra.mxu0 %v10352_v59  ;;  %v10390_v59 = vld [vmem:[%s11991_s27 + $0x30] sm:$0xff]  }
 0x44a   : > { %5486 = vmatpush1.bf16.msra.mxu1 %v10355_v61  ;;  %5446 = vmatprep.subr.bf16.mxu0 %v10360_v38 }
 0x44b   : > { %5487 = vmatprep.subr.bf16.mxu1 %v10363_v62 }
 0x44d   : > { %5447 = vmatpush1.bf16.msra.mxu0 %v10358_v26  ;;  %v10392_v26 = vld [vmem:[%s11991_s27 + $0x78] sm:$0xff]  }
 0x44e   : > { %5488 = vmatpush1.bf16.msra.mxu1 %v10361_v14  ;;  %9061 = vmatprep.subr.bf16.mxu0 %v10364_v24  ;;  %v3443_v24 = vadd.f32 %v12016_v40, %v2567_v33  ;;  %v10399_v40 = vld [vmem:[%s11991_s27 + $0x180] sm:$0xff]   ;;  %v2563_v33 = vrot.slane %v12179_v57, %v11645_v1  ;;  %v10424_v57 = vld [vmem:[%s11991_s27 + $0x178] sm:$0xff]  }
 0x44f   : > { %9083 = vmatprep.subr.bf16.mxu1 %v10365_v15  ;;  %v10394_v15 = vld [vmem:[%s11991_s27 + $0x38] sm:$0xff]  }
 0x450   : > { %5449 = vmatmul.mubr.bf16.vlgmr.msra.gmra.mrb[56].mxu0 %v2080_v20 }
 0x451   : > { %5490 = vmatmul.mubr.bf16.vlgmr.msra.gmra.mrb[48].mxu1 %v2080_v20  ;;  %9062 = vmatpush3.bf16.msra.mxu0 %v10366_v18  ;;  %v5498_v18 = vmax.f32 %v3039_v16, 0.0  ;;  %v5503_v20 = vmax.f32 %v3443_v24, 0.0  ;;  %v2583_v16 = vrot.slane %v12234_v48, %v11649_v2  ;;  %v10426_v24 = vld [vmem:[%s11991_s27 + $0x138] sm:$0xff]  }
 0x452   : > { %6275 = vmatprep.mubr.bf16.mxu0 %v5527_v23  ;;  %9084 = vmatpush3.bf16.msra.mxu1 %v10367_v51  ;;  %v5500_v51 = vmax.f32 %v3080_v10, 0.0  ;;  %v3482_v10 = vadd.f32 %v12014_v37, %v2571_v60  ;;  %v10429_v37 = vld [vmem:[%s11991_s27 + $0x2c0] sm:$0xff]  }
 0x453   : > { %6315 = vmatprep.mubr.bf16.mxu1 %v5529_v56  ;;  %9063 = vmatprep.subr.bf16.mxu0 %v10368_v7  ;;  %v10398_v7 = vld [vmem:[%s11991_s27 + $0x100] sm:$0xff]   ;;  %v5526_v23 = vpack.c.bf16 %v5498_v18, %v5498_v18  ;;  %v10401_v56 = vld [vmem:[%s11991_s27 + $0x1c8] sm:$0xff]  }
 0x454   : > { %9085 = vmatprep.subr.bf16.mxu1 %v10369_v22  ;;  %v5505_v22 = vmax.f32 %v3484_v5, 0.0  ;;  %v10427_v5 = vld [vmem:[%s11991_s27 + $0x1b8] sm:$0xff]   ;;  %v5504_v18 = vmax.f32 %v3482_v10, 0.0  ;;  %v10455_v10 = vld [vmem:[%s11991_s27 + $0x2b0] sm:$0xff]  }
 0x455   : > { %9064 = vmatpush3.bf16.msra.mxu0 %v10370_v27  ;;  %v5528_v27 = vpack.c.bf16 %v5500_v51, %v5500_v51  ;;  %v10430_v51 = vld [vmem:[%s11991_s27 + $0x200] sm:$0xff]  }
 0x456   : > { %9086 = vmatpush3.bf16.msra.mxu1 %v10371_v28  ;;  %9065 = vmatprep.subr.bf16.mxu0 %v10372_v29  ;;  %v5531_v28 = vpack.c.bf16 %v5503_v20, %v5503_v20  ;;  %v10402_v29 = vld [vmem:[%s11991_s27 + $0x108] sm:$0xff]  }
 0x457   : > { %9087 = vmatprep.subr.bf16.mxu1 %v10373_v30  ;;  %v5533_v30 = vpack.c.bf16 %v5505_v22, %v5505_v22  ;;  %v10433_v22 = vld [vmem:[%s11991_s27 + $0x2c8] sm:$0xff]  }
 0x459   : > { %9066 = vmatpush3.bf16.msra.mxu0 %v10374_v31  ;;  %v10403_v31 = vld [vmem:[%s11991_s27 + $0x188] sm:$0xff]  }
 0x45a   : > { %9088 = vmatpush3.bf16.msra.mxu1 %v10375_v32  ;;  %9067 = vmatprep.subr.bf16.mxu0 %v10376_v12  ;;  %v10404_v32 = vld [vmem:[%s11991_s27 + $0x150] sm:$0xff]  }
 0x45b   : > { %9089 = vmatprep.subr.bf16.mxu1 %v10377_v3  ;;  %v10405_v12 = vld [vmem:[%s11991_s27 + $0x1d0] sm:$0xff]  }
 0x45c   : > { %v10406_v3 = vld [vmem:[%s11991_s27 + $0x110] sm:$0xff]  }
 0x45d   : > { %9068 = vmatpush3.bf16.msra.mxu0 %v10378_v34  ;;  %v10407_v34 = vld [vmem:[%s11991_s27 + $0x190] sm:$0xff]  }
 0x45e   : > { %9090 = vmatpush3.bf16.msra.mxu1 %v10379_v21  ;;  %9069 = vmatprep.subr.bf16.mxu0 %v10380_v25  ;;  %v10408_v21 = vld [vmem:[%s11991_s27 + $0x158] sm:$0xff]  }
 0x45f   : > { %9091 = vmatprep.subr.bf16.mxu1 %v10381_v41  ;;  %v10409_v25 = vld [vmem:[%s11991_s27 + $0x1d8] sm:$0xff]  }
 0x460   : > { %v10410_v41 = vld [vmem:[%s11991_s27 + $0x118] sm:$0xff]  }
 0x461   : > { %9070 = vmatpush3.bf16.msra.mxu0 %v10382_v42  ;;  %v10411_v42 = vld [vmem:[%s11991_s27 + $0x198] sm:$0xff]  }
 0x462   : > { %9092 = vmatpush3.bf16.msra.mxu1 %v10383_v9  ;;  %9071 = vmatprep.subr.bf16.mxu0 %v10384_v43  ;;  %v10412_v9 = vld [vmem:[%s11991_s27 + $0x160] sm:$0xff]  }
 0x463   : > { %v12189_v4 = vpop.f32.mrb[44].mxu0  ;;  %9093 = vmatprep.subr.bf16.mxu1 %v10385_v13  ;;  %v10413_v43 = vld [vmem:[%s11991_s27 + $0x1e0] sm:$0xff]  }
 0x464   : > { %v12194_v55 = vpop.f32.mrb[36].mxu1  ;;  %v12196_v58 = vpop.f32.mrb[45].mxu0  ;;  %v10414_v13 = vld [vmem:[%s11991_s27 + $0x120] sm:$0xff]  }
 0x465   : > { %v12201_v47 = vpop.f32.mrb[37].mxu1  ;;  %v4248_v61 = vpop.f32.mrb[46].mxu0  ;;  %9072 = vmatpush3.bf16.msra.mxu0 %v10386_v45  ;;  %v10415_v45 = vld [vmem:[%s11991_s27 + $0x1a0] sm:$0xff]  }
 0x466   : > { %v4289_v38 = vpop.f32.mrb[38].mxu1  ;;  %9094 = vmatpush3.bf16.msra.mxu1 %v10387_v46  ;;  %v4249_v62 = vpop.f32.mrb[47].mxu0  ;;  %9073 = vmatprep.subr.bf16.mxu0 %v10388_v49  ;;  %v10416_v46 = vld [vmem:[%s11991_s27 + $0x168] sm:$0xff]   ;;  %v10421_v61 = vld [vmem:[%s11991_s27 + $0x1f0] sm:$0xff]  }
 0x467   : > { %v4290_v14 = vpop.f32.mrb[39].mxu1  ;;  %9095 = vmatprep.subr.bf16.mxu1 %v10389_v0  ;;  %v10417_v49 = vld [vmem:[%s11991_s27 + $0x1e8] sm:$0xff]   ;;  %v10422_v38 = vld [vmem:[%s11991_s27 + $0x130] sm:$0xff]   ;;  %v2591_v62 = vrot.slane %v12234_v48, %v12067_v35 }
 0x468   : > { %v10419_v0 = vld [vmem:[%s11991_s27 + $0x1a8] sm:$0xff]   ;;  %v10425_v14 = vld [vmem:[%s11991_s27 + $0x1f8] sm:$0xff]  }
 0x469   : > { %9074 = vmatpush3.bf16.msra.mxu0 %v10390_v59  ;;  %v10420_v59 = vld [vmem:[%s11991_s27 + $0x170] sm:$0xff]  }
 0x46a   : > { %9096 = vmatpush3.bf16.msra.mxu1 %v10391_v63  ;;  %9075 = vmatprep.subr.bf16.mxu0 %v10392_v26  ;;  %v10423_v63 = vld [vmem:[%s11991_s27 + $0x1b0] sm:$0xff]   ;;  %v3441_v26 = vadd.f32 %v12012_v36, %v2563_v33  ;;  %v10428_v36 = vld [vmem:[%s11991_s27 + $0x240] sm:$0xff]  }
 0x46b   : > { %9097 = vmatprep.subr.bf16.mxu1 %v10393_v52  ;;  %v3845_v52 = vadd.f32 %v12101_v11, %v2583_v16  ;;  %v10431_v11 = vld [vmem:[%s11991_s27 + $0x280] sm:$0xff]   ;;  %v10453_v33 = vld [vmem:[%s11991_s27 + $0x2f0] sm:$0xff]  }
 0x46c   : > { %v10454_v16 = vld [vmem:[%s11991_s27 + $0x230] sm:$0xff]  }
 0x46d   : > { %9076 = vmatpush3.bf16.msra.mxu0 %v10394_v15  ;;  %v3886_v15 = vadd.f32 %v12103_v53, %v2591_v62  ;;  %v10432_v53 = vld [vmem:[%s11991_s27 + $0x248] sm:$0xff]  }
 0x46e   : > { %9098 = vmatpush3.bf16.msra.mxu1 %v10395_v17  ;;  %9105 = vmatprep.subr.bf16.mxu0 %v10396_v19  ;;  %v5502_v17 = vmax.f32 %v3441_v26, 0.0  ;;  %v5507_v19 = vmax.f32 %v3845_v52, 0.0 }
 0x46f   : > { %9127 = vmatprep.subr.bf16.mxu1 %v10397_v6  ;;  %v5509_v6 = vmax.f32 %v3886_v15, 0.0  ;;  %v10457_v15 = vld [vmem:[%s11991_s27 + $0x2f8] sm:$0xff]  }
 0x470   : > { %6276 = vmatmul.mubr.bf16.vlgmr.msra.gmra.mrb[60].mxu0 %v5526_v23  ;;  %v5530_v20 = vpack.c.bf16 %v5502_v17, %v5502_v17  ;;  %v10434_v23 = vld [vmem:[%s11991_s27 + $0x208] sm:$0xff]   ;;  %v10458_v17 = vld [vmem:[%s11991_s27 + $0x238] sm:$0xff]  }
 0x471   : > { %6316 = vmatmul.mubr.bf16.vlgmr.msra.gmra.mrb[52].mxu1 %v5528_v27  ;;  %9106 = vmatpush3.bf16.msra.mxu0 %v10398_v7  ;;  %v5532_v7 = vpack.c.bf16 %v5504_v18, %v5504_v18  ;;  %v10435_v27 = vld [vmem:[%s11991_s27 + $0x288] sm:$0xff]   ;;  %v10459_v18 = vld [vmem:[%s11991_s27 + $0x2b8] sm:$0xff]  }
 0x472   : > { %6547 = vmatprep.mubr.bf16.mxu0 %v5531_v28  ;;  %9128 = vmatpush3.bf16.msra.mxu1 %v10399_v40  ;;  %v5535_v40 = vpack.c.bf16 %v5507_v19, %v5507_v19  ;;  %v10437_v28 = vld [vmem:[%s11991_s27 + $0x2d0] sm:$0xff]  }
 0x473   : > { %6587 = vmatprep.mubr.bf16.mxu1 %v5533_v30  ;;  %9107 = vmatprep.subr.bf16.mxu0 %v10400_v39  ;;  %v5537_v39 = vpack.c.bf16 %v5509_v6, %v5509_v6  ;;  %v10439_v30 = vld [vmem:[%s11991_s27 + $0x290] sm:$0xff]   ;;  %v10462_v6 = vld [vmem:[%s11991_s27 + $0x300] sm:$0xff]  }
 0x474   : > { %9129 = vmatprep.subr.bf16.mxu1 %v10401_v56  ;;  %v10436_v56 = vld [vmem:[%s11991_s27 + $0x250] sm:$0xff]  }
 0x475   : > { %9108 = vmatpush3.bf16.msra.mxu0 %v10402_v29  ;;  %v10438_v29 = vld [vmem:[%s11991_s27 + $0x210] sm:$0xff]  }
 0x476   : > { %9130 = vmatpush3.bf16.msra.mxu1 %v10403_v31  ;;  %9109 = vmatprep.subr.bf16.mxu0 %v10404_v32  ;;  %v10440_v31 = vld [vmem:[%s11991_s27 + $0x258] sm:$0xff]  }
 0x477   : > { %9131 = vmatprep.subr.bf16.mxu1 %v10405_v12  ;;  %v10441_v32 = vld [vmem:[%s11991_s27 + $0x2d8] sm:$0xff]  }
 0x478   : > { %v10442_v12 = vld [vmem:[%s11991_s27 + $0x218] sm:$0xff]  }
 0x479   : > { %9110 = vmatpush3.bf16.msra.mxu0 %v10406_v3  ;;  %v10443_v3 = vld [vmem:[%s11991_s27 + $0x298] sm:$0xff]  }
 0x47a   : > { %9132 = vmatpush3.bf16.msra.mxu1 %v10407_v34  ;;  %9111 = vmatprep.subr.bf16.mxu0 %v10408_v21  ;;  %v10444_v34 = vld [vmem:[%s11991_s27 + $0x260] sm:$0xff]  }
 0x47b   : > { %9133 = vmatprep.subr.bf16.mxu1 %v10409_v25  ;;  %v10445_v21 = vld [vmem:[%s11991_s27 + $0x2e0] sm:$0xff]  }
 0x47c   : > { %v10446_v25 = vld [vmem:[%s11991_s27 + $0x220] sm:$0xff]  }
 0x47d   : > { %9112 = vmatpush3.bf16.msra.mxu0 %v10410_v41  ;;  %v10447_v41 = vld [vmem:[%s11991_s27 + $0x2a0] sm:$0xff]  }
 0x47e   : > { %9134 = vmatpush3.bf16.msra.mxu1 %v10411_v42  ;;  %9113 = vmatprep.subr.bf16.mxu0 %v10412_v9  ;;  %v10448_v42 = vld [vmem:[%s11991_s27 + $0x268] sm:$0xff]  }
 0x47f   : > { %9135 = vmatprep.subr.bf16.mxu1 %v10413_v43  ;;  %v12281_v9 = vld [vmem:[%s11387_s30 + $0xc] sm:$0xf] }
 0x480   : > { %v10449_v43 = vld [vmem:[%s11991_s27 + $0x2e8] sm:$0xff]  }
 0x481   : > { %9114 = vmatpush3.bf16.msra.mxu0 %v10414_v13  ;;  %v10450_v13 = vld [vmem:[%s11991_s27 + $0x228] sm:$0xff]  }
 0x482   : > { %9136 = vmatpush3.bf16.msra.mxu1 %v10415_v45  ;;  %9115 = vmatprep.subr.bf16.mxu0 %v10416_v46  ;;  %v10451_v45 = vld [vmem:[%s11991_s27 + $0x2a8] sm:$0xff]   ;;  %v2579_v46 = vrot.slane %v12234_v48, %v11645_v1 }
 0x483   : > { %9137 = vmatprep.subr.bf16.mxu1 %v10417_v49  ;;  %v10452_v49 = vld [vmem:[%s11991_s27 + $0x270] sm:$0xff]  }
 0x485   : > { %9116 = vmatpush3.bf16.msra.mxu0 %v10418_v50  ;;  %v2587_v50 = vrot.slane %v12234_v48, %v12176_v44 }
 0x486   : > { %9138 = vmatpush3.bf16.msra.mxu1 %v10419_v0  ;;  %9117 = vmatprep.subr.bf16.mxu0 %v10420_v59  ;;  %v2599_v59 = vrot.slane %v12281_v9, %v11649_v2 }
 0x487   : > { %9139 = vmatprep.subr.bf16.mxu1 %v10421_v61  ;;  %v3884_v52 = vadd.f32 %v12098_v8, %v2587_v50  ;;  %v10461_v8 = vld [vmem:[%s11991_s27 + $0x3c0] sm:$0xff]   ;;  %v2603_v50 = vrot.slane %v12281_v9, %v12176_v44 }
 0x489   : > { %9118 = vmatpush3.bf16.msra.mxu0 %v10422_v38  ;;  %v2607_v38 = vrot.slane %v12281_v9, %v12067_v35  ;;  %v5508_v19 = vmax.f32 %v3884_v52, 0.0  ;;  %v10490_v52 = vld [vmem:[%s11991_s27 + $0x338] sm:$0xff]  }
 0x48a   : > { %9140 = vmatpush3.bf16.msra.mxu1 %v10423_v63  ;;  %9119 = vmatprep.subr.bf16.mxu0 %v10424_v57  ;;  %v3843_v63 = vadd.f32 %v12096_v54, %v2579_v46  ;;  %v10483_v46 = vld [vmem:[%s11991_s27 + $0x3a8] sm:$0xff]  }
 0x48b   : > { %9141 = vmatprep.subr.bf16.mxu1 %v10425_v14  ;;  %v10456_v14 = vld [vmem:[%s11991_s27 + $0x278] sm:$0xff]   ;;  %v4288_v54 = vadd.f32 %v12201_v47, %v2607_v38  ;;  %v10464_v47 = vld [vmem:[%s11991_s27 + $0x348] sm:$0xff]   ;;  %v10486_v38 = vld [vmem:[%s11991_s27 + $0x330] sm:$0xff]  }
 0x48d   : > { %9120 = vmatpush3.bf16.msra.mxu0 %v10426_v24 }
 0x48e   : > { %9142 = vmatpush3.bf16.msra.mxu1 %v10427_v5  ;;  %9149 = vmatprep.subr.bf16.mxu0 %v10428_v36  ;;  %v4247_v5 = vadd.f32 %v12196_v58, %v2599_v59  ;;  %v5506_v36 = vmax.f32 %v3843_v63, 0.0  ;;  %v10463_v58 = vld [vmem:[%s11991_s27 + $0x380] sm:$0xff]   ;;  %v10487_v63 = vld [vmem:[%s11991_s27 + $0x3b0] sm:$0xff]  }
 0x48f   : > { %9171 = vmatprep.subr.bf16.mxu1 %v10429_v37  ;;  %v10460_v37 = vld [vmem:[%s11991_s27 + $0x340] sm:$0xff]  }
 0x490   : > { %6548 = vmatmul.mubr.bf16.vlgmr.msra.gmra.mrb[64].mxu0 %v5530_v20  ;;  %v5534_v20 = vpack.c.bf16 %v5506_v36, %v5506_v36 }
 0x491   : > { %6588 = vmatmul.mubr.bf16.vlgmr.msra.gmra.mrb[56].mxu1 %v5532_v7  ;;  %9150 = vmatpush3.bf16.msra.mxu0 %v10430_v51  ;;  %v5511_v51 = vmax.f32 %v4247_v5, 0.0  ;;  %v10465_v7 = vld [vmem:[%s11991_s27 + $0x3c8] sm:$0xff]  }
 0x492   : > { %6819 = vmatprep.mubr.bf16.mxu0 %v5535_v40  ;;  %9172 = vmatpush3.bf16.msra.mxu1 %v10431_v11  ;;  %v5513_v11 = vmax.f32 %v4288_v54, 0.0  ;;  %v10466_v40 = vld [vmem:[%s11991_s27 + $0x308] sm:$0xff]  }
 0x493   : > { %6859 = vmatprep.mubr.bf16.mxu1 %v5537_v39  ;;  %9151 = vmatprep.subr.bf16.mxu0 %v10432_v53  ;;  %v5536_v53 = vpack.c.bf16 %v5508_v19, %v5508_v19  ;;  %v10467_v39 = vld [vmem:[%s11991_s27 + $0x388] sm:$0xff]  }
 0x494   : > { %9173 = vmatprep.subr.bf16.mxu1 %v10433_v22  ;;  %v5539_v22 = vpack.c.bf16 %v5511_v51, %v5511_v51 }
 0x495   : > { %9152 = vmatpush3.bf16.msra.mxu0 %v10434_v23  ;;  %v5541_v23 = vpack.c.bf16 %v5513_v11, %v5513_v11  ;;  %v10499_v11 = vld [vmem:[%s11991_s27 + $0x488] sm:$0xff]  }
 0x496   : > { %9174 = vmatpush3.bf16.msra.mxu1 %v10435_v27  ;;  %9153 = vmatprep.subr.bf16.mxu0 %v10436_v56  ;;  %v10468_v27 = vld [vmem:[%s11991_s27 + $0x350] sm:$0xff]  }
 0x497   : > { %9175 = vmatprep.subr.bf16.mxu1 %v10437_v28  ;;  %v10469_v56 = vld [vmem:[%s11991_s27 + $0x3d0] sm:$0xff]  }
 0x498   : > { %v10470_v28 = vld [vmem:[%s11991_s27 + $0x310] sm:$0xff]  }
 0x499   : > { %9154 = vmatpush3.bf16.msra.mxu0 %v10438_v29  ;;  %v10471_v29 = vld [vmem:[%s11991_s27 + $0x390] sm:$0xff]  }
 0x49a   : > { %9176 = vmatpush3.bf16.msra.mxu1 %v10439_v30  ;;  %9155 = vmatprep.subr.bf16.mxu0 %v10440_v31  ;;  %v10472_v30 = vld [vmem:[%s11991_s27 + $0x358] sm:$0xff]  }
 0x49b   : > { %9177 = vmatprep.subr.bf16.mxu1 %v10441_v32  ;;  %v10473_v31 = vld [vmem:[%s11991_s27 + $0x3d8] sm:$0xff]  }
 0x49c   : > { %v10474_v32 = vld [vmem:[%s11991_s27 + $0x318] sm:$0xff]  }
 0x49d   : > { %9156 = vmatpush3.bf16.msra.mxu0 %v10442_v12  ;;  %v10475_v12 = vld [vmem:[%s11991_s27 + $0x398] sm:$0xff]  }
 0x49e   : > { %9178 = vmatpush3.bf16.msra.mxu1 %v10443_v3  ;;  %9157 = vmatprep.subr.bf16.mxu0 %v10444_v34  ;;  %v10476_v3 = vld [vmem:[%s11991_s27 + $0x360] sm:$0xff]  }
 0x49f   : > { %9179 = vmatprep.subr.bf16.mxu1 %v10445_v21  ;;  %v10477_v34 = vld [vmem:[%s11991_s27 + $0x3e0] sm:$0xff]  }
 0x4a0   : > { %v10478_v21 = vld [vmem:[%s11991_s27 + $0x320] sm:$0xff]  }
 0x4a1   : > { %9158 = vmatpush3.bf16.msra.mxu0 %v10446_v25  ;;  %v10479_v25 = vld [vmem:[%s11991_s27 + $0x3a0] sm:$0xff]  }
 0x4a2   : > { %9180 = vmatpush3.bf16.msra.mxu1 %v10447_v41  ;;  %9159 = vmatprep.subr.bf16.mxu0 %v10448_v42  ;;  %v10480_v41 = vld [vmem:[%s11991_s27 + $0x368] sm:$0xff]  }
 0x4a3   : > { %v12291_v0 = vpop.f32.mrb[48].mxu0  ;;  %9181 = vmatprep.subr.bf16.mxu1 %v10449_v43  ;;  %v10481_v42 = vld [vmem:[%s11991_s27 + $0x3e8] sm:$0xff]   ;;  %v12337_v43 = vld [vmem:[%s11387_s30 + $0x10] sm:$0xf] }
 0x4a4   : > { %v12296_v60 = vpop.f32.mrb[40].mxu1  ;;  %v12298_v61 = vpop.f32.mrb[49].mxu0  ;;  %v2615_v59 = vrot.slane %v12337_v43, %v11649_v2 }
 0x4a5   : > { %v12303_v48 = vpop.f32.mrb[41].mxu1  ;;  %v4650_v62 = vpop.f32.mrb[50].mxu0  ;;  %9160 = vmatpush3.bf16.msra.mxu0 %v10450_v13  ;;  %v10482_v13 = vld [vmem:[%s11991_s27 + $0x328] sm:$0xff]  }
 0x4a6   : > { %v4691_v26 = vpop.f32.mrb[42].mxu1  ;;  %9182 = vmatpush3.bf16.msra.mxu1 %v10451_v45  ;;  %v4651_v57 = vpop.f32.mrb[51].mxu0  ;;  %9161 = vmatprep.subr.bf16.mxu0 %v10452_v49  ;;  %v2595_v45 = vrot.slane %v12281_v9, %v11645_v1  ;;  %v10484_v49 = vld [vmem:[%s11991_s27 + $0x370] sm:$0xff]   ;;  %v10488_v9 = vld [vmem:[%s11991_s27 + $0x378] sm:$0xff]  }
 0x4a7   : > { %v4692_v24 = vpop.f32.mrb[43].mxu1  ;;  %9183 = vmatprep.subr.bf16.mxu1 %v10453_v33  ;;  %v10485_v33 = vld [vmem:[%s11991_s27 + $0x3f0] sm:$0xff]   ;;  %v4286_v26 = vadd.f32 %v12194_v55, %v2603_v50  ;;  %v10489_v57 = vld [vmem:[%s11991_s27 + $0x3f8] sm:$0xff]   ;;  %v10493_v55 = vld [vmem:[%s11991_s27 + $0x4c0] sm:$0xff]  }
 0x4a8   : > { %v4245_v62 = vadd.f32 %v12189_v4, %v2595_v45  ;;  %v10491_v4 = vld [vmem:[%s11991_s27 + $0x3b8] sm:$0xff]  }
 0x4a9   : > { %9162 = vmatpush3.bf16.msra.mxu0 %v10454_v16  ;;  %v2623_v16 = vrot.slane %v12337_v43, %v12067_v35  ;;  %v5512_v5 = vmax.f32 %v4286_v26, 0.0  ;;  %v10521_v26 = vld [vmem:[%s11991_s27 + $0x4f8] sm:$0xff]  }
 0x4aa   : > { %9184 = vmatpush3.bf16.msra.mxu1 %v10455_v10  ;;  %9163 = vmatprep.subr.bf16.mxu0 %v10456_v14  ;;  %v4649_v10 = vadd.f32 %v12298_v61, %v2615_v59  ;;  %v5510_v24 = vmax.f32 %v4245_v62, 0.0  ;;  %v10494_v61 = vld [vmem:[%s11991_s27 + $0x400] sm:$0xff]   ;;  %v10520_v62 = vld [vmem:[%s11991_s27 + $0x478] sm:$0xff]  }
 0x4ab   : > { %9185 = vmatprep.subr.bf16.mxu1 %v10457_v15  ;;  %v4690_v14 = vadd.f32 %v12303_v48, %v2623_v16  ;;  %v10492_v15 = vld [vmem:[%s11991_s27 + $0x440] sm:$0xff]  }
 0x4ac   : > { %v5538_v36 = vpack.c.bf16 %v5510_v24, %v5510_v24  ;;  %v10495_v48 = vld [vmem:[%s11991_s27 + $0x480] sm:$0xff]  }
 0x4ad   : > { %9164 = vmatpush3.bf16.msra.mxu0 %v10458_v17  ;;  %v5515_v17 = vmax.f32 %v4649_v10, 0.0  ;;  %v5517_v54 = vmax.f32 %v4690_v14, 0.0  ;;  %v10522_v14 = vld [vmem:[%s11991_s27 + $0x438] sm:$0xff]   ;;  %v10524_v24 = vld [vmem:[%s11991_s27 + $0x540] sm:$0xff]  }
 0x4ae   : > { %9186 = vmatpush3.bf16.msra.mxu1 %v10459_v18  ;;  %9193 = vmatprep.subr.bf16.mxu0 %v10460_v37  ;;  %v5540_v18 = vpack.c.bf16 %v5512_v5, %v5512_v5  ;;  %v10496_v37 = vld [vmem:[%s11991_s27 + $0x448] sm:$0xff]  }
 0x4af   : > { %9215 = vmatprep.subr.bf16.mxu1 %v10461_v8  ;;  %v5543_v19 = vpack.c.bf16 %v5515_v17, %v5515_v17  ;;  %v10497_v8 = vld [vmem:[%s11991_s27 + $0x4c8] sm:$0xff]   ;;  %v5545_v51 = vpack.c.bf16 %v5517_v54, %v5517_v54  ;;  %v10527_v54 = vld [vmem:[%s11991_s27 + $0x580] sm:$0xff]  }
 0x4b0   : > { %6820 = vmatmul.mubr.bf16.vlgmr.msra.gmra.mrb[68].mxu0 %v5534_v20  ;;  %v10501_v20 = vld [vmem:[%s11991_s27 + $0x4d0] sm:$0xff]  }
 0x4b1   : > { %6860 = vmatmul.mubr.bf16.vlgmr.msra.gmra.mrb[60].mxu1 %v5536_v53  ;;  %9194 = vmatpush3.bf16.msra.mxu0 %v10462_v6  ;;  %v10498_v6 = vld [vmem:[%s11991_s27 + $0x408] sm:$0xff]   ;;  %v10503_v53 = vld [vmem:[%s11991_s27 + $0x490] sm:$0xff]  }
 0x4b2   : > { %7091 = vmatprep.mubr.bf16.mxu0 %v5539_v22  ;;  %9216 = vmatpush3.bf16.msra.mxu1 %v10463_v58  ;;  %v10500_v58 = vld [vmem:[%s11991_s27 + $0x450] sm:$0xff]   ;;  %v10505_v22 = vld [vmem:[%s11991_s27 + $0x4d8] sm:$0xff]  }
 0x4b3   : > { %7131 = vmatprep.mubr.bf16.mxu1 %v5541_v23  ;;  %9195 = vmatprep.subr.bf16.mxu0 %v10464_v47  ;;  %v10502_v47 = vld [vmem:[%s11991_s27 + $0x410] sm:$0xff]   ;;  %v10507_v23 = vld [vmem:[%s11991_s27 + $0x498] sm:$0xff]  }
 0x4b4   : > { %9217 = vmatprep.subr.bf16.mxu1 %v10465_v7  ;;  %v10504_v7 = vld [vmem:[%s11991_s27 + $0x458] sm:$0xff]  }
 0x4b5   : > { %9196 = vmatpush3.bf16.msra.mxu0 %v10466_v40  ;;  %v10506_v40 = vld [vmem:[%s11991_s27 + $0x418] sm:$0xff]  }
 0x4b6   : > { %9218 = vmatpush3.bf16.msra.mxu1 %v10467_v39  ;;  %9197 = vmatprep.subr.bf16.mxu0 %v10468_v27  ;;  %v10508_v39 = vld [vmem:[%s11991_s27 + $0x460] sm:$0xff]  }
 0x4b7   : > { %9219 = vmatprep.subr.bf16.mxu1 %v10469_v56  ;;  %v10509_v27 = vld [vmem:[%s11991_s27 + $0x4e0] sm:$0xff]  }
 0x4b8   : > { %v10510_v56 = vld [vmem:[%s11991_s27 + $0x420] sm:$0xff]  }
 0x4b9   : > { %9198 = vmatpush3.bf16.msra.mxu0 %v10470_v28  ;;  %v10511_v28 = vld [vmem:[%s11991_s27 + $0x4a0] sm:$0xff]  }
 0x4ba   : > { %9220 = vmatpush3.bf16.msra.mxu1 %v10471_v29  ;;  %9199 = vmatprep.subr.bf16.mxu0 %v10472_v30  ;;  %v10512_v29 = vld [vmem:[%s11991_s27 + $0x468] sm:$0xff]  }
 0x4bb   : > { %9221 = vmatprep.subr.bf16.mxu1 %v10473_v31  ;;  %v10513_v30 = vld [vmem:[%s11991_s27 + $0x4e8] sm:$0xff]   ;;  %v12384_v31 = vld [vmem:[%s11387_s30 + $0x14] sm:$0xf] }
 0x4bd   : > { %9200 = vmatpush3.bf16.msra.mxu0 %v10474_v32  ;;  %v10514_v32 = vld [vmem:[%s11991_s27 + $0x428] sm:$0xff]  }
 0x4be   : > { %9222 = vmatpush3.bf16.msra.mxu1 %v10475_v12  ;;  %9201 = vmatprep.subr.bf16.mxu0 %v10476_v3  ;;  %v2611_v12 = vrot.slane %v12337_v43, %v11645_v1  ;;  %v10515_v3 = vld [vmem:[%s11991_s27 + $0x4a8] sm:$0xff]  }
 0x4bf   : > { %9223 = vmatprep.subr.bf16.mxu1 %v10477_v34  ;;  %v10516_v34 = vld [vmem:[%s11991_s27 + $0x470] sm:$0xff]  }
 0x4c1   : > { %9202 = vmatpush3.bf16.msra.mxu0 %v10478_v21  ;;  %v2619_v21 = vrot.slane %v12337_v43, %v12176_v44  ;;  %v10518_v43 = vld [vmem:[%s11991_s27 + $0x430] sm:$0xff]  }
 0x4c2   : > { %9224 = vmatpush3.bf16.msra.mxu1 %v10479_v25  ;;  %9203 = vmatprep.subr.bf16.mxu0 %v10480_v41  ;;  %v10517_v41 = vld [vmem:[%s11991_s27 + $0x4f0] sm:$0xff]  }
 0x4c3   : > { %9225 = vmatprep.subr.bf16.mxu1 %v10481_v42 }
 0x4c5   : > { %9204 = vmatpush3.bf16.msra.mxu0 %v10482_v13  ;;  %v2631_v13 = vrot.slane %v12384_v31, %v11649_v2 }
 0x4c6   : > { %9226 = vmatpush3.bf16.msra.mxu1 %v10483_v46  ;;  %9205 = vmatprep.subr.bf16.mxu0 %v10484_v49  ;;  %v2639_v46 = vrot.slane %v12384_v31, %v12067_v35 }
 0x4c7   : > { %9227 = vmatprep.subr.bf16.mxu1 %v10485_v33  ;;  %v4647_v33 = vadd.f32 %v12291_v0, %v2611_v12  ;;  %v2635_v12 = vrot.slane %v12384_v31, %v12176_v44 }
 0x4c9   : > { %9206 = vmatpush3.bf16.msra.mxu0 %v10486_v38  ;;  %v10519_v38 = vld [vmem:[%s11991_s27 + $0x4b0] sm:$0xff]   ;;  %v5514_v0 = vmax.f32 %v4647_v33, 0.0  ;;  %v10557_v33 = vld [vmem:[%s11991_s27 + $0x6c0] sm:$0xff]  }
 0x4ca   : > { %9228 = vmatpush3.bf16.msra.mxu1 %v10487_v63  ;;  %9207 = vmatprep.subr.bf16.mxu0 %v10488_v9  ;;  %v4688_v63 = vadd.f32 %v12296_v60, %v2619_v21 }
 0x4cb   : > { %9229 = vmatprep.subr.bf16.mxu1 %v10489_v57  ;;  %v5542_v17 = vpack.c.bf16 %v5514_v0, %v5514_v0  ;;  %v10567_v0 = vld [vmem:[%s11991_s27 + $0x690] sm:$0xff]  }
 0x4cd   : > { %9208 = vmatpush3.bf16.msra.mxu0 %v10490_v52  ;;  %v10523_v52 = vld [vmem:[%s11991_s27 + $0x4b8] sm:$0xff]  }
 0x4ce   : > { %9230 = vmatpush3.bf16.msra.mxu1 %v10491_v4  ;;  %9237 = vmatprep.subr.bf16.mxu0 %v10492_v15  ;;  %v5516_v4 = vmax.f32 %v4688_v63, 0.0  ;;  %v10525_v15 = vld [vmem:[%s11991_s27 + $0x5c0] sm:$0xff]   ;;  %v10561_v63 = vld [vmem:[%s11991_s27 + $0x6c8] sm:$0xff]  }
 0x4cf   : > { %9259 = vmatprep.subr.bf16.mxu1 %v10493_v55  ;;  %v10526_v55 = vld [vmem:[%s11991_s27 + $0x500] sm:$0xff]  }
 0x4d0   : > { %7092 = vmatmul.mubr.bf16.vlgmr.msra.gmra.mrb[72].mxu0 %v5538_v36  ;;  %v10528_v36 = vld [vmem:[%s11991_s27 + $0x548] sm:$0xff]  }
 0x4d1   : > { %7132 = vmatmul.mubr.bf16.vlgmr.msra.gmra.mrb[64].mxu1 %v5540_v18  ;;  %9238 = vmatpush3.bf16.msra.mxu0 %v10494_v61  ;;  %v5544_v61 = vpack.c.bf16 %v5516_v4, %v5516_v4  ;;  %v10529_v18 = vld [vmem:[%s11991_s27 + $0x5c8] sm:$0xff]   ;;  %v10570_v4 = vld [vmem:[%s11991_s27 + $0x618] sm:$0xff]  }
 0x4d2   : > { %7363 = vmatprep.mubr.bf16.mxu0 %v5543_v19  ;;  %9260 = vmatpush3.bf16.msra.mxu1 %v10495_v48  ;;  %v10530_v19 = vld [vmem:[%s11991_s27 + $0x508] sm:$0xff]  }
 0x4d3   : > { %7403 = vmatprep.mubr.bf16.mxu1 %v5545_v51  ;;  %9239 = vmatprep.subr.bf16.mxu0 %v10496_v37  ;;  %v10532_v51 = vld [vmem:[%s11991_s27 + $0x550] sm:$0xff]  }
 0x4d4   : > { %9261 = vmatprep.subr.bf16.mxu1 %v10497_v8  ;;  %v10531_v8 = vld [vmem:[%s11991_s27 + $0x588] sm:$0xff]  }
 0x4d5   : > { %9240 = vmatpush3.bf16.msra.mxu0 %v10498_v6  ;;  %v10533_v6 = vld [vmem:[%s11991_s27 + $0x5d0] sm:$0xff]  }
 0x4d6   : > { %9262 = vmatpush3.bf16.msra.mxu1 %v10499_v11  ;;  %9241 = vmatprep.subr.bf16.mxu0 %v10500_v58  ;;  %v10534_v11 = vld [vmem:[%s11991_s27 + $0x510] sm:$0xff]  }
 0x4d7   : > { %9263 = vmatprep.subr.bf16.mxu1 %v10501_v20  ;;  %v10535_v58 = vld [vmem:[%s11991_s27 + $0x590] sm:$0xff]   ;;  %v10536_v20 = vld [vmem:[%s11991_s27 + $0x558] sm:$0xff]  }
 0x4d9   : > { %9242 = vmatpush3.bf16.msra.mxu0 %v10502_v47  ;;  %v10537_v47 = vld [vmem:[%s11991_s27 + $0x5d8] sm:$0xff]  }
 0x4da   : > { %9264 = vmatpush3.bf16.msra.mxu1 %v10503_v53  ;;  %9243 = vmatprep.subr.bf16.mxu0 %v10504_v7  ;;  %v10538_v53 = vld [vmem:[%s11991_s27 + $0x518] sm:$0xff]  }
 0x4db   : > { %9265 = vmatprep.subr.bf16.mxu1 %v10505_v22  ;;  %v10539_v7 = vld [vmem:[%s11991_s27 + $0x598] sm:$0xff]   ;;  %v10540_v22 = vld [vmem:[%s11991_s27 + $0x560] sm:$0xff]  }
 0x4dd   : > { %9244 = vmatpush3.bf16.msra.mxu0 %v10506_v40  ;;  %v10541_v40 = vld [vmem:[%s11991_s27 + $0x5e0] sm:$0xff]  }
 0x4de   : > { %9266 = vmatpush3.bf16.msra.mxu1 %v10507_v23  ;;  %9245 = vmatprep.subr.bf16.mxu0 %v10508_v39  ;;  %v10542_v23 = vld [vmem:[%s11991_s27 + $0x520] sm:$0xff]  }
 0x4df   : > { %9267 = vmatprep.subr.bf16.mxu1 %v10509_v27  ;;  %v10543_v39 = vld [vmem:[%s11991_s27 + $0x5a0] sm:$0xff]   ;;  %v10544_v27 = vld [vmem:[%s11991_s27 + $0x568] sm:$0xff]  }
 0x4e1   : > { %9246 = vmatpush3.bf16.msra.mxu0 %v10510_v56  ;;  %v10545_v56 = vld [vmem:[%s11991_s27 + $0x5e8] sm:$0xff]  }
 0x4e2   : > { %9268 = vmatpush3.bf16.msra.mxu1 %v10511_v28  ;;  %9247 = vmatprep.subr.bf16.mxu0 %v10512_v29  ;;  %v10546_v28 = vld [vmem:[%s11991_s27 + $0x528] sm:$0xff]   ;;  %v2627_v29 = vrot.slane %v12384_v31, %v11645_v1  ;;  %v10554_v31 = vld [vmem:[%s11991_s27 + $0x538] sm:$0xff]  }
 0x4e3   : > { %v12393_v25 = vpop.f32.mrb[52].mxu0  ;;  %9269 = vmatprep.subr.bf16.mxu1 %v10513_v30  ;;  %v10547_v30 = vld [vmem:[%s11991_s27 + $0x5a8] sm:$0xff]  }
 0x4e4   : > { %v12396_v42 = vpop.f32.mrb[44].mxu1  ;;  %v5050_v45 = vpop.f32.mrb[53].mxu0  ;;  %v5049_v21 = vadd.f32 %v12393_v25, %v2627_v29  ;;  %v10556_v25 = vld [vmem:[%s11991_s27 + $0x640] sm:$0xff]   ;;  %v10585_v29 = vld [vmem:[%s11991_s27 + $0x6f8] sm:$0xff]  }
 0x4e5   : > { %v5091_v49 = vpop.f32.mrb[45].mxu1  ;;  %v5052_v50 = vpop.f32.mrb[54].mxu0  ;;  %9248 = vmatpush3.bf16.msra.mxu0 %v10514_v32  ;;  %v5051_v57 = vadd.f32 %v5050_v45, %v2631_v13  ;;  %v10548_v32 = vld [vmem:[%s11991_s27 + $0x570] sm:$0xff]   ;;  %v10552_v13 = vld [vmem:[%s11991_s27 + $0x578] sm:$0xff]   ;;  %v5090_v45 = vadd.f32 %v12396_v42, %v2635_v12 }
 0x4e6   : > { %v5093_v59 = vpop.f32.mrb[46].mxu1  ;;  %9270 = vmatpush3.bf16.msra.mxu1 %v10515_v3  ;;  %v5053_v16 = vpop.f32.mrb[55].mxu0  ;;  %9249 = vmatprep.subr.bf16.mxu0 %v10516_v34  ;;  %v5092_v10 = vadd.f32 %v5091_v49, %v2639_v46  ;;  %v10549_v3 = vld [vmem:[%s11991_s27 + $0x5f0] sm:$0xff]   ;;  %v10553_v46 = vld [vmem:[%s11991_s27 + $0x5f8] sm:$0xff]   ;;  %v5518_v49 = vmax.f32 %v5049_v21, 0.0 }
 0x4e7   : > { %v5094_v9 = vpop.f32.mrb[47].mxu1  ;;  %9271 = vmatprep.subr.bf16.mxu1 %v10517_v41  ;;  %v5519_v60 = vmax.f32 %v5051_v57, 0.0  ;;  %v10550_v34 = vld [vmem:[%s11991_s27 + $0x530] sm:$0xff]   ;;  %v10555_v50 = vld [vmem:[%s11991_s27 + $0x5b8] sm:$0xff]   ;;  %v10558_v59 = vld [vmem:[%s11991_s27 + $0x600] sm:$0xff]  }
 0x4e8   : > { %v5521_v5 = vmax.f32 %v5092_v10, 0.0  ;;  %v10551_v41 = vld [vmem:[%s11991_s27 + $0x5b0] sm:$0xff]   ;;  %v5546_v42 = vpack.c.bf16 %v5518_v49, %v5518_v49  ;;  %v10559_v16 = vld [vmem:[%s11991_s27 + $0x680] sm:$0xff]   ;;  %v10562_v9 = vld [vmem:[%s11991_s27 + $0x608] sm:$0xff]  }
 0x4e9   : > { %9250 = vmatpush3.bf16.msra.mxu0 %v10518_v43  ;;  %v5547_v48 = vpack.c.bf16 %v5519_v60, %v5519_v60  ;;  %v5520_v43 = vmax.f32 %v5090_v45, 0.0  ;;  %v10564_v57 = vld [vmem:[%s11991_s27 + $0x650] sm:$0xff]   ;;  %v10572_v60 = vld [vmem:[%s11991_s27 + $0x660] sm:$0xff]   ;;  %v10586_v12 = vld [vmem:[%s11991_s27 + $0x638] sm:$0xff]  }
 0x4ea   : > { %9272 = vmatpush3.bf16.msra.mxu1 %v10519_v38  ;;  %9251 = vmatprep.subr.bf16.mxu0 %v10520_v62  ;;  %v5549_v37 = vpack.c.bf16 %v5521_v5, %v5521_v5  ;;  %v10560_v38 = vld [vmem:[%s11991_s27 + $0x648] sm:$0xff]   ;;  %v10565_v10 = vld [vmem:[%s11991_s27 + $0x6d0] sm:$0xff]   ;;  %v10573_v5 = vld [vmem:[%s11991_s27 + $0x6e0] sm:$0xff]  }
 0x4eb   : > { %9273 = vmatprep.subr.bf16.mxu1 %v10521_v26  ;;  %v5548_v62 = vpack.c.bf16 %v5520_v43, %v5520_v43  ;;  %v10563_v26 = vld [vmem:[%s11991_s27 + $0x688] sm:$0xff]   ;;  %v10587_v21 = vld [vmem:[%s11991_s27 + $0x6b8] sm:$0xff]  }
 0x4ec   : > { %v8796_v49 = vld [vmem:[%s11390_s11] ss:$0 sm:$0xff] }
 0x4ed   : > { %9252 = vmatpush3.bf16.msra.mxu0 %v10522_v14  ;;  %v10566_v14 = vld [vmem:[%s11991_s27 + $0x610] sm:$0xff]  }
 0x4ee   : > { %9274 = vmatpush3.bf16.msra.mxu1 %v10523_v52  ;;  %9281 = vmatprep.subr.bf16.mxu0 %v10524_v24  ;;  %v10568_v52 = vld [vmem:[%s11991_s27 + $0x658] sm:$0xff]  }
 0x4ef   : > { %9303 = vmatprep.subr.bf16.mxu1 %v10525_v15  ;;  %v10569_v24 = vld [vmem:[%s11991_s27 + $0x6d8] sm:$0xff]  }
 0x4f0   : > { %7364 = vmatmul.mubr.bf16.vlgmr.msra.gmra.mrb[76].mxu0 %v5542_v17  ;;  %v10571_v15 = vld [vmem:[%s11991_s27 + $0x698] sm:$0xff]   ;;  %v10575_v17 = vld [vmem:[%s11991_s27 + $0x6a0] sm:$0xff]  }
 0x4f1   : > { %7404 = vmatmul.mubr.bf16.vlgmr.msra.gmra.mrb[68].mxu1 %v5544_v61  ;;  %9282 = vmatpush3.bf16.msra.mxu0 %v10526_v55  ;;  %v10574_v55 = vld [vmem:[%s11991_s27 + $0x620] sm:$0xff]   ;;  %v10576_v61 = vld [vmem:[%s11991_s27 + $0x668] sm:$0xff]  }
 0x4f2   : > { %7635 = vmatprep.mubr.bf16.mxu0 %v5547_v48  ;;  %9304 = vmatpush3.bf16.msra.mxu1 %v10527_v54  ;;  %v2536_v54 = vld [vmem:[%s11387_s30 + $0x18] sm:$0xf] }
 0x4f3   : > { %7675 = vmatprep.mubr.bf16.mxu1 %v5549_v37  ;;  %9283 = vmatprep.subr.bf16.mxu0 %v10528_v36  ;;  %v10577_v36 = vld [vmem:[%s11991_s27 + $0x6e8] sm:$0xff]   ;;  %v2647_v48 = vrot.slane %v2536_v54, %v11649_v2  ;;  %v2643_v37 = vrot.slane %v2536_v54, %v11645_v1  ;;  %v10582_v1 = vld [vmem:[%s11991_s27 + $0x630] sm:$0xff]  }
 0x4f4   : > { %9305 = vmatprep.subr.bf16.mxu1 %v10529_v18  ;;  %v10578_v18 = vld [vmem:[%s11991_s27 + $0x628] sm:$0xff]  }
 0x4f5   : > { %9284 = vmatpush3.bf16.msra.mxu0 %v10530_v19  ;;  %v2655_v19 = vrot.slane %v2536_v54, %v12067_v35 }
 0x4f6   : > { %9306 = vmatpush3.bf16.msra.mxu1 %v10531_v8  ;;  %9285 = vmatprep.subr.bf16.mxu0 %v10532_v51  ;;  %v10579_v8 = vld [vmem:[%s11991_s27 + $0x6a8] sm:$0xff]   ;;  %v10580_v51 = vld [vmem:[%s11991_s27 + $0x670] sm:$0xff]  }
 0x4f7   : > { %9307 = vmatprep.subr.bf16.mxu1 %v10533_v6 }
 0x4f9   : > { %9286 = vmatpush3.bf16.msra.mxu0 %v10534_v11  ;;  %v2651_v11 = vrot.slane %v2536_v54, %v12176_v44  ;;  %v10583_v44 = vld [vmem:[%s11991_s27 + $0x6b0] sm:$0xff]  }
 0x4fa   : > { %9308 = vmatpush3.bf16.msra.mxu1 %v10535_v58  ;;  %9287 = vmatprep.subr.bf16.mxu0 %v10536_v20  ;;  %v10581_v58 = vld [vmem:[%s11991_s27 + $0x6f0] sm:$0xff]  }
 0x4fb   : > { %9309 = vmatprep.subr.bf16.mxu1 %v10537_v47 }
 0x4fd   : > { %9288 = vmatpush3.bf16.msra.mxu0 %v10538_v53 }
 0x4fe   : > { %9310 = vmatpush3.bf16.msra.mxu1 %v10539_v7  ;;  %9289 = vmatprep.subr.bf16.mxu0 %v10540_v22 }
 0x4ff   : > { %9311 = vmatprep.subr.bf16.mxu1 %v10541_v40 }
 0x501   : > { %9290 = vmatpush3.bf16.msra.mxu0 %v10542_v23 }
 0x502   : > { %9312 = vmatpush3.bf16.msra.mxu1 %v10543_v39  ;;  %9291 = vmatprep.subr.bf16.mxu0 %v10544_v27  ;;  %v10584_v39 = vld [vmem:[%s11991_s27 + $0x678] sm:$0xff]  }
 0x503   : > { %9313 = vmatprep.subr.bf16.mxu1 %v10545_v56 }
 0x505   : > { %9292 = vmatpush3.bf16.msra.mxu0 %v10546_v28 }
 0x506   : > { %9314 = vmatpush3.bf16.msra.mxu1 %v10547_v30  ;;  %9293 = vmatprep.subr.bf16.mxu0 %v10548_v32 }
 0x507   : > { %9315 = vmatprep.subr.bf16.mxu1 %v10549_v3 }
 0x509   : > { %9294 = vmatpush3.bf16.msra.mxu0 %v10550_v34 }
 0x50a   : > { %9316 = vmatpush3.bf16.msra.mxu1 %v10551_v41  ;;  %9295 = vmatprep.subr.bf16.mxu0 %v10552_v13 }
 0x50b   : > { %9317 = vmatprep.subr.bf16.mxu1 %v10553_v46 }
 0x50d   : > { %9296 = vmatpush3.bf16.msra.mxu0 %v10554_v31 }
 0x50e   : > { %9318 = vmatpush3.bf16.msra.mxu1 %v10555_v50  ;;  %9325 = vmatprep.subr.bf16.mxu0 %v10556_v25 }
 0x50f   : > { %9347 = vmatprep.subr.bf16.mxu1 %v10557_v33 }
 0x510   : > { %7636 = vmatmul.mubr.bf16.vlgmr.msra.gmra.mrb[80].mxu0 %v5546_v42 }
 0x511   : > { %7676 = vmatmul.mubr.bf16.vlgmr.msra.gmra.mrb[72].mxu1 %v5548_v62  ;;  %9326 = vmatpush3.bf16.msra.mxu0 %v10558_v59 }
 0x512   : > { %9348 = vmatpush3.bf16.msra.mxu1 %v10559_v16  ;;  %9327 = vmatprep.subr.bf16.mxu0 %v10560_v38 }
 0x513   : > { %9349 = vmatprep.subr.bf16.mxu1 %v10561_v63 }
 0x515   : > { %9328 = vmatpush3.bf16.msra.mxu0 %v10562_v9 }
 0x516   : > { %9350 = vmatpush3.bf16.msra.mxu1 %v10563_v26  ;;  %9329 = vmatprep.subr.bf16.mxu0 %v10564_v57  ;;  %v8797_v57 = vld [vmem:[%s11390_s11 + $0x1] ss:$0 sm:$0xff] }
 0x517   : > { %9351 = vmatprep.subr.bf16.mxu1 %v10565_v10 }
 0x519   : > { %9330 = vmatpush3.bf16.msra.mxu0 %v10566_v14 }
 0x51a   : > { %9352 = vmatpush3.bf16.msra.mxu1 %v10567_v0  ;;  %9331 = vmatprep.subr.bf16.mxu0 %v10568_v52 }
 0x51b   : > { %9353 = vmatprep.subr.bf16.mxu1 %v10569_v24 }
 0x51d   : > { %9332 = vmatpush3.bf16.msra.mxu0 %v10570_v4 }
 0x51e   : > { %9354 = vmatpush3.bf16.msra.mxu1 %v10571_v15  ;;  %9333 = vmatprep.subr.bf16.mxu0 %v10572_v60 }
 0x51f   : > { %9355 = vmatprep.subr.bf16.mxu1 %v10573_v5 }
 0x521   : > { %9334 = vmatpush3.bf16.msra.mxu0 %v10574_v55 }
 0x522   : > { %9356 = vmatpush3.bf16.msra.mxu1 %v10575_v17  ;;  %9335 = vmatprep.subr.bf16.mxu0 %v10576_v61  ;;  %v8798_v61 = vld [vmem:[%s11390_s11 + $0x2] ss:$0 sm:$0xff] }
 0x523   : > { %v5450_v6 = vpop.f32.mrb[56].mxu0  ;;  %9357 = vmatprep.subr.bf16.mxu1 %v10577_v36 }
 0x524   : > { %v5491_v20 = vpop.f32.mrb[48].mxu1  ;;  %v5452_v47 = vpop.f32.mrb[57].mxu0  ;;  %v5451_v22 = vadd.f32 %v5450_v6, %v2643_v37 }
 0x525   : > { %v5453_v2 = vadd.f32 %v5452_v47, %v2647_v48  ;;  %v5493_v53 = vpop.f32.mrb[49].mxu1  ;;  %v5454_v7 = vpop.f32.mrb[58].mxu0  ;;  %9336 = vmatpush3.bf16.msra.mxu0 %v10578_v18  ;;  %v5492_v27 = vadd.f32 %v5491_v20, %v2651_v11 }
 0x526   : > { %v5494_v35 = vadd.f32 %v5493_v53, %v2655_v19  ;;  %v5495_v40 = vpop.f32.mrb[50].mxu1  ;;  %9358 = vmatpush3.bf16.msra.mxu1 %v10579_v8  ;;  %v5455_v23 = vpop.f32.mrb[59].mxu0  ;;  %9337 = vmatprep.subr.bf16.mxu0 %v10580_v51  ;;  %v5522_v3 = vmax.f32 %v5451_v22, 0.0 }
 0x527   : > { %v5523_v56 = vmax.f32 %v5453_v2, 0.0  ;;  %v5496_v28 = vpop.f32.mrb[51].mxu1  ;;  %9359 = vmatprep.subr.bf16.mxu1 %v10581_v58  ;;  %v5524_v41 = vmax.f32 %v5492_v27, 0.0  ;;  %v8799_v2 = vld [vmem:[%s11390_s11 + $0x3] ss:$0 sm:$0xff] }
 0x528   : > { %v5525_v30 = vmax.f32 %v5494_v35, 0.0  ;;  %v5550_v13 = vpack.c.bf16 %v5522_v3, %v5522_v3 }
 0x529   : > { %v5551_v32 = vpack.c.bf16 %v5523_v56, %v5523_v56  ;;  %9338 = vmatpush3.bf16.msra.mxu0 %v10582_v1  ;;  %v5552_v45 = vpack.c.bf16 %v5524_v41, %v5524_v41 }
 0x52a   : > { %v5553_v34 = vpack.c.bf16 %v5525_v30, %v5525_v30  ;;  %9360 = vmatpush3.bf16.msra.mxu1 %v10583_v44  ;;  %9339 = vmatprep.subr.bf16.mxu0 %v10584_v39 }
 0x52b   : > { %7907 = vmatprep.mubr.bf16.mxu0 %v5551_v32  ;;  %9361 = vmatprep.subr.bf16.mxu1 %v10585_v29  ;;  %v8800_v29 = vld [vmem:[%s11390_s11 + $0x4] ss:$0 sm:$0xff] }
 0x52c   : > { %7947 = vmatprep.mubr.bf16.mxu1 %v5553_v34 }
 0x52d   : > { %9340 = vmatpush3.bf16.msra.mxu0 %v10586_v12 }
 0x52e   : > { %9362 = vmatpush3.bf16.msra.mxu1 %v10587_v21 }
 0x530   : > { %7908 = vmatmul.mubr.bf16.vlgmr.msra.gmra.mrb[84].mxu0 %v5550_v13 }
 0x531   : > { %7948 = vmatmul.mubr.bf16.vlgmr.msra.gmra.mrb[76].mxu1 %v5552_v45 }
 0x543   : > { %v9077_v46 = vpop.f32.mrb[60].mxu0 }
 0x544   : > { %v9099_v31 = vpop.f32.mrb[52].mxu1  ;;  %v9078_v50 = vpop.f32.mrb[61].mxu0 }
 0x545   : > { %v9079_v25 = vadd.f32 %v9078_v50, %v9077_v46  ;;  %v9100_v43 = vpop.f32.mrb[53].mxu1  ;;  %v9080_v33 = vpop.f32.mrb[62].mxu0  ;;  %v8801_v50 = vld [vmem:[%s11390_s11 + $0x5] ss:$0 sm:$0xff] }
 0x546   : > { %v9101_v59 = vadd.f32 %v9100_v43, %v9099_v31  ;;  %v9102_v42 = vpop.f32.mrb[54].mxu1  ;;  %v9081_v16 = vpop.f32.mrb[63].mxu0 }
 0x547   : > { %v6278_v38 = vadd.f32 %v9079_v25, %v8796_v49  ;;  %v9103_v62 = vpop.f32.mrb[55].mxu1 }
 0x549   : > { %v6318_v63 = vadd.f32 %v9101_v59, %v6278_v38 }
 0x54b   : > { %7956 = vst.msk [vmem:[%s12488_s19] sm:$0x3] %vm7955_vm3, %v6318_v63 }
 0x563   : > { %v9121_v9 = vpop.f32.mrb[64].mxu0 }
 0x564   : > { %v9143_v26 = vpop.f32.mrb[56].mxu1  ;;  %v9122_v10 = vpop.f32.mrb[65].mxu0 }
 0x565   : > { %v9123_v14 = vadd.f32 %v9122_v10, %v9121_v9  ;;  %v9144_v0 = vpop.f32.mrb[57].mxu1  ;;  %v9124_v52 = vpop.f32.mrb[66].mxu0  ;;  %v8802_v10 = vld [vmem:[%s11390_s11 + $0x6] ss:$0 sm:$0xff] }
 0x566   : > { %v9145_v24 = vadd.f32 %v9144_v0, %v9143_v26  ;;  %v9146_v4 = vpop.f32.mrb[58].mxu1  ;;  %v9125_v15 = vpop.f32.mrb[67].mxu0 }
 0x567   : > { %v6550_v60 = vadd.f32 %v9123_v14, %v8797_v57  ;;  %v9147_v5 = vpop.f32.mrb[59].mxu1 }
 0x569   : > { %v6590_v55 = vadd.f32 %v9145_v24, %v6550_v60 }
 0x56b   : > { %7957 = vst.msk [vmem:[%s12488_s19 + $0x2] sm:$0x3] %vm7955_vm3, %v6590_v55 }
 0x583   : > { %v9165_v17 = vpop.f32.mrb[68].mxu0 }
 0x584   : > { %v9187_v54 = vpop.f32.mrb[60].mxu1  ;;  %v9166_v36 = vpop.f32.mrb[69].mxu0 }
 0x585   : > { %v9167_v48 = vadd.f32 %v9166_v36, %v9165_v17  ;;  %v9188_v18 = vpop.f32.mrb[61].mxu1  ;;  %v9168_v37 = vpop.f32.mrb[70].mxu0 }
 0x586   : > { %v9189_v19 = vadd.f32 %v9188_v18, %v9187_v54  ;;  %v9190_v8 = vpop.f32.mrb[62].mxu1  ;;  %v9169_v51 = vpop.f32.mrb[71].mxu0 }
 0x587   : > { %v6822_v6 = vadd.f32 %v9167_v48, %v8798_v61  ;;  %v9191_v11 = vpop.f32.mrb[63].mxu1 }
 0x589   : > { %v6862_v58 = vadd.f32 %v9189_v19, %v6822_v6 }
 0x58b   : > { %7958 = vst.msk [vmem:[%s12488_s19 + $0x4] sm:$0x3] %vm7955_vm3, %v6862_v58 }
 0x5a3   : > { %v9209_v20 = vpop.f32.mrb[72].mxu0 }
 0x5a4   : > { %v9231_v47 = vpop.f32.mrb[64].mxu1  ;;  %v9210_v53 = vpop.f32.mrb[73].mxu0 }
 0x5a5   : > { %v9211_v7 = vadd.f32 %v9210_v53, %v9209_v20  ;;  %v9232_v1 = vpop.f32.mrb[65].mxu1  ;;  %v9212_v22 = vpop.f32.mrb[74].mxu0 }
 0x5a6   : > { %v9233_v35 = vadd.f32 %v9232_v1, %v9231_v47  ;;  %v9234_v40 = vpop.f32.mrb[66].mxu1  ;;  %v9213_v23 = vpop.f32.mrb[75].mxu0 }
 0x5a7   : > { %v7094_v44 = vadd.f32 %v9211_v7, %v8799_v2  ;;  %v9235_v39 = vpop.f32.mrb[67].mxu1 }
 0x5a9   : > { %v7134_v27 = vadd.f32 %v9233_v35, %v7094_v44 }
 0x5ab   : > { %7959 = vst.msk [vmem:[%s12488_s19 + $0x6] sm:$0x3] %vm7955_vm3, %v7134_v27 }
 0x5c3   : > { %v9253_v56 = vpop.f32.mrb[76].mxu0 }
 0x5c4   : > { %v9275_v28 = vpop.f32.mrb[68].mxu1  ;;  %v9254_v30 = vpop.f32.mrb[77].mxu0 }
 0x5c5   : > { %v9255_v32 = vadd.f32 %v9254_v30, %v9253_v56  ;;  %v9276_v12 = vpop.f32.mrb[69].mxu1  ;;  %v9256_v3 = vpop.f32.mrb[78].mxu0 }
 0x5c6   : > { %v9277_v34 = vadd.f32 %v9276_v12, %v9275_v28  ;;  %v9278_v21 = vpop.f32.mrb[70].mxu1  ;;  %v9257_v41 = vpop.f32.mrb[79].mxu0 }
 0x5c7   : > { %v7366_v13 = vadd.f32 %v9255_v32, %v8800_v29  ;;  %v9279_v45 = vpop.f32.mrb[71].mxu1 }
 0x5c9   : > { %v7406_v46 = vadd.f32 %v9277_v34, %v7366_v13 }
 0x5cb   : > { %7960 = vst.msk [vmem:[%s12488_s19 + $0x8] sm:$0x3] %vm7955_vm3, %v7406_v46 }
 0x5e3   : > { %v9297_v31 = vpop.f32.mrb[80].mxu0 }
 0x5e4   : > { %v9319_v49 = vpop.f32.mrb[72].mxu1  ;;  %v9298_v25 = vpop.f32.mrb[81].mxu0 }
 0x5e5   : > { %v9299_v43 = vadd.f32 %v9298_v25, %v9297_v31  ;;  %v9320_v33 = vpop.f32.mrb[73].mxu1  ;;  %v9300_v59 = vpop.f32.mrb[82].mxu0 }
 0x5e6   : > { %v9321_v42 = vadd.f32 %v9320_v33, %v9319_v49  ;;  %v9322_v16 = vpop.f32.mrb[74].mxu1  ;;  %v9301_v38 = vpop.f32.mrb[83].mxu0 }
 0x5e7   : > { %v7638_v62 = vadd.f32 %v9299_v43, %v8801_v50  ;;  %v9323_v63 = vpop.f32.mrb[75].mxu1 }
 0x5e9   : > { %v7678_v9 = vadd.f32 %v9321_v42, %v7638_v62 }
 0x5eb   : > { %7961 = vst.msk [vmem:[%s12488_s19 + $0xa] sm:$0x3] %vm7955_vm3, %v7678_v9 }
 0x603   : > { %v9341_v26 = vpop.f32.mrb[84].mxu0 }
 0x604   : > { %v9363_v57 = vpop.f32.mrb[76].mxu1  ;;  %v9342_v14 = vpop.f32.mrb[85].mxu0 }
 0x605   : > { %v9343_v0 = vadd.f32 %v9342_v14, %v9341_v26  ;;  %v9364_v52 = vpop.f32.mrb[77].mxu1  ;;  %v9344_v24 = vpop.f32.mrb[86].mxu0 }
 0x606   : > { %v9365_v4 = vadd.f32 %v9364_v52, %v9363_v57  ;;  %v9366_v15 = vpop.f32.mrb[78].mxu1  ;;  %v9345_v60 = vpop.f32.mrb[87].mxu0 }
 0x607   : > { %v7910_v5 = vadd.f32 %v9343_v0, %v8802_v10  ;;  %v9367_v55 = vpop.f32.mrb[79].mxu1 }
 0x609   : > { %v7950_v17 = vadd.f32 %v9365_v4, %v7910_v5 }
 0x60b   : > { %7962 = vst.msk [vmem:[%s12488_s19 + $0xc] sm:$0x3] %vm7955_vm3, %v7950_v17 }
 0x60c   : > { %10839 = shalt.err (!%p10836_p6)
}
 0x60d   : > { %s10840_s1 = scalar_lea.hbm %s12513_s26, 224  ;;  %s10844_s11 = scalar_lea.hbm %s12570_s9, 448 }
 0x60e   : > { %p10841_p8 = scmp.ne.s32.totalorder %s12513_s26, %s10840_s1  ;;  %p10845_p0 = scmp.lt.u32.totalorder %s12513_s26, %s12570_s9 }
 0x60f   : > { %p10846_p12 = scmp.lt.u32.totalorder %s10844_s11, %s10840_s1  ;;  %p10848_p3 = scmp.lt.u32.totalorder %s10840_s1, %s12513_s26 }
 0x610   : > { %p10842_p9 = pnand %p10841_p8, %p12633_p1 }
 0x611   : > { %p10847_p5 = por %p10846_p12, %p10845_p0 }
 0x612   : > { %p10843_p10 = pneg %p10842_p9 }
 0x613   : > { %p10849_p4 = por %p10848_p3, %p10847_p5 }
 0x615   : > { %p10850_p2 = pnand %p10849_p4, %p10843_p10 }
 0x617   : > { %10853 = shalt.err (!%p10850_p2)
}
 0x618   : > { %s10931_s20 = smov 32   ;;  %s10932_s18 = smov 2  }
 0x619   : > { %9441 = dma.vmem_to_hbm [thread:$0]  (%p12633_p1), %s12515_s15, 224, %s12513_s26, %s7964_s23, %s10931_s20, %s10931_s20, %s10932_s18  }
 0x61a PF: > { %s12634_s27 = sld [smem:[#allocation23_spill]]  ;;  %s12635_s19 = sld [smem:[#allocation27_spill]] }
 0x61b   : > { %p12637_p13 = scmp.ge.s32.totalorder %s10908_s12, 2 }
 0x620   : > { %s7992_s25 = sand.u32 1, %s12634_s27   ;;  %p12636_p7 = scmp.ne.s32.totalorder %s12635_s19, 0 }
 0x621   : > { %s7993_s13 = scalar_lea.sflag [#allocation4], %s7992_s25 }
 0x622   : > { %p9470_p11 = pnand %p12637_p13, %p12636_p7 }
 0x624   : > { %10891 = dma.done.wait (!%p9470_p11), %s7993_s13, 224  }
 0x625   : > { %10893 = vsyncadd (!%p9470_p11), %s7993_s13, 4294967072  ;;  %s12638_s12 = sld [smem:[#allocation25_spill]]  ;;  %s12639_s17 = sld [smem:[#allocation24_spill]] }
 0x626   : > { %s12640_s11 = sld [smem:[#allocation26_spill]]  ;;  %s12641_s30 = smov %s10900_s10 }
 0x62b   : > { %p32_p6 = scmp.ge.s32.totalorder %s12638_s12, 4   ;;  %s12642_s10 = smov %s12639_s17 }
 0x62d   :  { %34 = sbr.rel (!%p32_p6) target bundleno = 16 (0x10), region = 181 }
 0x634   :  { %7998 = vsyncpa [#allocation3], 1 }
 0x635   :  { %8000 = vsyncpa [#allocation3 + $0x1], 1 }
 0x636   :  { %8001 = vsyncpa [#allocation6], 1 }
 0x637   :  { %8003 = vsyncpa [#allocation6 + $0x1], 1 }
 0x638   :  { %8004 = vsyncpa [#allocation9], 1 }
 0x639   :  { %8006 = vsyncpa [#allocation9 + $0x1], 1 }
 0x63a   :  { %8007 = vsyncpa [#allocation12], 1 }
 0x63b   :  { %8009 = vsyncpa [#allocation12 + $0x1], 1 }
 0x63c   :  { %8010 = vsyncpa [#allocation15], 1 }
 0x63d   :  { %8012 = vsyncpa [#allocation15 + $0x1], 1 }
 0x63e   :  { %8013 = vsyncpa [#allocation4], 1 }
 0x63f   :  { %8015 = vsyncpa [#allocation4 + $0x1], 1 }

</bundles_post_ra>
